<compile_context>
chip_gen: v5e
topology: v5e:2x2
jax: 0.10.0
libtpu: 0.0.40
codegen_flags: <defaults>
</compile_context>

<pallas_src>
import functools

import jax
import jax.numpy as jnp
from jax.experimental import pallas as pl
from jax.experimental.pallas import tpu as pltpu

# ---------------- configuration (matches TabNetDA defaults) ----------------
INPUT_DIM = 16        # input_dim
INTER_DIM = 32        # intermediate_dim (tabnet output / classifier input)
OUTPUT_DIM = 5        # output_dim (class logits)
N_D = 8
N_A = 8
N_STEPS = 3
GAMMA = 1.3
EPSILON = 1e-15
N_INDEPENDENT = 2
N_SHARED = 2

GLU_DIM = 2 * (N_D + N_A)          # 32
SQRT_HALF = 0.7071067811865476     # torch.sqrt(0.5) in float32

BATCH_TILE = 128   # lane-dense batch tile; sweep 128..1024 for large batches


# ----------------------------- the kernel ----------------------------------
def tabnet_da_kernel(
    xT_ref,                                    # (D, TB)     input tile (transposed)
    bn0_scale_ref, bn0_shift_ref,              # (D, 1)
    w_sh0_ref, w_sh1_ref, w_spec_ref,          # (32,16), (32,16), (4,2,32,16)
    glu_scale_ref, glu_shift_ref,              # (32, 16) columns = 4*t + layer
    att_w_ref,                                 # (3, 16, 8)
    att_scale_ref, att_shift_ref,              # (16, 3) columns = step
    w_final_ref,                               # (32, 8)
    w_h1_ref, b_h1_ref,                        # (31, 32), (31, 1)  fused class/domain fc1
    wc2_ref, bc2_ref,                          # (10, 16), (10, 1)
    wc3_ref, bc3_ref,                          # (5, 10),  (5, 1)
    wd2_ref, bd2_ref,                          # (2, 15),  (2, 1)
    classT_ref, domainT_ref, ent_ref,          # (5, TB), (2, TB), (1, TB)
):
    f32 = jnp.float32
    xT = xT_ref[...]                            # (D, TB)
    TB = xT.shape[1]

    # ---- initial BatchNorm1d (eval mode, folded affine) ----
    x_bn = xT * bn0_scale_ref[...] + bn0_shift_ref[...]

    def glu_layer(h, w, col):
        # h: (in, TB), w: (32, in)  ->  (16, TB)
        y = jnp.dot(w, h, preferred_element_type=f32)
        y = y * glu_scale_ref[:, col:col + 1] + glu_shift_ref[:, col:col + 1]
        a = y[:N_D + N_A, :]
        g = y[N_D + N_A:, :]
        # sigmoid via EUP approximate reciprocal (frees VALU slots)
        return a * pl.reciprocal(1.0 + jnp.exp(-g), approx=True)

    def feat_transformer(h, t):
        # shared GLU block (first=True, n_shared=2 layers, shared fc weights)
        h = glu_layer(h, w_sh0_ref[...], 4 * t + 0)
        h = (h + glu_layer(h, w_sh1_ref[...], 4 * t + 1)) * SQRT_HALF
        # independent GLU block (n_independent=2 layers) -- use-site ref slices
        for l in range(N_INDEPENDENT):
            h = (h + glu_layer(h, w_spec_ref[t, l], 4 * t + 2 + l)) * SQRT_HALF
        return h                                 # (n_d + n_a, TB)

    def sparsemax(zin):
        # sparsemax along the feature axis (axis 0); sort-free, D-step
        # accumulation so all elementwise work runs on full 128-wide lanes.
        z = zin - jnp.max(zin, axis=0, keepdims=True)
        r = jnp.zeros_like(z)
        s = jnp.zeros_like(z)
        for j in range(INPUT_DIM):
            zj = z[j:j + 1, :]                   # (1, TB)
            ge = (zj >= z).astype(f32)           # (D, TB)
            r = r + ge
            s = s + ge * zj
        in_sup = (1.0 + r * z > s).astype(f32)
        k = jnp.sum(in_sup, axis=0, keepdims=True)
        sup_sum = jnp.sum(z * in_sup, axis=0, keepdims=True)
        tau = (sup_sum - 1.0) / k
        return jnp.maximum(z - tau, 0.0)

    # ---- TabNet steps ----
    prior = jnp.ones_like(x_bn)
    out = feat_transformer(x_bn, 0)              # initial splitter
    att = out[N_D:, :]                           # (n_a, TB)
    ent_acc = jnp.zeros((1, TB), dtype=f32)      # per-sample entropy, summed over steps
    steps_sum = jnp.zeros((N_D, TB), dtype=f32)

    for step in range(N_STEPS):
        # attentive transformer: fc -> GBN (folded) -> *prior -> sparsemax
        a = jnp.dot(att_w_ref[step], att, preferred_element_type=f32)   # (D, TB)
        a = a * att_scale_ref[:, step:step + 1] + att_shift_ref[:, step:step + 1]
        a = a * prior
        M = sparsemax(a)

        ent_acc = ent_acc + jnp.sum(M * jnp.log(M + EPSILON), axis=0, keepdims=True)

        prior = (GAMMA - M) * prior
        masked_x = M * x_bn
        out = feat_transformer(masked_x, step + 1)
        steps_sum = steps_sum + jnp.maximum(out[:N_D, :], 0.0)
        att = out[N_D:, :]

    # final mapping n_d -> intermediate_dim
    feature = jnp.dot(w_final_ref[...], steps_sum, preferred_element_type=f32)  # (32, TB)

    # ---- fused class/domain first layers ----
    h1 = jnp.maximum(
        jnp.dot(w_h1_ref[...], feature, preferred_element_type=f32) + b_h1_ref[...],
        0.0)                                     # (31, TB)
    c1 = h1[:16, :]                              # rows 0..14 class fc1, row 15 = zero pad
    d1 = h1[16:, :]                              # rows 16..30 domain fc1

    # ---- class classifier tail ----
    c2 = jnp.maximum(
        jnp.dot(wc2_ref[...], c1, preferred_element_type=f32) + bc2_ref[...], 0.0)
    classT_ref[...] = (
        jnp.dot(wc3_ref[...], c2, preferred_element_type=f32) + bc3_ref[...])

    # ---- domain classifier tail (ReverseLayerF forward == identity) ----
    domainT_ref[...] = (
        jnp.dot(wd2_ref[...], d1, preferred_element_type=f32) + bd2_ref[...])

    ent_ref[...] = ent_acc


# ----------------------------- wrapper --------------------------------------
def _const_index_map(ndim):
    zeros = (0,) * ndim
    return lambda i: zeros


@functools.partial(jax.jit, static_argnames=("batch_tile",))
def tabnet_da_forward(x, params, batch_tile=BATCH_TILE):
    B = x.shape[0]
    num_tiles = -(-B // batch_tile)
    b_pad = num_tiles * batch_tile

    xT = jnp.transpose(x).astype(jnp.float32)            # (D, B) -- batch on lanes
    if b_pad != B:
        xT = jnp.pad(xT, ((0, 0), (0, b_pad - B)))

    in_specs = [pl.BlockSpec((INPUT_DIM, batch_tile), lambda i: (0, i))]
    in_specs += [pl.BlockSpec(p.shape, _const_index_map(p.ndim)) for p in params]

    out_shape = (
        jax.ShapeDtypeStruct((OUTPUT_DIM, b_pad), jnp.float32),
        jax.ShapeDtypeStruct((2, b_pad), jnp.float32),
        jax.ShapeDtypeStruct((1, b_pad), jnp.float32),
    )
    out_specs = (
        pl.BlockSpec((OUTPUT_DIM, batch_tile), lambda i: (0, i)),
        pl.BlockSpec((2, batch_tile), lambda i: (0, i)),
        pl.BlockSpec((1, batch_tile), lambda i: (0, i)),
    )

    classT, domainT, ent = pl.pallas_call(
        tabnet_da_kernel,
        out_shape=out_shape,
        grid_spec=pl.GridSpec(grid=(num_tiles,), in_specs=in_specs, out_specs=out_specs),
        compiler_params=pltpu.CompilerParams(
            dimension_semantics=("parallel",),
            vmem_limit_bytes=32 * 1024 * 1024,
        ),
    )(xT, *params)

    class_out = classT[:, :B].T                           # (B, OUTPUT_DIM)
    domain_out = domainT[:, :B].T                         # (B, 2)
    # normalize with the GLOBAL batch size (not the tile size)
    m_loss = jnp.sum(ent[:, :B]) / (B * N_STEPS)
    return class_out, domain_out, m_loss


# --------------------- deterministic parameter init -------------------------
class _KeyGen:
    def __init__(self, key):
        self._key = key

    def __call__(self):
        self._key, sub = jax.random.split(self._key)
        return sub


def init_params(key):
    kg = _KeyGen(key)

    def nrm(shape, scale=0.2):
        return scale * jax.random.normal(kg(), shape, dtype=jnp.float32)

    def bn_affine(c):
        # eval-mode BatchNorm folded into scale/shift
        w = 1.0 + 0.1 * jax.random.normal(kg(), (c,), dtype=jnp.float32)
        b = 0.1 * jax.random.normal(kg(), (c,), dtype=jnp.float32)
        mean = 0.1 * jax.random.normal(kg(), (c,), dtype=jnp.float32)
        var = 1.0 + 0.5 * jax.random.uniform(kg(), (c,), dtype=jnp.float32)
        scale = w / jnp.sqrt(var + 1e-5)
        shift = b - mean * scale
        return scale, shift

    # initial BatchNorm1d(input_dim)  -> column vectors for the (feat, batch) layout
    s0, h0 = bn_affine(INPUT_DIM)
    bn0_scale = s0.reshape(INPUT_DIM, 1)
    bn0_shift = h0.reshape(INPUT_DIM, 1)

    # GLU BNs: (initial + n_steps) transformers x 4 GLU layers, packed by column
    gls, glh = [], []
    for _ in range((N_STEPS + 1) * 4):
        s, h = bn_affine(GLU_DIM)
        gls.append(s)
        glh.append(h)
    glu_scale = jnp.stack(gls, axis=1)          # (32, 16)  column = 4*t + layer
    glu_shift = jnp.stack(glh, axis=1)

    # attentive transformer BNs, packed by column (= step)
    als, alh = [], []
    for _ in range(N_STEPS):
        s, h = bn_affine(INPUT_DIM)
        als.append(s)
        alh.append(h)
    att_scale = jnp.stack(als, axis=1)          # (16, 3)
    att_shift = jnp.stack(alh, axis=1)          # (16, 3)

    # linear weights stored as (out_features, in_features) for Y^T = W^T X^T
    w_sh0 = nrm((GLU_DIM, INPUT_DIM))                            # shared fc 0
    w_sh1 = nrm((GLU_DIM, N_D + N_A))                            # shared fc 1
    w_spec = nrm((N_STEPS + 1, N_INDEPENDENT, GLU_DIM, N_D + N_A))
    att_w = nrm((N_STEPS, INPUT_DIM, N_A))                       # (out=D, in=n_a), no bias
    w_final = nrm((INTER_DIM, N_D))                              # no bias

    # class / domain classifier heads; fuse the two first layers (both consume
    # `feature`) with one zero row so the class/domain split is sublane-aligned.
    wc1, bc1 = nrm((15, INTER_DIM)), nrm((15, 1), 0.05)
    wd1, bd1 = nrm((15, INTER_DIM)), nrm((15, 1), 0.05)
    w_h1 = jnp.concatenate([wc1, jnp.zeros((1, INTER_DIM), jnp.float32), wd1], axis=0)  # (31, 32)
    b_h1 = jnp.concatenate([bc1, jnp.zeros((1, 1), jnp.float32), bd1], axis=0)          # (31, 1)
    wc2 = jnp.concatenate([nrm((10, 15)), jnp.zeros((10, 1), jnp.float32)], axis=1)     # (10, 16)
    bc2 = nrm((10, 1), 0.05)
    wc3, bc3 = nrm((OUTPUT_DIM, 10)), nrm((OUTPUT_DIM, 1), 0.05)
    wd2, bd2 = nrm((2, 15)), nrm((2, 1), 0.05)

    return (
        bn0_scale, bn0_shift,
        w_sh0, w_sh1, w_spec,
        glu_scale, glu_shift,
        att_w, att_scale, att_shift,
        w_final,
        w_h1, b_h1, wc2, bc2, wc3, bc3, wd2, bd2,
    )


# --------------------------- pure-JAX reference ------------------------------
def tabnet_da_reference(x, params):
    (bn0_scale, bn0_shift, w_sh0, w_sh1, w_spec, glu_scale, glu_shift,
     att_w, att_scale, att_shift, w_final, w_h1, b_h1,
     wc2, bc2, wc3, bc3, wd2, bd2) = params
    f32 = jnp.float32
    B = x.shape[0]

    def dot(a, b):
        return jnp.dot(a, b, precision="highest")

    x_bn = x * bn0_scale[:, 0] + bn0_shift[:, 0]

    def glu(h, w, col):
        y = dot(h, w.T)
        y = y * glu_scale[:, col] + glu_shift[:, col]
        return y[:, :N_D + N_A] * jax.nn.sigmoid(y[:, N_D + N_A:])

    def ft(h, t):
        h = glu(h, w_sh0, 4 * t + 0)
        h = (h + glu(h, w_sh1, 4 * t + 1)) * SQRT_HALF
        for l in range(N_INDEPENDENT):
            h = (h + glu(h, w_spec[t, l], 4 * t + 2 + l)) * SQRT_HALF
        return h

    def sparsemax(z):
        z = z - jnp.max(z, axis=-1, keepdims=True)
        ge = (z[:, None, :] >= z[:, :, None]).astype(f32)
        r = jnp.sum(ge, axis=2)
        s = jnp.sum(ge * z[:, None, :], axis=2)
        in_sup = (1.0 + r * z > s).astype(f32)
        k = jnp.sum(in_sup, axis=-1, keepdims=True)
        tau = (jnp.sum(z * in_sup, axis=-1, keepdims=True) - 1.0) / k
        return jnp.maximum(z - tau, 0.0)

    prior = jnp.ones_like(x_bn)
    out = ft(x_bn, 0)
    att = out[:, N_D:]
    m_loss = jnp.zeros((), f32)
    steps_sum = jnp.zeros((B, N_D), f32)
    for step in range(N_STEPS):
        a = dot(att, att_w[step].T)
        a = a * att_scale[:, step] + att_shift[:, step]
        M = sparsemax(a * prior)
        m_loss = m_loss + jnp.mean(jnp.sum(M * jnp.log(M + EPSILON), axis=1))
        prior = (GAMMA - M) * prior
        out = ft(M * x_bn, step + 1)
        steps_sum = steps_sum + jnp.maximum(out[:, :N_D], 0.0)
        att = out[:, N_D:]
    m_loss = m_loss / N_STEPS

    feature = dot(steps_sum, w_final.T)
    h1 = jnp.maximum(dot(feature, w_h1.T) + b_h1[:, 0], 0.0)
    c = jnp.maximum(dot(h1[:, :16], wc2.T) + bc2[:, 0], 0.0)
    class_out = dot(c, wc3.T) + bc3[:, 0]
    domain_out = dot(h1[:, 16:], wd2.T) + bd2[:, 0]
    return class_out, domain_out, m_loss


# --------------------------------- main --------------------------------------
if __name__ == "__main__":
    BATCH = 256   # 2 lane-dense batch tiles of 128

    key = jax.random.PRNGKey(0)
    k_x, k_p = jax.random.split(key)
    x = jax.random.normal(k_x, (BATCH, INPUT_DIM), dtype=jnp.float32)
    params = init_params(k_p)

    class_out, domain_out, m_loss = tabnet_da_forward(x, params)
    jax.block_until_ready((class_out, domain_out, m_loss))

    assert class_out.shape == (BATCH, OUTPUT_DIM)
    assert domain_out.shape == (BATCH, 2)
    assert m_loss.shape == ()
    assert bool(jnp.all(jnp.isfinite(class_out)))
    assert bool(jnp.all(jnp.isfinite(domain_out)))
    assert bool(jnp.isfinite(m_loss))

    # pure-JAX reference check (exact sigmoid, highest matmul precision);
    # loose tolerance covers the EUP approximate-reciprocal sigmoid.
    class_ref, domain_ref, m_ref = tabnet_da_reference(x, params)
    assert bool(jnp.allclose(class_out, class_ref, atol=5e-2, rtol=5e-2))
    assert bool(jnp.allclose(domain_out, domain_ref, atol=5e-2, rtol=5e-2))
    assert bool(jnp.allclose(m_loss, m_ref, atol=5e-2, rtol=5e-2))

    print("KERNEL_OK")
</pallas_src>

<mosaic_0001>
module attributes {stable_mosaic.version = 11 : i64} {
  func.func @tabnet_da_kernel(%arg0: i32, %arg1: memref<16x128xf32, #tpu.memory_space<vmem>>, %arg2: memref<16x1xf32, #tpu.memory_space<vmem>>, %arg3: memref<16x1xf32, #tpu.memory_space<vmem>>, %arg4: memref<32x16xf32, #tpu.memory_space<vmem>>, %arg5: memref<32x16xf32, #tpu.memory_space<vmem>>, %arg6: memref<4x2x32x16xf32, #tpu.memory_space<vmem>>, %arg7: memref<32x16xf32, #tpu.memory_space<vmem>>, %arg8: memref<32x16xf32, #tpu.memory_space<vmem>>, %arg9: memref<3x16x8xf32, #tpu.memory_space<vmem>>, %arg10: memref<16x3xf32, #tpu.memory_space<vmem>>, %arg11: memref<16x3xf32, #tpu.memory_space<vmem>>, %arg12: memref<32x8xf32, #tpu.memory_space<vmem>>, %arg13: memref<31x32xf32, #tpu.memory_space<vmem>>, %arg14: memref<31x1xf32, #tpu.memory_space<vmem>>, %arg15: memref<10x16xf32, #tpu.memory_space<vmem>>, %arg16: memref<10x1xf32, #tpu.memory_space<vmem>>, %arg17: memref<5x10xf32, #tpu.memory_space<vmem>>, %arg18: memref<5x1xf32, #tpu.memory_space<vmem>>, %arg19: memref<2x15xf32, #tpu.memory_space<vmem>>, %arg20: memref<2x1xf32, #tpu.memory_space<vmem>>, %arg21: memref<5x128xf32, #tpu.memory_space<vmem>>, %arg22: memref<2x128xf32, #tpu.memory_space<vmem>>, %arg23: memref<1x128xf32, #tpu.memory_space<vmem>>) attributes {dimension_semantics = [#tpu.dimension_semantics<parallel>], iteration_bounds = array<i64: 2>, scalar_prefetch = 0 : i64, scratch_operands = 0 : i64, tpu.core_type = #tpu.core_type<tc>, window_params = [{transform_indices = @transform_0, window_bounds = array<i64: 16, 128>}, {pipeline_mode = #tpu.pipeline_mode<synchronous>, transform_indices = @transform_1, window_bounds = array<i64: 16, 1>}, {pipeline_mode = #tpu.pipeline_mode<synchronous>, transform_indices = @transform_2, window_bounds = array<i64: 16, 1>}, {pipeline_mode = #tpu.pipeline_mode<synchronous>, transform_indices = @transform_3, window_bounds = array<i64: 32, 16>}, {pipeline_mode = #tpu.pipeline_mode<synchronous>, transform_indices = @transform_4, window_bounds = array<i64: 32, 16>}, {pipeline_mode = #tpu.pipeline_mode<synchronous>, transform_indices = @transform_5, window_bounds = array<i64: 4, 2, 32, 16>}, {pipeline_mode = #tpu.pipeline_mode<synchronous>, transform_indices = @transform_6, window_bounds = array<i64: 32, 16>}, {pipeline_mode = #tpu.pipeline_mode<synchronous>, transform_indices = @transform_7, window_bounds = array<i64: 32, 16>}, {pipeline_mode = #tpu.pipeline_mode<synchronous>, transform_indices = @transform_8, window_bounds = array<i64: 3, 16, 8>}, {pipeline_mode = #tpu.pipeline_mode<synchronous>, transform_indices = @transform_9, window_bounds = array<i64: 16, 3>}, {pipeline_mode = #tpu.pipeline_mode<synchronous>, transform_indices = @transform_10, window_bounds = array<i64: 16, 3>}, {pipeline_mode = #tpu.pipeline_mode<synchronous>, transform_indices = @transform_11, window_bounds = array<i64: 32, 8>}, {pipeline_mode = #tpu.pipeline_mode<synchronous>, transform_indices = @transform_12, window_bounds = array<i64: 31, 32>}, {pipeline_mode = #tpu.pipeline_mode<synchronous>, transform_indices = @transform_13, window_bounds = array<i64: 31, 1>}, {pipeline_mode = #tpu.pipeline_mode<synchronous>, transform_indices = @transform_14, window_bounds = array<i64: 10, 16>}, {pipeline_mode = #tpu.pipeline_mode<synchronous>, transform_indices = @transform_15, window_bounds = array<i64: 10, 1>}, {pipeline_mode = #tpu.pipeline_mode<synchronous>, transform_indices = @transform_16, window_bounds = array<i64: 5, 10>}, {pipeline_mode = #tpu.pipeline_mode<synchronous>, transform_indices = @transform_17, window_bounds = array<i64: 5, 1>}, {pipeline_mode = #tpu.pipeline_mode<synchronous>, transform_indices = @transform_18, window_bounds = array<i64: 2, 15>}, {pipeline_mode = #tpu.pipeline_mode<synchronous>, transform_indices = @transform_19, window_bounds = array<i64: 2, 1>}, {transform_indices = @transform_20, window_bounds = array<i64: 5, 128>}, {transform_indices = @transform_21, window_bounds = array<i64: 2, 128>}, {transform_indices = @transform_22, window_bounds = array<i64: 1, 128>}]} {
    %c0 = arith.constant 0 : index
    %c0_0 = arith.constant 0 : index
    %0 = vector.load %arg1[%c0, %c0_0] : memref<16x128xf32, #tpu.memory_space<vmem>>, vector<16x128xf32>
    %c0_1 = arith.constant 0 : index
    %c0_2 = arith.constant 0 : index
    %1 = vector.load %arg2[%c0_1, %c0_2] : memref<16x1xf32, #tpu.memory_space<vmem>>, vector<16x1xf32>
    %2 = vector.broadcast %1 : vector<16x1xf32> to vector<16x128xf32>
    %3 = arith.mulf %0, %2 : vector<16x128xf32>
    %c0_3 = arith.constant 0 : index
    %c0_4 = arith.constant 0 : index
    %4 = vector.load %arg3[%c0_3, %c0_4] : memref<16x1xf32, #tpu.memory_space<vmem>>, vector<16x1xf32>
    %5 = vector.broadcast %4 : vector<16x1xf32> to vector<16x128xf32>
    %6 = arith.addf %3, %5 : vector<16x128xf32>
    %cst = arith.constant 1.000000e+00 : f32
    %7 = vector.broadcast %cst : f32 to vector<16x128xf32>
    %c0_5 = arith.constant 0 : index
    %c0_6 = arith.constant 0 : index
    %8 = vector.load %arg4[%c0_5, %c0_6] : memref<32x16xf32, #tpu.memory_space<vmem>>, vector<32x16xf32>
    %cst_7 = arith.constant dense<0.000000e+00> : vector<32x128xf32>
    %9 = tpu.matmul %8, %6, %cst_7 {dimension_numbers = #tpu.dot_dimension_numbers<[1], [0], [0], [1], [0, 0, 1, 1], [], []>} : vector<32x16xf32>, vector<16x128xf32>, vector<32x128xf32> -> vector<32x128xf32>
    %c0_8 = arith.constant 0 : index
    %c0_9 = arith.constant 0 : index
    %10 = vector.load %arg7[%c0_8, %c0_9] : memref<32x16xf32, #tpu.memory_space<vmem>>, vector<32x1xf32>
    %11 = vector.broadcast %10 : vector<32x1xf32> to vector<32x128xf32>
    %12 = arith.mulf %9, %11 : vector<32x128xf32>
    %c0_10 = arith.constant 0 : index
    %c0_11 = arith.constant 0 : index
    %13 = vector.load %arg8[%c0_10, %c0_11] : memref<32x16xf32, #tpu.memory_space<vmem>>, vector<32x1xf32>
    %14 = vector.broadcast %13 : vector<32x1xf32> to vector<32x128xf32>
    %15 = arith.addf %12, %14 : vector<32x128xf32>
    %16 = vector.extract_strided_slice %15 {offsets = [0, 0], sizes = [16, 128], strides = [1, 1]} : vector<32x128xf32> to vector<16x128xf32>
    %17 = vector.extract_strided_slice %15 {offsets = [16, 0], sizes = [16, 128], strides = [1, 1]} : vector<32x128xf32> to vector<16x128xf32>
    %cst_12 = arith.constant 0.000000e+00 : f32
    %18 = vector.broadcast %cst_12 : f32 to vector<16x128xf32>
    %19 = arith.subf %18, %17 : vector<16x128xf32>
    %20 = math.exp %19 : vector<16x128xf32>
    %cst_13 = arith.constant 1.000000e+00 : f32
    %21 = vector.broadcast %cst_13 : f32 to vector<16x128xf32>
    %22 = arith.addf %21, %20 : vector<16x128xf32>
    %23 = tpu.reciprocal %22 {approx = true} : vector<16x128xf32> -> vector<16x128xf32>
    %24 = arith.mulf %16, %23 : vector<16x128xf32>
    %c0_14 = arith.constant 0 : index
    %c0_15 = arith.constant 0 : index
    %25 = vector.load %arg5[%c0_14, %c0_15] : memref<32x16xf32, #tpu.memory_space<vmem>>, vector<32x16xf32>
    %cst_16 = arith.constant dense<0.000000e+00> : vector<32x128xf32>
    %26 = tpu.matmul %25, %24, %cst_16 {dimension_numbers = #tpu.dot_dimension_numbers<[1], [0], [0], [1], [0, 0, 1, 1], [], []>} : vector<32x16xf32>, vector<16x128xf32>, vector<32x128xf32> -> vector<32x128xf32>
    %c0_17 = arith.constant 0 : index
    %c1 = arith.constant 1 : index
    %27 = vector.load %arg7[%c0_17, %c1] : memref<32x16xf32, #tpu.memory_space<vmem>>, vector<32x1xf32>
    %28 = vector.broadcast %27 : vector<32x1xf32> to vector<32x128xf32>
    %29 = arith.mulf %26, %28 : vector<32x128xf32>
    %c0_18 = arith.constant 0 : index
    %c1_19 = arith.constant 1 : index
    %30 = vector.load %arg8[%c0_18, %c1_19] : memref<32x16xf32, #tpu.memory_space<vmem>>, vector<32x1xf32>
    %31 = vector.broadcast %30 : vector<32x1xf32> to vector<32x128xf32>
    %32 = arith.addf %29, %31 : vector<32x128xf32>
    %33 = vector.extract_strided_slice %32 {offsets = [0, 0], sizes = [16, 128], strides = [1, 1]} : vector<32x128xf32> to vector<16x128xf32>
    %34 = vector.extract_strided_slice %32 {offsets = [16, 0], sizes = [16, 128], strides = [1, 1]} : vector<32x128xf32> to vector<16x128xf32>
    %cst_20 = arith.constant 0.000000e+00 : f32
    %35 = vector.broadcast %cst_20 : f32 to vector<16x128xf32>
    %36 = arith.subf %35, %34 : vector<16x128xf32>
    %37 = math.exp %36 : vector<16x128xf32>
    %cst_21 = arith.constant 1.000000e+00 : f32
    %38 = vector.broadcast %cst_21 : f32 to vector<16x128xf32>
    %39 = arith.addf %38, %37 : vector<16x128xf32>
    %40 = tpu.reciprocal %39 {approx = true} : vector<16x128xf32> -> vector<16x128xf32>
    %41 = arith.mulf %33, %40 : vector<16x128xf32>
    %42 = arith.addf %24, %41 : vector<16x128xf32>
    %cst_22 = arith.constant 0.707106769 : f32
    %43 = vector.broadcast %cst_22 : f32 to vector<16x128xf32>
    %44 = arith.mulf %42, %43 : vector<16x128xf32>
    %c0_23 = arith.constant 0 : index
    %c0_24 = arith.constant 0 : index
    %c0_25 = arith.constant 0 : index
    %c0_26 = arith.constant 0 : index
    %45 = vector.load %arg6[%c0_23, %c0_24, %c0_25, %c0_26] : memref<4x2x32x16xf32, #tpu.memory_space<vmem>>, vector<1x1x32x16xf32>
    %46 = vector.shape_cast %45 : vector<1x1x32x16xf32> to vector<32x16xf32>
    %cst_27 = arith.constant dense<0.000000e+00> : vector<32x128xf32>
    %47 = tpu.matmul %46, %44, %cst_27 {dimension_numbers = #tpu.dot_dimension_numbers<[1], [0], [0], [1], [0, 0, 1, 1], [], []>} : vector<32x16xf32>, vector<16x128xf32>, vector<32x128xf32> -> vector<32x128xf32>
    %c0_28 = arith.constant 0 : index
    %c2 = arith.constant 2 : index
    %48 = vector.load %arg7[%c0_28, %c2] : memref<32x16xf32, #tpu.memory_space<vmem>>, vector<32x1xf32>
    %49 = vector.broadcast %48 : vector<32x1xf32> to vector<32x128xf32>
    %50 = arith.mulf %47, %49 : vector<32x128xf32>
    %c0_29 = arith.constant 0 : index
    %c2_30 = arith.constant 2 : index
    %51 = vector.load %arg8[%c0_29, %c2_30] : memref<32x16xf32, #tpu.memory_space<vmem>>, vector<32x1xf32>
    %52 = vector.broadcast %51 : vector<32x1xf32> to vector<32x128xf32>
    %53 = arith.addf %50, %52 : vector<32x128xf32>
    %54 = vector.extract_strided_slice %53 {offsets = [0, 0], sizes = [16, 128], strides = [1, 1]} : vector<32x128xf32> to vector<16x128xf32>
    %55 = vector.extract_strided_slice %53 {offsets = [16, 0], sizes = [16, 128], strides = [1, 1]} : vector<32x128xf32> to vector<16x128xf32>
    %cst_31 = arith.constant 0.000000e+00 : f32
    %56 = vector.broadcast %cst_31 : f32 to vector<16x128xf32>
    %57 = arith.subf %56, %55 : vector<16x128xf32>
    %58 = math.exp %57 : vector<16x128xf32>
    %cst_32 = arith.constant 1.000000e+00 : f32
    %59 = vector.broadcast %cst_32 : f32 to vector<16x128xf32>
    %60 = arith.addf %59, %58 : vector<16x128xf32>
    %61 = tpu.reciprocal %60 {approx = true} : vector<16x128xf32> -> vector<16x128xf32>
    %62 = arith.mulf %54, %61 : vector<16x128xf32>
    %63 = arith.addf %44, %62 : vector<16x128xf32>
    %cst_33 = arith.constant 0.707106769 : f32
    %64 = vector.broadcast %cst_33 : f32 to vector<16x128xf32>
    %65 = arith.mulf %63, %64 : vector<16x128xf32>
    %c0_34 = arith.constant 0 : index
    %c1_35 = arith.constant 1 : index
    %c0_36 = arith.constant 0 : index
    %c0_37 = arith.constant 0 : index
    %66 = vector.load %arg6[%c0_34, %c1_35, %c0_36, %c0_37] : memref<4x2x32x16xf32, #tpu.memory_space<vmem>>, vector<1x1x32x16xf32>
    %67 = vector.shape_cast %66 : vector<1x1x32x16xf32> to vector<32x16xf32>
    %cst_38 = arith.constant dense<0.000000e+00> : vector<32x128xf32>
    %68 = tpu.matmul %67, %65, %cst_38 {dimension_numbers = #tpu.dot_dimension_numbers<[1], [0], [0], [1], [0, 0, 1, 1], [], []>} : vector<32x16xf32>, vector<16x128xf32>, vector<32x128xf32> -> vector<32x128xf32>
    %c0_39 = arith.constant 0 : index
    %c3 = arith.constant 3 : index
    %69 = vector.load %arg7[%c0_39, %c3] : memref<32x16xf32, #tpu.memory_space<vmem>>, vector<32x1xf32>
    %70 = vector.broadcast %69 : vector<32x1xf32> to vector<32x128xf32>
    %71 = arith.mulf %68, %70 : vector<32x128xf32>
    %c0_40 = arith.constant 0 : index
    %c3_41 = arith.constant 3 : index
    %72 = vector.load %arg8[%c0_40, %c3_41] : memref<32x16xf32, #tpu.memory_space<vmem>>, vector<32x1xf32>
    %73 = vector.broadcast %72 : vector<32x1xf32> to vector<32x128xf32>
    %74 = arith.addf %71, %73 : vector<32x128xf32>
    %75 = vector.extract_strided_slice %74 {offsets = [0, 0], sizes = [16, 128], strides = [1, 1]} : vector<32x128xf32> to vector<16x128xf32>
    %76 = vector.extract_strided_slice %74 {offsets = [16, 0], sizes = [16, 128], strides = [1, 1]} : vector<32x128xf32> to vector<16x128xf32>
    %cst_42 = arith.constant 0.000000e+00 : f32
    %77 = vector.broadcast %cst_42 : f32 to vector<16x128xf32>
    %78 = arith.subf %77, %76 : vector<16x128xf32>
    %79 = math.exp %78 : vector<16x128xf32>
    %cst_43 = arith.constant 1.000000e+00 : f32
    %80 = vector.broadcast %cst_43 : f32 to vector<16x128xf32>
    %81 = arith.addf %80, %79 : vector<16x128xf32>
    %82 = tpu.reciprocal %81 {approx = true} : vector<16x128xf32> -> vector<16x128xf32>
    %83 = arith.mulf %75, %82 : vector<16x128xf32>
    %84 = arith.addf %65, %83 : vector<16x128xf32>
    %cst_44 = arith.constant 0.707106769 : f32
    %85 = vector.broadcast %cst_44 : f32 to vector<16x128xf32>
    %86 = arith.mulf %84, %85 : vector<16x128xf32>
    %87 = vector.extract_strided_slice %86 {offsets = [8, 0], sizes = [8, 128], strides = [1, 1]} : vector<16x128xf32> to vector<8x128xf32>
    %cst_45 = arith.constant 0.000000e+00 : f32
    %88 = vector.broadcast %cst_45 : f32 to vector<1x128xf32>
    %cst_46 = arith.constant 0.000000e+00 : f32
    %89 = vector.broadcast %cst_46 : f32 to vector<8x128xf32>
    %c0_47 = arith.constant 0 : index
    %c0_48 = arith.constant 0 : index
    %c0_49 = arith.constant 0 : index
    %90 = vector.load %arg9[%c0_47, %c0_48, %c0_49] : memref<3x16x8xf32, #tpu.memory_space<vmem>>, vector<1x16x8xf32>
    %91 = vector.shape_cast %90 : vector<1x16x8xf32> to vector<16x8xf32>
    %cst_50 = arith.constant dense<0.000000e+00> : vector<16x128xf32>
    %92 = tpu.matmul %91, %87, %cst_50 {dimension_numbers = #tpu.dot_dimension_numbers<[1], [0], [0], [1], [0, 0, 1, 1], [], []>} : vector<16x8xf32>, vector<8x128xf32>, vector<16x128xf32> -> vector<16x128xf32>
    %c0_51 = arith.constant 0 : index
    %c0_52 = arith.constant 0 : index
    %93 = vector.load %arg10[%c0_51, %c0_52] : memref<16x3xf32, #tpu.memory_space<vmem>>, vector<16x1xf32>
    %94 = vector.broadcast %93 : vector<16x1xf32> to vector<16x128xf32>
    %95 = arith.mulf %92, %94 : vector<16x128xf32>
    %c0_53 = arith.constant 0 : index
    %c0_54 = arith.constant 0 : index
    %96 = vector.load %arg11[%c0_53, %c0_54] : memref<16x3xf32, #tpu.memory_space<vmem>>, vector<16x1xf32>
    %97 = vector.broadcast %96 : vector<16x1xf32> to vector<16x128xf32>
    %98 = arith.addf %95, %97 : vector<16x128xf32>
    %99 = arith.mulf %98, %7 : vector<16x128xf32>
    %cst_55 = arith.constant dense<0xFF800000> : vector<128xf32>
    %100 = vector.multi_reduction <maximumf>, %99, %cst_55 [0] : vector<16x128xf32> to vector<128xf32>
    %101 = vector.shape_cast %100 : vector<128xf32> to vector<1x128xf32>
    %102 = vector.broadcast %101 : vector<1x128xf32> to vector<16x128xf32>
    %103 = arith.subf %99, %102 : vector<16x128xf32>
    %cst_56 = arith.constant 0.000000e+00 : f32
    %104 = vector.broadcast %cst_56 : f32 to vector<16x128xf32>
    %cst_57 = arith.constant 0.000000e+00 : f32
    %105 = vector.broadcast %cst_57 : f32 to vector<16x128xf32>
    %106 = vector.extract_strided_slice %103 {offsets = [0, 0], sizes = [1, 128], strides = [1, 1]} : vector<16x128xf32> to vector<1x128xf32>
    %107 = vector.broadcast %106 : vector<1x128xf32> to vector<16x128xf32>
    %108 = arith.cmpf oge, %107, %103 : vector<16x128xf32>
    %109 = arith.extui %108 : vector<16x128xi1> to vector<16x128xi32>
    %110 = arith.sitofp %109 : vector<16x128xi32> to vector<16x128xf32>
    %111 = arith.addf %104, %110 : vector<16x128xf32>
    %112 = vector.broadcast %106 : vector<1x128xf32> to vector<16x128xf32>
    %113 = arith.mulf %110, %112 : vector<16x128xf32>
    %114 = arith.addf %105, %113 : vector<16x128xf32>
    %115 = vector.extract_strided_slice %103 {offsets = [1, 0], sizes = [1, 128], strides = [1, 1]} : vector<16x128xf32> to vector<1x128xf32>
    %116 = vector.broadcast %115 : vector<1x128xf32> to vector<16x128xf32>
    %117 = arith.cmpf oge, %116, %103 : vector<16x128xf32>
    %118 = arith.extui %117 : vector<16x128xi1> to vector<16x128xi32>
    %119 = arith.sitofp %118 : vector<16x128xi32> to vector<16x128xf32>
    %120 = arith.addf %111, %119 : vector<16x128xf32>
    %121 = vector.broadcast %115 : vector<1x128xf32> to vector<16x128xf32>
    %122 = arith.mulf %119, %121 : vector<16x128xf32>
    %123 = arith.addf %114, %122 : vector<16x128xf32>
    %124 = vector.extract_strided_slice %103 {offsets = [2, 0], sizes = [1, 128], strides = [1, 1]} : vector<16x128xf32> to vector<1x128xf32>
    %125 = vector.broadcast %124 : vector<1x128xf32> to vector<16x128xf32>
    %126 = arith.cmpf oge, %125, %103 : vector<16x128xf32>
    %127 = arith.extui %126 : vector<16x128xi1> to vector<16x128xi32>
    %128 = arith.sitofp %127 : vector<16x128xi32> to vector<16x128xf32>
    %129 = arith.addf %120, %128 : vector<16x128xf32>
    %130 = vector.broadcast %124 : vector<1x128xf32> to vector<16x128xf32>
    %131 = arith.mulf %128, %130 : vector<16x128xf32>
    %132 = arith.addf %123, %131 : vector<16x128xf32>
    %133 = vector.extract_strided_slice %103 {offsets = [3, 0], sizes = [1, 128], strides = [1, 1]} : vector<16x128xf32> to vector<1x128xf32>
    %134 = vector.broadcast %133 : vector<1x128xf32> to vector<16x128xf32>
    %135 = arith.cmpf oge, %134, %103 : vector<16x128xf32>
    %136 = arith.extui %135 : vector<16x128xi1> to vector<16x128xi32>
    %137 = arith.sitofp %136 : vector<16x128xi32> to vector<16x128xf32>
    %138 = arith.addf %129, %137 : vector<16x128xf32>
    %139 = vector.broadcast %133 : vector<1x128xf32> to vector<16x128xf32>
    %140 = arith.mulf %137, %139 : vector<16x128xf32>
    %141 = arith.addf %132, %140 : vector<16x128xf32>
    %142 = vector.extract_strided_slice %103 {offsets = [4, 0], sizes = [1, 128], strides = [1, 1]} : vector<16x128xf32> to vector<1x128xf32>
    %143 = vector.broadcast %142 : vector<1x128xf32> to vector<16x128xf32>
    %144 = arith.cmpf oge, %143, %103 : vector<16x128xf32>
    %145 = arith.extui %144 : vector<16x128xi1> to vector<16x128xi32>
    %146 = arith.sitofp %145 : vector<16x128xi32> to vector<16x128xf32>
    %147 = arith.addf %138, %146 : vector<16x128xf32>
    %148 = vector.broadcast %142 : vector<1x128xf32> to vector<16x128xf32>
    %149 = arith.mulf %146, %148 : vector<16x128xf32>
    %150 = arith.addf %141, %149 : vector<16x128xf32>
    %151 = vector.extract_strided_slice %103 {offsets = [5, 0], sizes = [1, 128], strides = [1, 1]} : vector<16x128xf32> to vector<1x128xf32>
    %152 = vector.broadcast %151 : vector<1x128xf32> to vector<16x128xf32>
    %153 = arith.cmpf oge, %152, %103 : vector<16x128xf32>
    %154 = arith.extui %153 : vector<16x128xi1> to vector<16x128xi32>
    %155 = arith.sitofp %154 : vector<16x128xi32> to vector<16x128xf32>
    %156 = arith.addf %147, %155 : vector<16x128xf32>
    %157 = vector.broadcast %151 : vector<1x128xf32> to vector<16x128xf32>
    %158 = arith.mulf %155, %157 : vector<16x128xf32>
    %159 = arith.addf %150, %158 : vector<16x128xf32>
    %160 = vector.extract_strided_slice %103 {offsets = [6, 0], sizes = [1, 128], strides = [1, 1]} : vector<16x128xf32> to vector<1x128xf32>
    %161 = vector.broadcast %160 : vector<1x128xf32> to vector<16x128xf32>
    %162 = arith.cmpf oge, %161, %103 : vector<16x128xf32>
    %163 = arith.extui %162 : vector<16x128xi1> to vector<16x128xi32>
    %164 = arith.sitofp %163 : vector<16x128xi32> to vector<16x128xf32>
    %165 = arith.addf %156, %164 : vector<16x128xf32>
    %166 = vector.broadcast %160 : vector<1x128xf32> to vector<16x128xf32>
    %167 = arith.mulf %164, %166 : vector<16x128xf32>
    %168 = arith.addf %159, %167 : vector<16x128xf32>
    %169 = vector.extract_strided_slice %103 {offsets = [7, 0], sizes = [1, 128], strides = [1, 1]} : vector<16x128xf32> to vector<1x128xf32>
    %170 = vector.broadcast %169 : vector<1x128xf32> to vector<16x128xf32>
    %171 = arith.cmpf oge, %170, %103 : vector<16x128xf32>
    %172 = arith.extui %171 : vector<16x128xi1> to vector<16x128xi32>
    %173 = arith.sitofp %172 : vector<16x128xi32> to vector<16x128xf32>
    %174 = arith.addf %165, %173 : vector<16x128xf32>
    %175 = vector.broadcast %169 : vector<1x128xf32> to vector<16x128xf32>
    %176 = arith.mulf %173, %175 : vector<16x128xf32>
    %177 = arith.addf %168, %176 : vector<16x128xf32>
    %178 = vector.extract_strided_slice %103 {offsets = [8, 0], sizes = [1, 128], strides = [1, 1]} : vector<16x128xf32> to vector<1x128xf32>
    %179 = vector.broadcast %178 : vector<1x128xf32> to vector<16x128xf32>
    %180 = arith.cmpf oge, %179, %103 : vector<16x128xf32>
    %181 = arith.extui %180 : vector<16x128xi1> to vector<16x128xi32>
    %182 = arith.sitofp %181 : vector<16x128xi32> to vector<16x128xf32>
    %183 = arith.addf %174, %182 : vector<16x128xf32>
    %184 = vector.broadcast %178 : vector<1x128xf32> to vector<16x128xf32>
    %185 = arith.mulf %182, %184 : vector<16x128xf32>
    %186 = arith.addf %177, %185 : vector<16x128xf32>
    %187 = vector.extract_strided_slice %103 {offsets = [9, 0], sizes = [1, 128], strides = [1, 1]} : vector<16x128xf32> to vector<1x128xf32>
    %188 = vector.broadcast %187 : vector<1x128xf32> to vector<16x128xf32>
    %189 = arith.cmpf oge, %188, %103 : vector<16x128xf32>
    %190 = arith.extui %189 : vector<16x128xi1> to vector<16x128xi32>
    %191 = arith.sitofp %190 : vector<16x128xi32> to vector<16x128xf32>
    %192 = arith.addf %183, %191 : vector<16x128xf32>
    %193 = vector.broadcast %187 : vector<1x128xf32> to vector<16x128xf32>
    %194 = arith.mulf %191, %193 : vector<16x128xf32>
    %195 = arith.addf %186, %194 : vector<16x128xf32>
    %196 = vector.extract_strided_slice %103 {offsets = [10, 0], sizes = [1, 128], strides = [1, 1]} : vector<16x128xf32> to vector<1x128xf32>
    %197 = vector.broadcast %196 : vector<1x128xf32> to vector<16x128xf32>
    %198 = arith.cmpf oge, %197, %103 : vector<16x128xf32>
    %199 = arith.extui %198 : vector<16x128xi1> to vector<16x128xi32>
    %200 = arith.sitofp %199 : vector<16x128xi32> to vector<16x128xf32>
    %201 = arith.addf %192, %200 : vector<16x128xf32>
    %202 = vector.broadcast %196 : vector<1x128xf32> to vector<16x128xf32>
    %203 = arith.mulf %200, %202 : vector<16x128xf32>
    %204 = arith.addf %195, %203 : vector<16x128xf32>
    %205 = vector.extract_strided_slice %103 {offsets = [11, 0], sizes = [1, 128], strides = [1, 1]} : vector<16x128xf32> to vector<1x128xf32>
    %206 = vector.broadcast %205 : vector<1x128xf32> to vector<16x128xf32>
    %207 = arith.cmpf oge, %206, %103 : vector<16x128xf32>
    %208 = arith.extui %207 : vector<16x128xi1> to vector<16x128xi32>
    %209 = arith.sitofp %208 : vector<16x128xi32> to vector<16x128xf32>
    %210 = arith.addf %201, %209 : vector<16x128xf32>
    %211 = vector.broadcast %205 : vector<1x128xf32> to vector<16x128xf32>
    %212 = arith.mulf %209, %211 : vector<16x128xf32>
    %213 = arith.addf %204, %212 : vector<16x128xf32>
    %214 = vector.extract_strided_slice %103 {offsets = [12, 0], sizes = [1, 128], strides = [1, 1]} : vector<16x128xf32> to vector<1x128xf32>
    %215 = vector.broadcast %214 : vector<1x128xf32> to vector<16x128xf32>
    %216 = arith.cmpf oge, %215, %103 : vector<16x128xf32>
    %217 = arith.extui %216 : vector<16x128xi1> to vector<16x128xi32>
    %218 = arith.sitofp %217 : vector<16x128xi32> to vector<16x128xf32>
    %219 = arith.addf %210, %218 : vector<16x128xf32>
    %220 = vector.broadcast %214 : vector<1x128xf32> to vector<16x128xf32>
    %221 = arith.mulf %218, %220 : vector<16x128xf32>
    %222 = arith.addf %213, %221 : vector<16x128xf32>
    %223 = vector.extract_strided_slice %103 {offsets = [13, 0], sizes = [1, 128], strides = [1, 1]} : vector<16x128xf32> to vector<1x128xf32>
    %224 = vector.broadcast %223 : vector<1x128xf32> to vector<16x128xf32>
    %225 = arith.cmpf oge, %224, %103 : vector<16x128xf32>
    %226 = arith.extui %225 : vector<16x128xi1> to vector<16x128xi32>
    %227 = arith.sitofp %226 : vector<16x128xi32> to vector<16x128xf32>
    %228 = arith.addf %219, %227 : vector<16x128xf32>
    %229 = vector.broadcast %223 : vector<1x128xf32> to vector<16x128xf32>
    %230 = arith.mulf %227, %229 : vector<16x128xf32>
    %231 = arith.addf %222, %230 : vector<16x128xf32>
    %232 = vector.extract_strided_slice %103 {offsets = [14, 0], sizes = [1, 128], strides = [1, 1]} : vector<16x128xf32> to vector<1x128xf32>
    %233 = vector.broadcast %232 : vector<1x128xf32> to vector<16x128xf32>
    %234 = arith.cmpf oge, %233, %103 : vector<16x128xf32>
    %235 = arith.extui %234 : vector<16x128xi1> to vector<16x128xi32>
    %236 = arith.sitofp %235 : vector<16x128xi32> to vector<16x128xf32>
    %237 = arith.addf %228, %236 : vector<16x128xf32>
    %238 = vector.broadcast %232 : vector<1x128xf32> to vector<16x128xf32>
    %239 = arith.mulf %236, %238 : vector<16x128xf32>
    %240 = arith.addf %231, %239 : vector<16x128xf32>
    %241 = vector.extract_strided_slice %103 {offsets = [15, 0], sizes = [1, 128], strides = [1, 1]} : vector<16x128xf32> to vector<1x128xf32>
    %242 = vector.broadcast %241 : vector<1x128xf32> to vector<16x128xf32>
    %243 = arith.cmpf oge, %242, %103 : vector<16x128xf32>
    %244 = arith.extui %243 : vector<16x128xi1> to vector<16x128xi32>
    %245 = arith.sitofp %244 : vector<16x128xi32> to vector<16x128xf32>
    %246 = arith.addf %237, %245 : vector<16x128xf32>
    %247 = vector.broadcast %241 : vector<1x128xf32> to vector<16x128xf32>
    %248 = arith.mulf %245, %247 : vector<16x128xf32>
    %249 = arith.addf %240, %248 : vector<16x128xf32>
    %250 = arith.mulf %246, %103 : vector<16x128xf32>
    %cst_58 = arith.constant 1.000000e+00 : f32
    %251 = vector.broadcast %cst_58 : f32 to vector<16x128xf32>
    %252 = arith.addf %251, %250 : vector<16x128xf32>
    %253 = arith.cmpf ogt, %252, %249 : vector<16x128xf32>
    %254 = arith.extui %253 : vector<16x128xi1> to vector<16x128xi32>
    %255 = arith.sitofp %254 : vector<16x128xi32> to vector<16x128xf32>
    %cst_59 = arith.constant dense<0.000000e+00> : vector<128xf32>
    %256 = vector.multi_reduction <add>, %255, %cst_59 [0] : vector<16x128xf32> to vector<128xf32>
    %257 = vector.shape_cast %256 : vector<128xf32> to vector<1x128xf32>
    %258 = arith.mulf %103, %255 : vector<16x128xf32>
    %cst_60 = arith.constant dense<0.000000e+00> : vector<128xf32>
    %259 = vector.multi_reduction <add>, %258, %cst_60 [0] : vector<16x128xf32> to vector<128xf32>
    %260 = vector.shape_cast %259 : vector<128xf32> to vector<1x128xf32>
    %cst_61 = arith.constant 1.000000e+00 : f32
    %261 = vector.broadcast %cst_61 : f32 to vector<1x128xf32>
    %262 = arith.subf %260, %261 : vector<1x128xf32>
    %263 = arith.divf %262, %257 : vector<1x128xf32>
    %264 = vector.broadcast %263 : vector<1x128xf32> to vector<16x128xf32>
    %265 = arith.subf %103, %264 : vector<16x128xf32>
    %cst_62 = arith.constant 0.000000e+00 : f32
    %266 = vector.broadcast %cst_62 : f32 to vector<16x128xf32>
    %267 = arith.maximumf %265, %266 : vector<16x128xf32>
    %cst_63 = arith.constant 1.000000e-15 : f32
    %268 = vector.broadcast %cst_63 : f32 to vector<16x128xf32>
    %269 = arith.addf %267, %268 : vector<16x128xf32>
    %270 = math.log %269 : vector<16x128xf32>
    %271 = arith.mulf %267, %270 : vector<16x128xf32>
    %cst_64 = arith.constant dense<0.000000e+00> : vector<128xf32>
    %272 = vector.multi_reduction <add>, %271, %cst_64 [0] : vector<16x128xf32> to vector<128xf32>
    %273 = vector.shape_cast %272 : vector<128xf32> to vector<1x128xf32>
    %274 = arith.addf %88, %273 : vector<1x128xf32>
    %cst_65 = arith.constant 1.300000e+00 : f32
    %275 = vector.broadcast %cst_65 : f32 to vector<16x128xf32>
    %276 = arith.subf %275, %267 : vector<16x128xf32>
    %277 = arith.mulf %276, %7 : vector<16x128xf32>
    %278 = arith.mulf %267, %6 : vector<16x128xf32>
    %c0_66 = arith.constant 0 : index
    %c0_67 = arith.constant 0 : index
    %279 = vector.load %arg4[%c0_66, %c0_67] : memref<32x16xf32, #tpu.memory_space<vmem>>, vector<32x16xf32>
    %cst_68 = arith.constant dense<0.000000e+00> : vector<32x128xf32>
    %280 = tpu.matmul %279, %278, %cst_68 {dimension_numbers = #tpu.dot_dimension_numbers<[1], [0], [0], [1], [0, 0, 1, 1], [], []>} : vector<32x16xf32>, vector<16x128xf32>, vector<32x128xf32> -> vector<32x128xf32>
    %c0_69 = arith.constant 0 : index
    %c4 = arith.constant 4 : index
    %281 = vector.load %arg7[%c0_69, %c4] : memref<32x16xf32, #tpu.memory_space<vmem>>, vector<32x1xf32>
    %282 = vector.broadcast %281 : vector<32x1xf32> to vector<32x128xf32>
    %283 = arith.mulf %280, %282 : vector<32x128xf32>
    %c0_70 = arith.constant 0 : index
    %c4_71 = arith.constant 4 : index
    %284 = vector.load %arg8[%c0_70, %c4_71] : memref<32x16xf32, #tpu.memory_space<vmem>>, vector<32x1xf32>
    %285 = vector.broadcast %284 : vector<32x1xf32> to vector<32x128xf32>
    %286 = arith.addf %283, %285 : vector<32x128xf32>
    %287 = vector.extract_strided_slice %286 {offsets = [0, 0], sizes = [16, 128], strides = [1, 1]} : vector<32x128xf32> to vector<16x128xf32>
    %288 = vector.extract_strided_slice %286 {offsets = [16, 0], sizes = [16, 128], strides = [1, 1]} : vector<32x128xf32> to vector<16x128xf32>
    %cst_72 = arith.constant 0.000000e+00 : f32
    %289 = vector.broadcast %cst_72 : f32 to vector<16x128xf32>
    %290 = arith.subf %289, %288 : vector<16x128xf32>
    %291 = math.exp %290 : vector<16x128xf32>
    %cst_73 = arith.constant 1.000000e+00 : f32
    %292 = vector.broadcast %cst_73 : f32 to vector<16x128xf32>
    %293 = arith.addf %292, %291 : vector<16x128xf32>
    %294 = tpu.reciprocal %293 {approx = true} : vector<16x128xf32> -> vector<16x128xf32>
    %295 = arith.mulf %287, %294 : vector<16x128xf32>
    %c0_74 = arith.constant 0 : index
    %c0_75 = arith.constant 0 : index
    %296 = vector.load %arg5[%c0_74, %c0_75] : memref<32x16xf32, #tpu.memory_space<vmem>>, vector<32x16xf32>
    %cst_76 = arith.constant dense<0.000000e+00> : vector<32x128xf32>
    %297 = tpu.matmul %296, %295, %cst_76 {dimension_numbers = #tpu.dot_dimension_numbers<[1], [0], [0], [1], [0, 0, 1, 1], [], []>} : vector<32x16xf32>, vector<16x128xf32>, vector<32x128xf32> -> vector<32x128xf32>
    %c0_77 = arith.constant 0 : index
    %c5 = arith.constant 5 : index
    %298 = vector.load %arg7[%c0_77, %c5] : memref<32x16xf32, #tpu.memory_space<vmem>>, vector<32x1xf32>
    %299 = vector.broadcast %298 : vector<32x1xf32> to vector<32x128xf32>
    %300 = arith.mulf %297, %299 : vector<32x128xf32>
    %c0_78 = arith.constant 0 : index
    %c5_79 = arith.constant 5 : index
    %301 = vector.load %arg8[%c0_78, %c5_79] : memref<32x16xf32, #tpu.memory_space<vmem>>, vector<32x1xf32>
    %302 = vector.broadcast %301 : vector<32x1xf32> to vector<32x128xf32>
    %303 = arith.addf %300, %302 : vector<32x128xf32>
    %304 = vector.extract_strided_slice %303 {offsets = [0, 0], sizes = [16, 128], strides = [1, 1]} : vector<32x128xf32> to vector<16x128xf32>
    %305 = vector.extract_strided_slice %303 {offsets = [16, 0], sizes = [16, 128], strides = [1, 1]} : vector<32x128xf32> to vector<16x128xf32>
    %cst_80 = arith.constant 0.000000e+00 : f32
    %306 = vector.broadcast %cst_80 : f32 to vector<16x128xf32>
    %307 = arith.subf %306, %305 : vector<16x128xf32>
    %308 = math.exp %307 : vector<16x128xf32>
    %cst_81 = arith.constant 1.000000e+00 : f32
    %309 = vector.broadcast %cst_81 : f32 to vector<16x128xf32>
    %310 = arith.addf %309, %308 : vector<16x128xf32>
    %311 = tpu.reciprocal %310 {approx = true} : vector<16x128xf32> -> vector<16x128xf32>
    %312 = arith.mulf %304, %311 : vector<16x128xf32>
    %313 = arith.addf %295, %312 : vector<16x128xf32>
    %cst_82 = arith.constant 0.707106769 : f32
    %314 = vector.broadcast %cst_82 : f32 to vector<16x128xf32>
    %315 = arith.mulf %313, %314 : vector<16x128xf32>
    %c1_83 = arith.constant 1 : index
    %c0_84 = arith.constant 0 : index
    %c0_85 = arith.constant 0 : index
    %c0_86 = arith.constant 0 : index
    %316 = vector.load %arg6[%c1_83, %c0_84, %c0_85, %c0_86] : memref<4x2x32x16xf32, #tpu.memory_space<vmem>>, vector<1x1x32x16xf32>
    %317 = vector.shape_cast %316 : vector<1x1x32x16xf32> to vector<32x16xf32>
    %cst_87 = arith.constant dense<0.000000e+00> : vector<32x128xf32>
    %318 = tpu.matmul %317, %315, %cst_87 {dimension_numbers = #tpu.dot_dimension_numbers<[1], [0], [0], [1], [0, 0, 1, 1], [], []>} : vector<32x16xf32>, vector<16x128xf32>, vector<32x128xf32> -> vector<32x128xf32>
    %c0_88 = arith.constant 0 : index
    %c6 = arith.constant 6 : index
    %319 = vector.load %arg7[%c0_88, %c6] : memref<32x16xf32, #tpu.memory_space<vmem>>, vector<32x1xf32>
    %320 = vector.broadcast %319 : vector<32x1xf32> to vector<32x128xf32>
    %321 = arith.mulf %318, %320 : vector<32x128xf32>
    %c0_89 = arith.constant 0 : index
    %c6_90 = arith.constant 6 : index
    %322 = vector.load %arg8[%c0_89, %c6_90] : memref<32x16xf32, #tpu.memory_space<vmem>>, vector<32x1xf32>
    %323 = vector.broadcast %322 : vector<32x1xf32> to vector<32x128xf32>
    %324 = arith.addf %321, %323 : vector<32x128xf32>
    %325 = vector.extract_strided_slice %324 {offsets = [0, 0], sizes = [16, 128], strides = [1, 1]} : vector<32x128xf32> to vector<16x128xf32>
    %326 = vector.extract_strided_slice %324 {offsets = [16, 0], sizes = [16, 128], strides = [1, 1]} : vector<32x128xf32> to vector<16x128xf32>
    %cst_91 = arith.constant 0.000000e+00 : f32
    %327 = vector.broadcast %cst_91 : f32 to vector<16x128xf32>
    %328 = arith.subf %327, %326 : vector<16x128xf32>
    %329 = math.exp %328 : vector<16x128xf32>
    %cst_92 = arith.constant 1.000000e+00 : f32
    %330 = vector.broadcast %cst_92 : f32 to vector<16x128xf32>
    %331 = arith.addf %330, %329 : vector<16x128xf32>
    %332 = tpu.reciprocal %331 {approx = true} : vector<16x128xf32> -> vector<16x128xf32>
    %333 = arith.mulf %325, %332 : vector<16x128xf32>
    %334 = arith.addf %315, %333 : vector<16x128xf32>
    %cst_93 = arith.constant 0.707106769 : f32
    %335 = vector.broadcast %cst_93 : f32 to vector<16x128xf32>
    %336 = arith.mulf %334, %335 : vector<16x128xf32>
    %c1_94 = arith.constant 1 : index
    %c1_95 = arith.constant 1 : index
    %c0_96 = arith.constant 0 : index
    %c0_97 = arith.constant 0 : index
    %337 = vector.load %arg6[%c1_94, %c1_95, %c0_96, %c0_97] : memref<4x2x32x16xf32, #tpu.memory_space<vmem>>, vector<1x1x32x16xf32>
    %338 = vector.shape_cast %337 : vector<1x1x32x16xf32> to vector<32x16xf32>
    %cst_98 = arith.constant dense<0.000000e+00> : vector<32x128xf32>
    %339 = tpu.matmul %338, %336, %cst_98 {dimension_numbers = #tpu.dot_dimension_numbers<[1], [0], [0], [1], [0, 0, 1, 1], [], []>} : vector<32x16xf32>, vector<16x128xf32>, vector<32x128xf32> -> vector<32x128xf32>
    %c0_99 = arith.constant 0 : index
    %c7 = arith.constant 7 : index
    %340 = vector.load %arg7[%c0_99, %c7] : memref<32x16xf32, #tpu.memory_space<vmem>>, vector<32x1xf32>
    %341 = vector.broadcast %340 : vector<32x1xf32> to vector<32x128xf32>
    %342 = arith.mulf %339, %341 : vector<32x128xf32>
    %c0_100 = arith.constant 0 : index
    %c7_101 = arith.constant 7 : index
    %343 = vector.load %arg8[%c0_100, %c7_101] : memref<32x16xf32, #tpu.memory_space<vmem>>, vector<32x1xf32>
    %344 = vector.broadcast %343 : vector<32x1xf32> to vector<32x128xf32>
    %345 = arith.addf %342, %344 : vector<32x128xf32>
    %346 = vector.extract_strided_slice %345 {offsets = [0, 0], sizes = [16, 128], strides = [1, 1]} : vector<32x128xf32> to vector<16x128xf32>
    %347 = vector.extract_strided_slice %345 {offsets = [16, 0], sizes = [16, 128], strides = [1, 1]} : vector<32x128xf32> to vector<16x128xf32>
    %cst_102 = arith.constant 0.000000e+00 : f32
    %348 = vector.broadcast %cst_102 : f32 to vector<16x128xf32>
    %349 = arith.subf %348, %347 : vector<16x128xf32>
    %350 = math.exp %349 : vector<16x128xf32>
    %cst_103 = arith.constant 1.000000e+00 : f32
    %351 = vector.broadcast %cst_103 : f32 to vector<16x128xf32>
    %352 = arith.addf %351, %350 : vector<16x128xf32>
    %353 = tpu.reciprocal %352 {approx = true} : vector<16x128xf32> -> vector<16x128xf32>
    %354 = arith.mulf %346, %353 : vector<16x128xf32>
    %355 = arith.addf %336, %354 : vector<16x128xf32>
    %cst_104 = arith.constant 0.707106769 : f32
    %356 = vector.broadcast %cst_104 : f32 to vector<16x128xf32>
    %357 = arith.mulf %355, %356 : vector<16x128xf32>
    %358 = vector.extract_strided_slice %357 {offsets = [0, 0], sizes = [8, 128], strides = [1, 1]} : vector<16x128xf32> to vector<8x128xf32>
    %cst_105 = arith.constant 0.000000e+00 : f32
    %359 = vector.broadcast %cst_105 : f32 to vector<8x128xf32>
    %360 = arith.maximumf %358, %359 : vector<8x128xf32>
    %361 = arith.addf %89, %360 : vector<8x128xf32>
    %362 = vector.extract_strided_slice %357 {offsets = [8, 0], sizes = [8, 128], strides = [1, 1]} : vector<16x128xf32> to vector<8x128xf32>
    %c1_106 = arith.constant 1 : index
    %c0_107 = arith.constant 0 : index
    %c0_108 = arith.constant 0 : index
    %363 = vector.load %arg9[%c1_106, %c0_107, %c0_108] : memref<3x16x8xf32, #tpu.memory_space<vmem>>, vector<1x16x8xf32>
    %364 = vector.shape_cast %363 : vector<1x16x8xf32> to vector<16x8xf32>
    %cst_109 = arith.constant dense<0.000000e+00> : vector<16x128xf32>
    %365 = tpu.matmul %364, %362, %cst_109 {dimension_numbers = #tpu.dot_dimension_numbers<[1], [0], [0], [1], [0, 0, 1, 1], [], []>} : vector<16x8xf32>, vector<8x128xf32>, vector<16x128xf32> -> vector<16x128xf32>
    %c0_110 = arith.constant 0 : index
    %c1_111 = arith.constant 1 : index
    %366 = vector.load %arg10[%c0_110, %c1_111] : memref<16x3xf32, #tpu.memory_space<vmem>>, vector<16x1xf32>
    %367 = vector.broadcast %366 : vector<16x1xf32> to vector<16x128xf32>
    %368 = arith.mulf %365, %367 : vector<16x128xf32>
    %c0_112 = arith.constant 0 : index
    %c1_113 = arith.constant 1 : index
    %369 = vector.load %arg11[%c0_112, %c1_113] : memref<16x3xf32, #tpu.memory_space<vmem>>, vector<16x1xf32>
    %370 = vector.broadcast %369 : vector<16x1xf32> to vector<16x128xf32>
    %371 = arith.addf %368, %370 : vector<16x128xf32>
    %372 = arith.mulf %371, %277 : vector<16x128xf32>
    %cst_114 = arith.constant dense<0xFF800000> : vector<128xf32>
    %373 = vector.multi_reduction <maximumf>, %372, %cst_114 [0] : vector<16x128xf32> to vector<128xf32>
    %374 = vector.shape_cast %373 : vector<128xf32> to vector<1x128xf32>
    %375 = vector.broadcast %374 : vector<1x128xf32> to vector<16x128xf32>
    %376 = arith.subf %372, %375 : vector<16x128xf32>
    %cst_115 = arith.constant 0.000000e+00 : f32
    %377 = vector.broadcast %cst_115 : f32 to vector<16x128xf32>
    %cst_116 = arith.constant 0.000000e+00 : f32
    %378 = vector.broadcast %cst_116 : f32 to vector<16x128xf32>
    %379 = vector.extract_strided_slice %376 {offsets = [0, 0], sizes = [1, 128], strides = [1, 1]} : vector<16x128xf32> to vector<1x128xf32>
    %380 = vector.broadcast %379 : vector<1x128xf32> to vector<16x128xf32>
    %381 = arith.cmpf oge, %380, %376 : vector<16x128xf32>
    %382 = arith.extui %381 : vector<16x128xi1> to vector<16x128xi32>
    %383 = arith.sitofp %382 : vector<16x128xi32> to vector<16x128xf32>
    %384 = arith.addf %377, %383 : vector<16x128xf32>
    %385 = vector.broadcast %379 : vector<1x128xf32> to vector<16x128xf32>
    %386 = arith.mulf %383, %385 : vector<16x128xf32>
    %387 = arith.addf %378, %386 : vector<16x128xf32>
    %388 = vector.extract_strided_slice %376 {offsets = [1, 0], sizes = [1, 128], strides = [1, 1]} : vector<16x128xf32> to vector<1x128xf32>
    %389 = vector.broadcast %388 : vector<1x128xf32> to vector<16x128xf32>
    %390 = arith.cmpf oge, %389, %376 : vector<16x128xf32>
    %391 = arith.extui %390 : vector<16x128xi1> to vector<16x128xi32>
    %392 = arith.sitofp %391 : vector<16x128xi32> to vector<16x128xf32>
    %393 = arith.addf %384, %392 : vector<16x128xf32>
    %394 = vector.broadcast %388 : vector<1x128xf32> to vector<16x128xf32>
    %395 = arith.mulf %392, %394 : vector<16x128xf32>
    %396 = arith.addf %387, %395 : vector<16x128xf32>
    %397 = vector.extract_strided_slice %376 {offsets = [2, 0], sizes = [1, 128], strides = [1, 1]} : vector<16x128xf32> to vector<1x128xf32>
    %398 = vector.broadcast %397 : vector<1x128xf32> to vector<16x128xf32>
    %399 = arith.cmpf oge, %398, %376 : vector<16x128xf32>
    %400 = arith.extui %399 : vector<16x128xi1> to vector<16x128xi32>
    %401 = arith.sitofp %400 : vector<16x128xi32> to vector<16x128xf32>
    %402 = arith.addf %393, %401 : vector<16x128xf32>
    %403 = vector.broadcast %397 : vector<1x128xf32> to vector<16x128xf32>
    %404 = arith.mulf %401, %403 : vector<16x128xf32>
    %405 = arith.addf %396, %404 : vector<16x128xf32>
    %406 = vector.extract_strided_slice %376 {offsets = [3, 0], sizes = [1, 128], strides = [1, 1]} : vector<16x128xf32> to vector<1x128xf32>
    %407 = vector.broadcast %406 : vector<1x128xf32> to vector<16x128xf32>
    %408 = arith.cmpf oge, %407, %376 : vector<16x128xf32>
    %409 = arith.extui %408 : vector<16x128xi1> to vector<16x128xi32>
    %410 = arith.sitofp %409 : vector<16x128xi32> to vector<16x128xf32>
    %411 = arith.addf %402, %410 : vector<16x128xf32>
    %412 = vector.broadcast %406 : vector<1x128xf32> to vector<16x128xf32>
    %413 = arith.mulf %410, %412 : vector<16x128xf32>
    %414 = arith.addf %405, %413 : vector<16x128xf32>
    %415 = vector.extract_strided_slice %376 {offsets = [4, 0], sizes = [1, 128], strides = [1, 1]} : vector<16x128xf32> to vector<1x128xf32>
    %416 = vector.broadcast %415 : vector<1x128xf32> to vector<16x128xf32>
    %417 = arith.cmpf oge, %416, %376 : vector<16x128xf32>
    %418 = arith.extui %417 : vector<16x128xi1> to vector<16x128xi32>
    %419 = arith.sitofp %418 : vector<16x128xi32> to vector<16x128xf32>
    %420 = arith.addf %411, %419 : vector<16x128xf32>
    %421 = vector.broadcast %415 : vector<1x128xf32> to vector<16x128xf32>
    %422 = arith.mulf %419, %421 : vector<16x128xf32>
    %423 = arith.addf %414, %422 : vector<16x128xf32>
    %424 = vector.extract_strided_slice %376 {offsets = [5, 0], sizes = [1, 128], strides = [1, 1]} : vector<16x128xf32> to vector<1x128xf32>
    %425 = vector.broadcast %424 : vector<1x128xf32> to vector<16x128xf32>
    %426 = arith.cmpf oge, %425, %376 : vector<16x128xf32>
    %427 = arith.extui %426 : vector<16x128xi1> to vector<16x128xi32>
    %428 = arith.sitofp %427 : vector<16x128xi32> to vector<16x128xf32>
    %429 = arith.addf %420, %428 : vector<16x128xf32>
    %430 = vector.broadcast %424 : vector<1x128xf32> to vector<16x128xf32>
    %431 = arith.mulf %428, %430 : vector<16x128xf32>
    %432 = arith.addf %423, %431 : vector<16x128xf32>
    %433 = vector.extract_strided_slice %376 {offsets = [6, 0], sizes = [1, 128], strides = [1, 1]} : vector<16x128xf32> to vector<1x128xf32>
    %434 = vector.broadcast %433 : vector<1x128xf32> to vector<16x128xf32>
    %435 = arith.cmpf oge, %434, %376 : vector<16x128xf32>
    %436 = arith.extui %435 : vector<16x128xi1> to vector<16x128xi32>
    %437 = arith.sitofp %436 : vector<16x128xi32> to vector<16x128xf32>
    %438 = arith.addf %429, %437 : vector<16x128xf32>
    %439 = vector.broadcast %433 : vector<1x128xf32> to vector<16x128xf32>
    %440 = arith.mulf %437, %439 : vector<16x128xf32>
    %441 = arith.addf %432, %440 : vector<16x128xf32>
    %442 = vector.extract_strided_slice %376 {offsets = [7, 0], sizes = [1, 128], strides = [1, 1]} : vector<16x128xf32> to vector<1x128xf32>
    %443 = vector.broadcast %442 : vector<1x128xf32> to vector<16x128xf32>
    %444 = arith.cmpf oge, %443, %376 : vector<16x128xf32>
    %445 = arith.extui %444 : vector<16x128xi1> to vector<16x128xi32>
    %446 = arith.sitofp %445 : vector<16x128xi32> to vector<16x128xf32>
    %447 = arith.addf %438, %446 : vector<16x128xf32>
    %448 = vector.broadcast %442 : vector<1x128xf32> to vector<16x128xf32>
    %449 = arith.mulf %446, %448 : vector<16x128xf32>
    %450 = arith.addf %441, %449 : vector<16x128xf32>
    %451 = vector.extract_strided_slice %376 {offsets = [8, 0], sizes = [1, 128], strides = [1, 1]} : vector<16x128xf32> to vector<1x128xf32>
    %452 = vector.broadcast %451 : vector<1x128xf32> to vector<16x128xf32>
    %453 = arith.cmpf oge, %452, %376 : vector<16x128xf32>
    %454 = arith.extui %453 : vector<16x128xi1> to vector<16x128xi32>
    %455 = arith.sitofp %454 : vector<16x128xi32> to vector<16x128xf32>
    %456 = arith.addf %447, %455 : vector<16x128xf32>
    %457 = vector.broadcast %451 : vector<1x128xf32> to vector<16x128xf32>
    %458 = arith.mulf %455, %457 : vector<16x128xf32>
    %459 = arith.addf %450, %458 : vector<16x128xf32>
    %460 = vector.extract_strided_slice %376 {offsets = [9, 0], sizes = [1, 128], strides = [1, 1]} : vector<16x128xf32> to vector<1x128xf32>
    %461 = vector.broadcast %460 : vector<1x128xf32> to vector<16x128xf32>
    %462 = arith.cmpf oge, %461, %376 : vector<16x128xf32>
    %463 = arith.extui %462 : vector<16x128xi1> to vector<16x128xi32>
    %464 = arith.sitofp %463 : vector<16x128xi32> to vector<16x128xf32>
    %465 = arith.addf %456, %464 : vector<16x128xf32>
    %466 = vector.broadcast %460 : vector<1x128xf32> to vector<16x128xf32>
    %467 = arith.mulf %464, %466 : vector<16x128xf32>
    %468 = arith.addf %459, %467 : vector<16x128xf32>
    %469 = vector.extract_strided_slice %376 {offsets = [10, 0], sizes = [1, 128], strides = [1, 1]} : vector<16x128xf32> to vector<1x128xf32>
    %470 = vector.broadcast %469 : vector<1x128xf32> to vector<16x128xf32>
    %471 = arith.cmpf oge, %470, %376 : vector<16x128xf32>
    %472 = arith.extui %471 : vector<16x128xi1> to vector<16x128xi32>
    %473 = arith.sitofp %472 : vector<16x128xi32> to vector<16x128xf32>
    %474 = arith.addf %465, %473 : vector<16x128xf32>
    %475 = vector.broadcast %469 : vector<1x128xf32> to vector<16x128xf32>
    %476 = arith.mulf %473, %475 : vector<16x128xf32>
    %477 = arith.addf %468, %476 : vector<16x128xf32>
    %478 = vector.extract_strided_slice %376 {offsets = [11, 0], sizes = [1, 128], strides = [1, 1]} : vector<16x128xf32> to vector<1x128xf32>
    %479 = vector.broadcast %478 : vector<1x128xf32> to vector<16x128xf32>
    %480 = arith.cmpf oge, %479, %376 : vector<16x128xf32>
    %481 = arith.extui %480 : vector<16x128xi1> to vector<16x128xi32>
    %482 = arith.sitofp %481 : vector<16x128xi32> to vector<16x128xf32>
    %483 = arith.addf %474, %482 : vector<16x128xf32>
    %484 = vector.broadcast %478 : vector<1x128xf32> to vector<16x128xf32>
    %485 = arith.mulf %482, %484 : vector<16x128xf32>
    %486 = arith.addf %477, %485 : vector<16x128xf32>
    %487 = vector.extract_strided_slice %376 {offsets = [12, 0], sizes = [1, 128], strides = [1, 1]} : vector<16x128xf32> to vector<1x128xf32>
    %488 = vector.broadcast %487 : vector<1x128xf32> to vector<16x128xf32>
    %489 = arith.cmpf oge, %488, %376 : vector<16x128xf32>
    %490 = arith.extui %489 : vector<16x128xi1> to vector<16x128xi32>
    %491 = arith.sitofp %490 : vector<16x128xi32> to vector<16x128xf32>
    %492 = arith.addf %483, %491 : vector<16x128xf32>
    %493 = vector.broadcast %487 : vector<1x128xf32> to vector<16x128xf32>
    %494 = arith.mulf %491, %493 : vector<16x128xf32>
    %495 = arith.addf %486, %494 : vector<16x128xf32>
    %496 = vector.extract_strided_slice %376 {offsets = [13, 0], sizes = [1, 128], strides = [1, 1]} : vector<16x128xf32> to vector<1x128xf32>
    %497 = vector.broadcast %496 : vector<1x128xf32> to vector<16x128xf32>
    %498 = arith.cmpf oge, %497, %376 : vector<16x128xf32>
    %499 = arith.extui %498 : vector<16x128xi1> to vector<16x128xi32>
    %500 = arith.sitofp %499 : vector<16x128xi32> to vector<16x128xf32>
    %501 = arith.addf %492, %500 : vector<16x128xf32>
    %502 = vector.broadcast %496 : vector<1x128xf32> to vector<16x128xf32>
    %503 = arith.mulf %500, %502 : vector<16x128xf32>
    %504 = arith.addf %495, %503 : vector<16x128xf32>
    %505 = vector.extract_strided_slice %376 {offsets = [14, 0], sizes = [1, 128], strides = [1, 1]} : vector<16x128xf32> to vector<1x128xf32>
    %506 = vector.broadcast %505 : vector<1x128xf32> to vector<16x128xf32>
    %507 = arith.cmpf oge, %506, %376 : vector<16x128xf32>
    %508 = arith.extui %507 : vector<16x128xi1> to vector<16x128xi32>
    %509 = arith.sitofp %508 : vector<16x128xi32> to vector<16x128xf32>
    %510 = arith.addf %501, %509 : vector<16x128xf32>
    %511 = vector.broadcast %505 : vector<1x128xf32> to vector<16x128xf32>
    %512 = arith.mulf %509, %511 : vector<16x128xf32>
    %513 = arith.addf %504, %512 : vector<16x128xf32>
    %514 = vector.extract_strided_slice %376 {offsets = [15, 0], sizes = [1, 128], strides = [1, 1]} : vector<16x128xf32> to vector<1x128xf32>
    %515 = vector.broadcast %514 : vector<1x128xf32> to vector<16x128xf32>
    %516 = arith.cmpf oge, %515, %376 : vector<16x128xf32>
    %517 = arith.extui %516 : vector<16x128xi1> to vector<16x128xi32>
    %518 = arith.sitofp %517 : vector<16x128xi32> to vector<16x128xf32>
    %519 = arith.addf %510, %518 : vector<16x128xf32>
    %520 = vector.broadcast %514 : vector<1x128xf32> to vector<16x128xf32>
    %521 = arith.mulf %518, %520 : vector<16x128xf32>
    %522 = arith.addf %513, %521 : vector<16x128xf32>
    %523 = arith.mulf %519, %376 : vector<16x128xf32>
    %cst_117 = arith.constant 1.000000e+00 : f32
    %524 = vector.broadcast %cst_117 : f32 to vector<16x128xf32>
    %525 = arith.addf %524, %523 : vector<16x128xf32>
    %526 = arith.cmpf ogt, %525, %522 : vector<16x128xf32>
    %527 = arith.extui %526 : vector<16x128xi1> to vector<16x128xi32>
    %528 = arith.sitofp %527 : vector<16x128xi32> to vector<16x128xf32>
    %cst_118 = arith.constant dense<0.000000e+00> : vector<128xf32>
    %529 = vector.multi_reduction <add>, %528, %cst_118 [0] : vector<16x128xf32> to vector<128xf32>
    %530 = vector.shape_cast %529 : vector<128xf32> to vector<1x128xf32>
    %531 = arith.mulf %376, %528 : vector<16x128xf32>
    %cst_119 = arith.constant dense<0.000000e+00> : vector<128xf32>
    %532 = vector.multi_reduction <add>, %531, %cst_119 [0] : vector<16x128xf32> to vector<128xf32>
    %533 = vector.shape_cast %532 : vector<128xf32> to vector<1x128xf32>
    %cst_120 = arith.constant 1.000000e+00 : f32
    %534 = vector.broadcast %cst_120 : f32 to vector<1x128xf32>
    %535 = arith.subf %533, %534 : vector<1x128xf32>
    %536 = arith.divf %535, %530 : vector<1x128xf32>
    %537 = vector.broadcast %536 : vector<1x128xf32> to vector<16x128xf32>
    %538 = arith.subf %376, %537 : vector<16x128xf32>
    %cst_121 = arith.constant 0.000000e+00 : f32
    %539 = vector.broadcast %cst_121 : f32 to vector<16x128xf32>
    %540 = arith.maximumf %538, %539 : vector<16x128xf32>
    %cst_122 = arith.constant 1.000000e-15 : f32
    %541 = vector.broadcast %cst_122 : f32 to vector<16x128xf32>
    %542 = arith.addf %540, %541 : vector<16x128xf32>
    %543 = math.log %542 : vector<16x128xf32>
    %544 = arith.mulf %540, %543 : vector<16x128xf32>
    %cst_123 = arith.constant dense<0.000000e+00> : vector<128xf32>
    %545 = vector.multi_reduction <add>, %544, %cst_123 [0] : vector<16x128xf32> to vector<128xf32>
    %546 = vector.shape_cast %545 : vector<128xf32> to vector<1x128xf32>
    %547 = arith.addf %274, %546 : vector<1x128xf32>
    %cst_124 = arith.constant 1.300000e+00 : f32
    %548 = vector.broadcast %cst_124 : f32 to vector<16x128xf32>
    %549 = arith.subf %548, %540 : vector<16x128xf32>
    %550 = arith.mulf %549, %277 : vector<16x128xf32>
    %551 = arith.mulf %540, %6 : vector<16x128xf32>
    %c0_125 = arith.constant 0 : index
    %c0_126 = arith.constant 0 : index
    %552 = vector.load %arg4[%c0_125, %c0_126] : memref<32x16xf32, #tpu.memory_space<vmem>>, vector<32x16xf32>
    %cst_127 = arith.constant dense<0.000000e+00> : vector<32x128xf32>
    %553 = tpu.matmul %552, %551, %cst_127 {dimension_numbers = #tpu.dot_dimension_numbers<[1], [0], [0], [1], [0, 0, 1, 1], [], []>} : vector<32x16xf32>, vector<16x128xf32>, vector<32x128xf32> -> vector<32x128xf32>
    %c0_128 = arith.constant 0 : index
    %c8 = arith.constant 8 : index
    %554 = vector.load %arg7[%c0_128, %c8] : memref<32x16xf32, #tpu.memory_space<vmem>>, vector<32x1xf32>
    %555 = vector.broadcast %554 : vector<32x1xf32> to vector<32x128xf32>
    %556 = arith.mulf %553, %555 : vector<32x128xf32>
    %c0_129 = arith.constant 0 : index
    %c8_130 = arith.constant 8 : index
    %557 = vector.load %arg8[%c0_129, %c8_130] : memref<32x16xf32, #tpu.memory_space<vmem>>, vector<32x1xf32>
    %558 = vector.broadcast %557 : vector<32x1xf32> to vector<32x128xf32>
    %559 = arith.addf %556, %558 : vector<32x128xf32>
    %560 = vector.extract_strided_slice %559 {offsets = [0, 0], sizes = [16, 128], strides = [1, 1]} : vector<32x128xf32> to vector<16x128xf32>
    %561 = vector.extract_strided_slice %559 {offsets = [16, 0], sizes = [16, 128], strides = [1, 1]} : vector<32x128xf32> to vector<16x128xf32>
    %cst_131 = arith.constant 0.000000e+00 : f32
    %562 = vector.broadcast %cst_131 : f32 to vector<16x128xf32>
    %563 = arith.subf %562, %561 : vector<16x128xf32>
    %564 = math.exp %563 : vector<16x128xf32>
    %cst_132 = arith.constant 1.000000e+00 : f32
    %565 = vector.broadcast %cst_132 : f32 to vector<16x128xf32>
    %566 = arith.addf %565, %564 : vector<16x128xf32>
    %567 = tpu.reciprocal %566 {approx = true} : vector<16x128xf32> -> vector<16x128xf32>
    %568 = arith.mulf %560, %567 : vector<16x128xf32>
    %c0_133 = arith.constant 0 : index
    %c0_134 = arith.constant 0 : index
    %569 = vector.load %arg5[%c0_133, %c0_134] : memref<32x16xf32, #tpu.memory_space<vmem>>, vector<32x16xf32>
    %cst_135 = arith.constant dense<0.000000e+00> : vector<32x128xf32>
    %570 = tpu.matmul %569, %568, %cst_135 {dimension_numbers = #tpu.dot_dimension_numbers<[1], [0], [0], [1], [0, 0, 1, 1], [], []>} : vector<32x16xf32>, vector<16x128xf32>, vector<32x128xf32> -> vector<32x128xf32>
    %c0_136 = arith.constant 0 : index
    %c9 = arith.constant 9 : index
    %571 = vector.load %arg7[%c0_136, %c9] : memref<32x16xf32, #tpu.memory_space<vmem>>, vector<32x1xf32>
    %572 = vector.broadcast %571 : vector<32x1xf32> to vector<32x128xf32>
    %573 = arith.mulf %570, %572 : vector<32x128xf32>
    %c0_137 = arith.constant 0 : index
    %c9_138 = arith.constant 9 : index
    %574 = vector.load %arg8[%c0_137, %c9_138] : memref<32x16xf32, #tpu.memory_space<vmem>>, vector<32x1xf32>
    %575 = vector.broadcast %574 : vector<32x1xf32> to vector<32x128xf32>
    %576 = arith.addf %573, %575 : vector<32x128xf32>
    %577 = vector.extract_strided_slice %576 {offsets = [0, 0], sizes = [16, 128], strides = [1, 1]} : vector<32x128xf32> to vector<16x128xf32>
    %578 = vector.extract_strided_slice %576 {offsets = [16, 0], sizes = [16, 128], strides = [1, 1]} : vector<32x128xf32> to vector<16x128xf32>
    %cst_139 = arith.constant 0.000000e+00 : f32
    %579 = vector.broadcast %cst_139 : f32 to vector<16x128xf32>
    %580 = arith.subf %579, %578 : vector<16x128xf32>
    %581 = math.exp %580 : vector<16x128xf32>
    %cst_140 = arith.constant 1.000000e+00 : f32
    %582 = vector.broadcast %cst_140 : f32 to vector<16x128xf32>
    %583 = arith.addf %582, %581 : vector<16x128xf32>
    %584 = tpu.reciprocal %583 {approx = true} : vector<16x128xf32> -> vector<16x128xf32>
    %585 = arith.mulf %577, %584 : vector<16x128xf32>
    %586 = arith.addf %568, %585 : vector<16x128xf32>
    %cst_141 = arith.constant 0.707106769 : f32
    %587 = vector.broadcast %cst_141 : f32 to vector<16x128xf32>
    %588 = arith.mulf %586, %587 : vector<16x128xf32>
    %c2_142 = arith.constant 2 : index
    %c0_143 = arith.constant 0 : index
    %c0_144 = arith.constant 0 : index
    %c0_145 = arith.constant 0 : index
    %589 = vector.load %arg6[%c2_142, %c0_143, %c0_144, %c0_145] : memref<4x2x32x16xf32, #tpu.memory_space<vmem>>, vector<1x1x32x16xf32>
    %590 = vector.shape_cast %589 : vector<1x1x32x16xf32> to vector<32x16xf32>
    %cst_146 = arith.constant dense<0.000000e+00> : vector<32x128xf32>
    %591 = tpu.matmul %590, %588, %cst_146 {dimension_numbers = #tpu.dot_dimension_numbers<[1], [0], [0], [1], [0, 0, 1, 1], [], []>} : vector<32x16xf32>, vector<16x128xf32>, vector<32x128xf32> -> vector<32x128xf32>
    %c0_147 = arith.constant 0 : index
    %c10 = arith.constant 10 : index
    %592 = vector.load %arg7[%c0_147, %c10] : memref<32x16xf32, #tpu.memory_space<vmem>>, vector<32x1xf32>
    %593 = vector.broadcast %592 : vector<32x1xf32> to vector<32x128xf32>
    %594 = arith.mulf %591, %593 : vector<32x128xf32>
    %c0_148 = arith.constant 0 : index
    %c10_149 = arith.constant 10 : index
    %595 = vector.load %arg8[%c0_148, %c10_149] : memref<32x16xf32, #tpu.memory_space<vmem>>, vector<32x1xf32>
    %596 = vector.broadcast %595 : vector<32x1xf32> to vector<32x128xf32>
    %597 = arith.addf %594, %596 : vector<32x128xf32>
    %598 = vector.extract_strided_slice %597 {offsets = [0, 0], sizes = [16, 128], strides = [1, 1]} : vector<32x128xf32> to vector<16x128xf32>
    %599 = vector.extract_strided_slice %597 {offsets = [16, 0], sizes = [16, 128], strides = [1, 1]} : vector<32x128xf32> to vector<16x128xf32>
    %cst_150 = arith.constant 0.000000e+00 : f32
    %600 = vector.broadcast %cst_150 : f32 to vector<16x128xf32>
    %601 = arith.subf %600, %599 : vector<16x128xf32>
    %602 = math.exp %601 : vector<16x128xf32>
    %cst_151 = arith.constant 1.000000e+00 : f32
    %603 = vector.broadcast %cst_151 : f32 to vector<16x128xf32>
    %604 = arith.addf %603, %602 : vector<16x128xf32>
    %605 = tpu.reciprocal %604 {approx = true} : vector<16x128xf32> -> vector<16x128xf32>
    %606 = arith.mulf %598, %605 : vector<16x128xf32>
    %607 = arith.addf %588, %606 : vector<16x128xf32>
    %cst_152 = arith.constant 0.707106769 : f32
    %608 = vector.broadcast %cst_152 : f32 to vector<16x128xf32>
    %609 = arith.mulf %607, %608 : vector<16x128xf32>
    %c2_153 = arith.constant 2 : index
    %c1_154 = arith.constant 1 : index
    %c0_155 = arith.constant 0 : index
    %c0_156 = arith.constant 0 : index
    %610 = vector.load %arg6[%c2_153, %c1_154, %c0_155, %c0_156] : memref<4x2x32x16xf32, #tpu.memory_space<vmem>>, vector<1x1x32x16xf32>
    %611 = vector.shape_cast %610 : vector<1x1x32x16xf32> to vector<32x16xf32>
    %cst_157 = arith.constant dense<0.000000e+00> : vector<32x128xf32>
    %612 = tpu.matmul %611, %609, %cst_157 {dimension_numbers = #tpu.dot_dimension_numbers<[1], [0], [0], [1], [0, 0, 1, 1], [], []>} : vector<32x16xf32>, vector<16x128xf32>, vector<32x128xf32> -> vector<32x128xf32>
    %c0_158 = arith.constant 0 : index
    %c11 = arith.constant 11 : index
    %613 = vector.load %arg7[%c0_158, %c11] : memref<32x16xf32, #tpu.memory_space<vmem>>, vector<32x1xf32>
    %614 = vector.broadcast %613 : vector<32x1xf32> to vector<32x128xf32>
    %615 = arith.mulf %612, %614 : vector<32x128xf32>
    %c0_159 = arith.constant 0 : index
    %c11_160 = arith.constant 11 : index
    %616 = vector.load %arg8[%c0_159, %c11_160] : memref<32x16xf32, #tpu.memory_space<vmem>>, vector<32x1xf32>
    %617 = vector.broadcast %616 : vector<32x1xf32> to vector<32x128xf32>
    %618 = arith.addf %615, %617 : vector<32x128xf32>
    %619 = vector.extract_strided_slice %618 {offsets = [0, 0], sizes = [16, 128], strides = [1, 1]} : vector<32x128xf32> to vector<16x128xf32>
    %620 = vector.extract_strided_slice %618 {offsets = [16, 0], sizes = [16, 128], strides = [1, 1]} : vector<32x128xf32> to vector<16x128xf32>
    %cst_161 = arith.constant 0.000000e+00 : f32
    %621 = vector.broadcast %cst_161 : f32 to vector<16x128xf32>
    %622 = arith.subf %621, %620 : vector<16x128xf32>
    %623 = math.exp %622 : vector<16x128xf32>
    %cst_162 = arith.constant 1.000000e+00 : f32
    %624 = vector.broadcast %cst_162 : f32 to vector<16x128xf32>
    %625 = arith.addf %624, %623 : vector<16x128xf32>
    %626 = tpu.reciprocal %625 {approx = true} : vector<16x128xf32> -> vector<16x128xf32>
    %627 = arith.mulf %619, %626 : vector<16x128xf32>
    %628 = arith.addf %609, %627 : vector<16x128xf32>
    %cst_163 = arith.constant 0.707106769 : f32
    %629 = vector.broadcast %cst_163 : f32 to vector<16x128xf32>
    %630 = arith.mulf %628, %629 : vector<16x128xf32>
    %631 = vector.extract_strided_slice %630 {offsets = [0, 0], sizes = [8, 128], strides = [1, 1]} : vector<16x128xf32> to vector<8x128xf32>
    %cst_164 = arith.constant 0.000000e+00 : f32
    %632 = vector.broadcast %cst_164 : f32 to vector<8x128xf32>
    %633 = arith.maximumf %631, %632 : vector<8x128xf32>
    %634 = arith.addf %361, %633 : vector<8x128xf32>
    %635 = vector.extract_strided_slice %630 {offsets = [8, 0], sizes = [8, 128], strides = [1, 1]} : vector<16x128xf32> to vector<8x128xf32>
    %c2_165 = arith.constant 2 : index
    %c0_166 = arith.constant 0 : index
    %c0_167 = arith.constant 0 : index
    %636 = vector.load %arg9[%c2_165, %c0_166, %c0_167] : memref<3x16x8xf32, #tpu.memory_space<vmem>>, vector<1x16x8xf32>
    %637 = vector.shape_cast %636 : vector<1x16x8xf32> to vector<16x8xf32>
    %cst_168 = arith.constant dense<0.000000e+00> : vector<16x128xf32>
    %638 = tpu.matmul %637, %635, %cst_168 {dimension_numbers = #tpu.dot_dimension_numbers<[1], [0], [0], [1], [0, 0, 1, 1], [], []>} : vector<16x8xf32>, vector<8x128xf32>, vector<16x128xf32> -> vector<16x128xf32>
    %c0_169 = arith.constant 0 : index
    %c2_170 = arith.constant 2 : index
    %639 = vector.load %arg10[%c0_169, %c2_170] : memref<16x3xf32, #tpu.memory_space<vmem>>, vector<16x1xf32>
    %640 = vector.broadcast %639 : vector<16x1xf32> to vector<16x128xf32>
    %641 = arith.mulf %638, %640 : vector<16x128xf32>
    %c0_171 = arith.constant 0 : index
    %c2_172 = arith.constant 2 : index
    %642 = vector.load %arg11[%c0_171, %c2_172] : memref<16x3xf32, #tpu.memory_space<vmem>>, vector<16x1xf32>
    %643 = vector.broadcast %642 : vector<16x1xf32> to vector<16x128xf32>
    %644 = arith.addf %641, %643 : vector<16x128xf32>
    %645 = arith.mulf %644, %550 : vector<16x128xf32>
    %cst_173 = arith.constant dense<0xFF800000> : vector<128xf32>
    %646 = vector.multi_reduction <maximumf>, %645, %cst_173 [0] : vector<16x128xf32> to vector<128xf32>
    %647 = vector.shape_cast %646 : vector<128xf32> to vector<1x128xf32>
    %648 = vector.broadcast %647 : vector<1x128xf32> to vector<16x128xf32>
    %649 = arith.subf %645, %648 : vector<16x128xf32>
    %cst_174 = arith.constant 0.000000e+00 : f32
    %650 = vector.broadcast %cst_174 : f32 to vector<16x128xf32>
    %cst_175 = arith.constant 0.000000e+00 : f32
    %651 = vector.broadcast %cst_175 : f32 to vector<16x128xf32>
    %652 = vector.extract_strided_slice %649 {offsets = [0, 0], sizes = [1, 128], strides = [1, 1]} : vector<16x128xf32> to vector<1x128xf32>
    %653 = vector.broadcast %652 : vector<1x128xf32> to vector<16x128xf32>
    %654 = arith.cmpf oge, %653, %649 : vector<16x128xf32>
    %655 = arith.extui %654 : vector<16x128xi1> to vector<16x128xi32>
    %656 = arith.sitofp %655 : vector<16x128xi32> to vector<16x128xf32>
    %657 = arith.addf %650, %656 : vector<16x128xf32>
    %658 = vector.broadcast %652 : vector<1x128xf32> to vector<16x128xf32>
    %659 = arith.mulf %656, %658 : vector<16x128xf32>
    %660 = arith.addf %651, %659 : vector<16x128xf32>
    %661 = vector.extract_strided_slice %649 {offsets = [1, 0], sizes = [1, 128], strides = [1, 1]} : vector<16x128xf32> to vector<1x128xf32>
    %662 = vector.broadcast %661 : vector<1x128xf32> to vector<16x128xf32>
    %663 = arith.cmpf oge, %662, %649 : vector<16x128xf32>
    %664 = arith.extui %663 : vector<16x128xi1> to vector<16x128xi32>
    %665 = arith.sitofp %664 : vector<16x128xi32> to vector<16x128xf32>
    %666 = arith.addf %657, %665 : vector<16x128xf32>
    %667 = vector.broadcast %661 : vector<1x128xf32> to vector<16x128xf32>
    %668 = arith.mulf %665, %667 : vector<16x128xf32>
    %669 = arith.addf %660, %668 : vector<16x128xf32>
    %670 = vector.extract_strided_slice %649 {offsets = [2, 0], sizes = [1, 128], strides = [1, 1]} : vector<16x128xf32> to vector<1x128xf32>
    %671 = vector.broadcast %670 : vector<1x128xf32> to vector<16x128xf32>
    %672 = arith.cmpf oge, %671, %649 : vector<16x128xf32>
    %673 = arith.extui %672 : vector<16x128xi1> to vector<16x128xi32>
    %674 = arith.sitofp %673 : vector<16x128xi32> to vector<16x128xf32>
    %675 = arith.addf %666, %674 : vector<16x128xf32>
    %676 = vector.broadcast %670 : vector<1x128xf32> to vector<16x128xf32>
    %677 = arith.mulf %674, %676 : vector<16x128xf32>
    %678 = arith.addf %669, %677 : vector<16x128xf32>
    %679 = vector.extract_strided_slice %649 {offsets = [3, 0], sizes = [1, 128], strides = [1, 1]} : vector<16x128xf32> to vector<1x128xf32>
    %680 = vector.broadcast %679 : vector<1x128xf32> to vector<16x128xf32>
    %681 = arith.cmpf oge, %680, %649 : vector<16x128xf32>
    %682 = arith.extui %681 : vector<16x128xi1> to vector<16x128xi32>
    %683 = arith.sitofp %682 : vector<16x128xi32> to vector<16x128xf32>
    %684 = arith.addf %675, %683 : vector<16x128xf32>
    %685 = vector.broadcast %679 : vector<1x128xf32> to vector<16x128xf32>
    %686 = arith.mulf %683, %685 : vector<16x128xf32>
    %687 = arith.addf %678, %686 : vector<16x128xf32>
    %688 = vector.extract_strided_slice %649 {offsets = [4, 0], sizes = [1, 128], strides = [1, 1]} : vector<16x128xf32> to vector<1x128xf32>
    %689 = vector.broadcast %688 : vector<1x128xf32> to vector<16x128xf32>
    %690 = arith.cmpf oge, %689, %649 : vector<16x128xf32>
    %691 = arith.extui %690 : vector<16x128xi1> to vector<16x128xi32>
    %692 = arith.sitofp %691 : vector<16x128xi32> to vector<16x128xf32>
    %693 = arith.addf %684, %692 : vector<16x128xf32>
    %694 = vector.broadcast %688 : vector<1x128xf32> to vector<16x128xf32>
    %695 = arith.mulf %692, %694 : vector<16x128xf32>
    %696 = arith.addf %687, %695 : vector<16x128xf32>
    %697 = vector.extract_strided_slice %649 {offsets = [5, 0], sizes = [1, 128], strides = [1, 1]} : vector<16x128xf32> to vector<1x128xf32>
    %698 = vector.broadcast %697 : vector<1x128xf32> to vector<16x128xf32>
    %699 = arith.cmpf oge, %698, %649 : vector<16x128xf32>
    %700 = arith.extui %699 : vector<16x128xi1> to vector<16x128xi32>
    %701 = arith.sitofp %700 : vector<16x128xi32> to vector<16x128xf32>
    %702 = arith.addf %693, %701 : vector<16x128xf32>
    %703 = vector.broadcast %697 : vector<1x128xf32> to vector<16x128xf32>
    %704 = arith.mulf %701, %703 : vector<16x128xf32>
    %705 = arith.addf %696, %704 : vector<16x128xf32>
    %706 = vector.extract_strided_slice %649 {offsets = [6, 0], sizes = [1, 128], strides = [1, 1]} : vector<16x128xf32> to vector<1x128xf32>
    %707 = vector.broadcast %706 : vector<1x128xf32> to vector<16x128xf32>
    %708 = arith.cmpf oge, %707, %649 : vector<16x128xf32>
    %709 = arith.extui %708 : vector<16x128xi1> to vector<16x128xi32>
    %710 = arith.sitofp %709 : vector<16x128xi32> to vector<16x128xf32>
    %711 = arith.addf %702, %710 : vector<16x128xf32>
    %712 = vector.broadcast %706 : vector<1x128xf32> to vector<16x128xf32>
    %713 = arith.mulf %710, %712 : vector<16x128xf32>
    %714 = arith.addf %705, %713 : vector<16x128xf32>
    %715 = vector.extract_strided_slice %649 {offsets = [7, 0], sizes = [1, 128], strides = [1, 1]} : vector<16x128xf32> to vector<1x128xf32>
    %716 = vector.broadcast %715 : vector<1x128xf32> to vector<16x128xf32>
    %717 = arith.cmpf oge, %716, %649 : vector<16x128xf32>
    %718 = arith.extui %717 : vector<16x128xi1> to vector<16x128xi32>
    %719 = arith.sitofp %718 : vector<16x128xi32> to vector<16x128xf32>
    %720 = arith.addf %711, %719 : vector<16x128xf32>
    %721 = vector.broadcast %715 : vector<1x128xf32> to vector<16x128xf32>
    %722 = arith.mulf %719, %721 : vector<16x128xf32>
    %723 = arith.addf %714, %722 : vector<16x128xf32>
    %724 = vector.extract_strided_slice %649 {offsets = [8, 0], sizes = [1, 128], strides = [1, 1]} : vector<16x128xf32> to vector<1x128xf32>
    %725 = vector.broadcast %724 : vector<1x128xf32> to vector<16x128xf32>
    %726 = arith.cmpf oge, %725, %649 : vector<16x128xf32>
    %727 = arith.extui %726 : vector<16x128xi1> to vector<16x128xi32>
    %728 = arith.sitofp %727 : vector<16x128xi32> to vector<16x128xf32>
    %729 = arith.addf %720, %728 : vector<16x128xf32>
    %730 = vector.broadcast %724 : vector<1x128xf32> to vector<16x128xf32>
    %731 = arith.mulf %728, %730 : vector<16x128xf32>
    %732 = arith.addf %723, %731 : vector<16x128xf32>
    %733 = vector.extract_strided_slice %649 {offsets = [9, 0], sizes = [1, 128], strides = [1, 1]} : vector<16x128xf32> to vector<1x128xf32>
    %734 = vector.broadcast %733 : vector<1x128xf32> to vector<16x128xf32>
    %735 = arith.cmpf oge, %734, %649 : vector<16x128xf32>
    %736 = arith.extui %735 : vector<16x128xi1> to vector<16x128xi32>
    %737 = arith.sitofp %736 : vector<16x128xi32> to vector<16x128xf32>
    %738 = arith.addf %729, %737 : vector<16x128xf32>
    %739 = vector.broadcast %733 : vector<1x128xf32> to vector<16x128xf32>
    %740 = arith.mulf %737, %739 : vector<16x128xf32>
    %741 = arith.addf %732, %740 : vector<16x128xf32>
    %742 = vector.extract_strided_slice %649 {offsets = [10, 0], sizes = [1, 128], strides = [1, 1]} : vector<16x128xf32> to vector<1x128xf32>
    %743 = vector.broadcast %742 : vector<1x128xf32> to vector<16x128xf32>
    %744 = arith.cmpf oge, %743, %649 : vector<16x128xf32>
    %745 = arith.extui %744 : vector<16x128xi1> to vector<16x128xi32>
    %746 = arith.sitofp %745 : vector<16x128xi32> to vector<16x128xf32>
    %747 = arith.addf %738, %746 : vector<16x128xf32>
    %748 = vector.broadcast %742 : vector<1x128xf32> to vector<16x128xf32>
    %749 = arith.mulf %746, %748 : vector<16x128xf32>
    %750 = arith.addf %741, %749 : vector<16x128xf32>
    %751 = vector.extract_strided_slice %649 {offsets = [11, 0], sizes = [1, 128], strides = [1, 1]} : vector<16x128xf32> to vector<1x128xf32>
    %752 = vector.broadcast %751 : vector<1x128xf32> to vector<16x128xf32>
    %753 = arith.cmpf oge, %752, %649 : vector<16x128xf32>
    %754 = arith.extui %753 : vector<16x128xi1> to vector<16x128xi32>
    %755 = arith.sitofp %754 : vector<16x128xi32> to vector<16x128xf32>
    %756 = arith.addf %747, %755 : vector<16x128xf32>
    %757 = vector.broadcast %751 : vector<1x128xf32> to vector<16x128xf32>
    %758 = arith.mulf %755, %757 : vector<16x128xf32>
    %759 = arith.addf %750, %758 : vector<16x128xf32>
    %760 = vector.extract_strided_slice %649 {offsets = [12, 0], sizes = [1, 128], strides = [1, 1]} : vector<16x128xf32> to vector<1x128xf32>
    %761 = vector.broadcast %760 : vector<1x128xf32> to vector<16x128xf32>
    %762 = arith.cmpf oge, %761, %649 : vector<16x128xf32>
    %763 = arith.extui %762 : vector<16x128xi1> to vector<16x128xi32>
    %764 = arith.sitofp %763 : vector<16x128xi32> to vector<16x128xf32>
    %765 = arith.addf %756, %764 : vector<16x128xf32>
    %766 = vector.broadcast %760 : vector<1x128xf32> to vector<16x128xf32>
    %767 = arith.mulf %764, %766 : vector<16x128xf32>
    %768 = arith.addf %759, %767 : vector<16x128xf32>
    %769 = vector.extract_strided_slice %649 {offsets = [13, 0], sizes = [1, 128], strides = [1, 1]} : vector<16x128xf32> to vector<1x128xf32>
    %770 = vector.broadcast %769 : vector<1x128xf32> to vector<16x128xf32>
    %771 = arith.cmpf oge, %770, %649 : vector<16x128xf32>
    %772 = arith.extui %771 : vector<16x128xi1> to vector<16x128xi32>
    %773 = arith.sitofp %772 : vector<16x128xi32> to vector<16x128xf32>
    %774 = arith.addf %765, %773 : vector<16x128xf32>
    %775 = vector.broadcast %769 : vector<1x128xf32> to vector<16x128xf32>
    %776 = arith.mulf %773, %775 : vector<16x128xf32>
    %777 = arith.addf %768, %776 : vector<16x128xf32>
    %778 = vector.extract_strided_slice %649 {offsets = [14, 0], sizes = [1, 128], strides = [1, 1]} : vector<16x128xf32> to vector<1x128xf32>
    %779 = vector.broadcast %778 : vector<1x128xf32> to vector<16x128xf32>
    %780 = arith.cmpf oge, %779, %649 : vector<16x128xf32>
    %781 = arith.extui %780 : vector<16x128xi1> to vector<16x128xi32>
    %782 = arith.sitofp %781 : vector<16x128xi32> to vector<16x128xf32>
    %783 = arith.addf %774, %782 : vector<16x128xf32>
    %784 = vector.broadcast %778 : vector<1x128xf32> to vector<16x128xf32>
    %785 = arith.mulf %782, %784 : vector<16x128xf32>
    %786 = arith.addf %777, %785 : vector<16x128xf32>
    %787 = vector.extract_strided_slice %649 {offsets = [15, 0], sizes = [1, 128], strides = [1, 1]} : vector<16x128xf32> to vector<1x128xf32>
    %788 = vector.broadcast %787 : vector<1x128xf32> to vector<16x128xf32>
    %789 = arith.cmpf oge, %788, %649 : vector<16x128xf32>
    %790 = arith.extui %789 : vector<16x128xi1> to vector<16x128xi32>
    %791 = arith.sitofp %790 : vector<16x128xi32> to vector<16x128xf32>
    %792 = arith.addf %783, %791 : vector<16x128xf32>
    %793 = vector.broadcast %787 : vector<1x128xf32> to vector<16x128xf32>
    %794 = arith.mulf %791, %793 : vector<16x128xf32>
    %795 = arith.addf %786, %794 : vector<16x128xf32>
    %796 = arith.mulf %792, %649 : vector<16x128xf32>
    %cst_176 = arith.constant 1.000000e+00 : f32
    %797 = vector.broadcast %cst_176 : f32 to vector<16x128xf32>
    %798 = arith.addf %797, %796 : vector<16x128xf32>
    %799 = arith.cmpf ogt, %798, %795 : vector<16x128xf32>
    %800 = arith.extui %799 : vector<16x128xi1> to vector<16x128xi32>
    %801 = arith.sitofp %800 : vector<16x128xi32> to vector<16x128xf32>
    %cst_177 = arith.constant dense<0.000000e+00> : vector<128xf32>
    %802 = vector.multi_reduction <add>, %801, %cst_177 [0] : vector<16x128xf32> to vector<128xf32>
    %803 = vector.shape_cast %802 : vector<128xf32> to vector<1x128xf32>
    %804 = arith.mulf %649, %801 : vector<16x128xf32>
    %cst_178 = arith.constant dense<0.000000e+00> : vector<128xf32>
    %805 = vector.multi_reduction <add>, %804, %cst_178 [0] : vector<16x128xf32> to vector<128xf32>
    %806 = vector.shape_cast %805 : vector<128xf32> to vector<1x128xf32>
    %cst_179 = arith.constant 1.000000e+00 : f32
    %807 = vector.broadcast %cst_179 : f32 to vector<1x128xf32>
    %808 = arith.subf %806, %807 : vector<1x128xf32>
    %809 = arith.divf %808, %803 : vector<1x128xf32>
    %810 = vector.broadcast %809 : vector<1x128xf32> to vector<16x128xf32>
    %811 = arith.subf %649, %810 : vector<16x128xf32>
    %cst_180 = arith.constant 0.000000e+00 : f32
    %812 = vector.broadcast %cst_180 : f32 to vector<16x128xf32>
    %813 = arith.maximumf %811, %812 : vector<16x128xf32>
    %cst_181 = arith.constant 1.000000e-15 : f32
    %814 = vector.broadcast %cst_181 : f32 to vector<16x128xf32>
    %815 = arith.addf %813, %814 : vector<16x128xf32>
    %816 = math.log %815 : vector<16x128xf32>
    %817 = arith.mulf %813, %816 : vector<16x128xf32>
    %cst_182 = arith.constant dense<0.000000e+00> : vector<128xf32>
    %818 = vector.multi_reduction <add>, %817, %cst_182 [0] : vector<16x128xf32> to vector<128xf32>
    %819 = vector.shape_cast %818 : vector<128xf32> to vector<1x128xf32>
    %820 = arith.addf %547, %819 : vector<1x128xf32>
    %821 = arith.mulf %813, %6 : vector<16x128xf32>
    %c0_183 = arith.constant 0 : index
    %c0_184 = arith.constant 0 : index
    %822 = vector.load %arg4[%c0_183, %c0_184] : memref<32x16xf32, #tpu.memory_space<vmem>>, vector<32x16xf32>
    %cst_185 = arith.constant dense<0.000000e+00> : vector<32x128xf32>
    %823 = tpu.matmul %822, %821, %cst_185 {dimension_numbers = #tpu.dot_dimension_numbers<[1], [0], [0], [1], [0, 0, 1, 1], [], []>} : vector<32x16xf32>, vector<16x128xf32>, vector<32x128xf32> -> vector<32x128xf32>
    %c0_186 = arith.constant 0 : index
    %c12 = arith.constant 12 : index
    %824 = vector.load %arg7[%c0_186, %c12] : memref<32x16xf32, #tpu.memory_space<vmem>>, vector<32x1xf32>
    %825 = vector.broadcast %824 : vector<32x1xf32> to vector<32x128xf32>
    %826 = arith.mulf %823, %825 : vector<32x128xf32>
    %c0_187 = arith.constant 0 : index
    %c12_188 = arith.constant 12 : index
    %827 = vector.load %arg8[%c0_187, %c12_188] : memref<32x16xf32, #tpu.memory_space<vmem>>, vector<32x1xf32>
    %828 = vector.broadcast %827 : vector<32x1xf32> to vector<32x128xf32>
    %829 = arith.addf %826, %828 : vector<32x128xf32>
    %830 = vector.extract_strided_slice %829 {offsets = [0, 0], sizes = [16, 128], strides = [1, 1]} : vector<32x128xf32> to vector<16x128xf32>
    %831 = vector.extract_strided_slice %829 {offsets = [16, 0], sizes = [16, 128], strides = [1, 1]} : vector<32x128xf32> to vector<16x128xf32>
    %cst_189 = arith.constant 0.000000e+00 : f32
    %832 = vector.broadcast %cst_189 : f32 to vector<16x128xf32>
    %833 = arith.subf %832, %831 : vector<16x128xf32>
    %834 = math.exp %833 : vector<16x128xf32>
    %cst_190 = arith.constant 1.000000e+00 : f32
    %835 = vector.broadcast %cst_190 : f32 to vector<16x128xf32>
    %836 = arith.addf %835, %834 : vector<16x128xf32>
    %837 = tpu.reciprocal %836 {approx = true} : vector<16x128xf32> -> vector<16x128xf32>
    %838 = arith.mulf %830, %837 : vector<16x128xf32>
    %c0_191 = arith.constant 0 : index
    %c0_192 = arith.constant 0 : index
    %839 = vector.load %arg5[%c0_191, %c0_192] : memref<32x16xf32, #tpu.memory_space<vmem>>, vector<32x16xf32>
    %cst_193 = arith.constant dense<0.000000e+00> : vector<32x128xf32>
    %840 = tpu.matmul %839, %838, %cst_193 {dimension_numbers = #tpu.dot_dimension_numbers<[1], [0], [0], [1], [0, 0, 1, 1], [], []>} : vector<32x16xf32>, vector<16x128xf32>, vector<32x128xf32> -> vector<32x128xf32>
    %c0_194 = arith.constant 0 : index
    %c13 = arith.constant 13 : index
    %841 = vector.load %arg7[%c0_194, %c13] : memref<32x16xf32, #tpu.memory_space<vmem>>, vector<32x1xf32>
    %842 = vector.broadcast %841 : vector<32x1xf32> to vector<32x128xf32>
    %843 = arith.mulf %840, %842 : vector<32x128xf32>
    %c0_195 = arith.constant 0 : index
    %c13_196 = arith.constant 13 : index
    %844 = vector.load %arg8[%c0_195, %c13_196] : memref<32x16xf32, #tpu.memory_space<vmem>>, vector<32x1xf32>
    %845 = vector.broadcast %844 : vector<32x1xf32> to vector<32x128xf32>
    %846 = arith.addf %843, %845 : vector<32x128xf32>
    %847 = vector.extract_strided_slice %846 {offsets = [0, 0], sizes = [16, 128], strides = [1, 1]} : vector<32x128xf32> to vector<16x128xf32>
    %848 = vector.extract_strided_slice %846 {offsets = [16, 0], sizes = [16, 128], strides = [1, 1]} : vector<32x128xf32> to vector<16x128xf32>
    %cst_197 = arith.constant 0.000000e+00 : f32
    %849 = vector.broadcast %cst_197 : f32 to vector<16x128xf32>
    %850 = arith.subf %849, %848 : vector<16x128xf32>
    %851 = math.exp %850 : vector<16x128xf32>
    %cst_198 = arith.constant 1.000000e+00 : f32
    %852 = vector.broadcast %cst_198 : f32 to vector<16x128xf32>
    %853 = arith.addf %852, %851 : vector<16x128xf32>
    %854 = tpu.reciprocal %853 {approx = true} : vector<16x128xf32> -> vector<16x128xf32>
    %855 = arith.mulf %847, %854 : vector<16x128xf32>
    %856 = arith.addf %838, %855 : vector<16x128xf32>
    %cst_199 = arith.constant 0.707106769 : f32
    %857 = vector.broadcast %cst_199 : f32 to vector<16x128xf32>
    %858 = arith.mulf %856, %857 : vector<16x128xf32>
    %c3_200 = arith.constant 3 : index
    %c0_201 = arith.constant 0 : index
    %c0_202 = arith.constant 0 : index
    %c0_203 = arith.constant 0 : index
    %859 = vector.load %arg6[%c3_200, %c0_201, %c0_202, %c0_203] : memref<4x2x32x16xf32, #tpu.memory_space<vmem>>, vector<1x1x32x16xf32>
    %860 = vector.shape_cast %859 : vector<1x1x32x16xf32> to vector<32x16xf32>
    %cst_204 = arith.constant dense<0.000000e+00> : vector<32x128xf32>
    %861 = tpu.matmul %860, %858, %cst_204 {dimension_numbers = #tpu.dot_dimension_numbers<[1], [0], [0], [1], [0, 0, 1, 1], [], []>} : vector<32x16xf32>, vector<16x128xf32>, vector<32x128xf32> -> vector<32x128xf32>
    %c0_205 = arith.constant 0 : index
    %c14 = arith.constant 14 : index
    %862 = vector.load %arg7[%c0_205, %c14] : memref<32x16xf32, #tpu.memory_space<vmem>>, vector<32x1xf32>
    %863 = vector.broadcast %862 : vector<32x1xf32> to vector<32x128xf32>
    %864 = arith.mulf %861, %863 : vector<32x128xf32>
    %c0_206 = arith.constant 0 : index
    %c14_207 = arith.constant 14 : index
    %865 = vector.load %arg8[%c0_206, %c14_207] : memref<32x16xf32, #tpu.memory_space<vmem>>, vector<32x1xf32>
    %866 = vector.broadcast %865 : vector<32x1xf32> to vector<32x128xf32>
    %867 = arith.addf %864, %866 : vector<32x128xf32>
    %868 = vector.extract_strided_slice %867 {offsets = [0, 0], sizes = [16, 128], strides = [1, 1]} : vector<32x128xf32> to vector<16x128xf32>
    %869 = vector.extract_strided_slice %867 {offsets = [16, 0], sizes = [16, 128], strides = [1, 1]} : vector<32x128xf32> to vector<16x128xf32>
    %cst_208 = arith.constant 0.000000e+00 : f32
    %870 = vector.broadcast %cst_208 : f32 to vector<16x128xf32>
    %871 = arith.subf %870, %869 : vector<16x128xf32>
    %872 = math.exp %871 : vector<16x128xf32>
    %cst_209 = arith.constant 1.000000e+00 : f32
    %873 = vector.broadcast %cst_209 : f32 to vector<16x128xf32>
    %874 = arith.addf %873, %872 : vector<16x128xf32>
    %875 = tpu.reciprocal %874 {approx = true} : vector<16x128xf32> -> vector<16x128xf32>
    %876 = arith.mulf %868, %875 : vector<16x128xf32>
    %877 = arith.addf %858, %876 : vector<16x128xf32>
    %cst_210 = arith.constant 0.707106769 : f32
    %878 = vector.broadcast %cst_210 : f32 to vector<16x128xf32>
    %879 = arith.mulf %877, %878 : vector<16x128xf32>
    %c3_211 = arith.constant 3 : index
    %c1_212 = arith.constant 1 : index
    %c0_213 = arith.constant 0 : index
    %c0_214 = arith.constant 0 : index
    %880 = vector.load %arg6[%c3_211, %c1_212, %c0_213, %c0_214] : memref<4x2x32x16xf32, #tpu.memory_space<vmem>>, vector<1x1x32x16xf32>
    %881 = vector.shape_cast %880 : vector<1x1x32x16xf32> to vector<32x16xf32>
    %cst_215 = arith.constant dense<0.000000e+00> : vector<32x128xf32>
    %882 = tpu.matmul %881, %879, %cst_215 {dimension_numbers = #tpu.dot_dimension_numbers<[1], [0], [0], [1], [0, 0, 1, 1], [], []>} : vector<32x16xf32>, vector<16x128xf32>, vector<32x128xf32> -> vector<32x128xf32>
    %c0_216 = arith.constant 0 : index
    %c15 = arith.constant 15 : index
    %883 = vector.load %arg7[%c0_216, %c15] : memref<32x16xf32, #tpu.memory_space<vmem>>, vector<32x1xf32>
    %884 = vector.broadcast %883 : vector<32x1xf32> to vector<32x128xf32>
    %885 = arith.mulf %882, %884 : vector<32x128xf32>
    %c0_217 = arith.constant 0 : index
    %c15_218 = arith.constant 15 : index
    %886 = vector.load %arg8[%c0_217, %c15_218] : memref<32x16xf32, #tpu.memory_space<vmem>>, vector<32x1xf32>
    %887 = vector.broadcast %886 : vector<32x1xf32> to vector<32x128xf32>
    %888 = arith.addf %885, %887 : vector<32x128xf32>
    %889 = vector.extract_strided_slice %888 {offsets = [0, 0], sizes = [16, 128], strides = [1, 1]} : vector<32x128xf32> to vector<16x128xf32>
    %890 = vector.extract_strided_slice %888 {offsets = [16, 0], sizes = [16, 128], strides = [1, 1]} : vector<32x128xf32> to vector<16x128xf32>
    %cst_219 = arith.constant 0.000000e+00 : f32
    %891 = vector.broadcast %cst_219 : f32 to vector<16x128xf32>
    %892 = arith.subf %891, %890 : vector<16x128xf32>
    %893 = math.exp %892 : vector<16x128xf32>
    %cst_220 = arith.constant 1.000000e+00 : f32
    %894 = vector.broadcast %cst_220 : f32 to vector<16x128xf32>
    %895 = arith.addf %894, %893 : vector<16x128xf32>
    %896 = tpu.reciprocal %895 {approx = true} : vector<16x128xf32> -> vector<16x128xf32>
    %897 = arith.mulf %889, %896 : vector<16x128xf32>
    %898 = arith.addf %879, %897 : vector<16x128xf32>
    %cst_221 = arith.constant 0.707106769 : f32
    %899 = vector.broadcast %cst_221 : f32 to vector<16x128xf32>
    %900 = arith.mulf %898, %899 : vector<16x128xf32>
    %901 = vector.extract_strided_slice %900 {offsets = [0, 0], sizes = [8, 128], strides = [1, 1]} : vector<16x128xf32> to vector<8x128xf32>
    %cst_222 = arith.constant 0.000000e+00 : f32
    %902 = vector.broadcast %cst_222 : f32 to vector<8x128xf32>
    %903 = arith.maximumf %901, %902 : vector<8x128xf32>
    %904 = arith.addf %634, %903 : vector<8x128xf32>
    %c0_223 = arith.constant 0 : index
    %c0_224 = arith.constant 0 : index
    %905 = vector.load %arg12[%c0_223, %c0_224] : memref<32x8xf32, #tpu.memory_space<vmem>>, vector<32x8xf32>
    %cst_225 = arith.constant dense<0.000000e+00> : vector<32x128xf32>
    %906 = tpu.matmul %905, %904, %cst_225 {dimension_numbers = #tpu.dot_dimension_numbers<[1], [0], [0], [1], [0, 0, 1, 1], [], []>} : vector<32x8xf32>, vector<8x128xf32>, vector<32x128xf32> -> vector<32x128xf32>
    %c0_226 = arith.constant 0 : index
    %c0_227 = arith.constant 0 : index
    %907 = vector.load %arg13[%c0_226, %c0_227] : memref<31x32xf32, #tpu.memory_space<vmem>>, vector<31x32xf32>
    %cst_228 = arith.constant dense<0.000000e+00> : vector<31x128xf32>
    %908 = tpu.matmul %907, %906, %cst_228 {dimension_numbers = #tpu.dot_dimension_numbers<[1], [0], [0], [1], [0, 0, 1, 1], [], []>} : vector<31x32xf32>, vector<32x128xf32>, vector<31x128xf32> -> vector<31x128xf32>
    %c0_229 = arith.constant 0 : index
    %c0_230 = arith.constant 0 : index
    %909 = vector.load %arg14[%c0_229, %c0_230] : memref<31x1xf32, #tpu.memory_space<vmem>>, vector<31x1xf32>
    %910 = vector.broadcast %909 : vector<31x1xf32> to vector<31x128xf32>
    %911 = arith.addf %908, %910 : vector<31x128xf32>
    %cst_231 = arith.constant 0.000000e+00 : f32
    %912 = vector.broadcast %cst_231 : f32 to vector<31x128xf32>
    %913 = arith.maximumf %911, %912 : vector<31x128xf32>
    %914 = vector.extract_strided_slice %913 {offsets = [0, 0], sizes = [16, 128], strides = [1, 1]} : vector<31x128xf32> to vector<16x128xf32>
    %915 = vector.extract_strided_slice %913 {offsets = [16, 0], sizes = [15, 128], strides = [1, 1]} : vector<31x128xf32> to vector<15x128xf32>
    %c0_232 = arith.constant 0 : index
    %c0_233 = arith.constant 0 : index
    %916 = vector.load %arg15[%c0_232, %c0_233] : memref<10x16xf32, #tpu.memory_space<vmem>>, vector<10x16xf32>
    %cst_234 = arith.constant dense<0.000000e+00> : vector<10x128xf32>
    %917 = tpu.matmul %916, %914, %cst_234 {dimension_numbers = #tpu.dot_dimension_numbers<[1], [0], [0], [1], [0, 0, 1, 1], [], []>} : vector<10x16xf32>, vector<16x128xf32>, vector<10x128xf32> -> vector<10x128xf32>
    %c0_235 = arith.constant 0 : index
    %c0_236 = arith.constant 0 : index
    %918 = vector.load %arg16[%c0_235, %c0_236] : memref<10x1xf32, #tpu.memory_space<vmem>>, vector<10x1xf32>
    %919 = vector.broadcast %918 : vector<10x1xf32> to vector<10x128xf32>
    %920 = arith.addf %917, %919 : vector<10x128xf32>
    %cst_237 = arith.constant 0.000000e+00 : f32
    %921 = vector.broadcast %cst_237 : f32 to vector<10x128xf32>
    %922 = arith.maximumf %920, %921 : vector<10x128xf32>
    %c0_238 = arith.constant 0 : index
    %c0_239 = arith.constant 0 : index
    %923 = vector.load %arg17[%c0_238, %c0_239] : memref<5x10xf32, #tpu.memory_space<vmem>>, vector<5x10xf32>
    %cst_240 = arith.constant dense<0.000000e+00> : vector<5x128xf32>
    %924 = tpu.matmul %923, %922, %cst_240 {dimension_numbers = #tpu.dot_dimension_numbers<[1], [0], [0], [1], [0, 0, 1, 1], [], []>} : vector<5x10xf32>, vector<10x128xf32>, vector<5x128xf32> -> vector<5x128xf32>
    %c0_241 = arith.constant 0 : index
    %c0_242 = arith.constant 0 : index
    %925 = vector.load %arg18[%c0_241, %c0_242] : memref<5x1xf32, #tpu.memory_space<vmem>>, vector<5x1xf32>
    %926 = vector.broadcast %925 : vector<5x1xf32> to vector<5x128xf32>
    %927 = arith.addf %924, %926 : vector<5x128xf32>
    %c0_243 = arith.constant 0 : index
    %c0_244 = arith.constant 0 : index
    %928 = vector.load %arg21[%c0_243, %c0_244] : memref<5x128xf32, #tpu.memory_space<vmem>>, vector<5x128xf32>
    tpu.vector_store %arg21[%c0_243, %c0_244], %927 {strides = array<i32>} : memref<5x128xf32, #tpu.memory_space<vmem>>, vector<5x128xf32>,
    %c0_245 = arith.constant 0 : index
    %c0_246 = arith.constant 0 : index
    %929 = vector.load %arg19[%c0_245, %c0_246] : memref<2x15xf32, #tpu.memory_space<vmem>>, vector<2x15xf32>
    %cst_247 = arith.constant dense<0.000000e+00> : vector<2x128xf32>
    %930 = tpu.matmul %929, %915, %cst_247 {dimension_numbers = #tpu.dot_dimension_numbers<[1], [0], [0], [1], [0, 0, 1, 1], [], []>} : vector<2x15xf32>, vector<15x128xf32>, vector<2x128xf32> -> vector<2x128xf32>
    %c0_248 = arith.constant 0 : index
    %c0_249 = arith.constant 0 : index
    %931 = vector.load %arg20[%c0_248, %c0_249] : memref<2x1xf32, #tpu.memory_space<vmem>>, vector<2x1xf32>
    %932 = vector.broadcast %931 : vector<2x1xf32> to vector<2x128xf32>
    %933 = arith.addf %930, %932 : vector<2x128xf32>
    %c0_250 = arith.constant 0 : index
    %c0_251 = arith.constant 0 : index
    %934 = vector.load %arg22[%c0_250, %c0_251] : memref<2x128xf32, #tpu.memory_space<vmem>>, vector<2x128xf32>
    tpu.vector_store %arg22[%c0_250, %c0_251], %933 {strides = array<i32>} : memref<2x128xf32, #tpu.memory_space<vmem>>, vector<2x128xf32>,
    %c0_252 = arith.constant 0 : index
    %c0_253 = arith.constant 0 : index
    %935 = vector.load %arg23[%c0_252, %c0_253] : memref<1x128xf32, #tpu.memory_space<vmem>>, vector<1x128xf32>
    tpu.vector_store %arg23[%c0_252, %c0_253], %820 {strides = array<i32>} : memref<1x128xf32, #tpu.memory_space<vmem>>, vector<1x128xf32>,
    return
  }
  func.func @transform_0(%arg0: i32) -> (i32, i32) {
    %c0_i32 = arith.constant 0 : i32
    %c0_i32_0 = arith.constant 0 : i32
    return %c0_i32, %arg0 : i32, i32
  }
  func.func @transform_1(%arg0: i32) -> (i32, i32) {
    %c0_i32 = arith.constant 0 : i32
    %c0_i32_0 = arith.constant 0 : i32
    %c0_i32_1 = arith.constant 0 : i32
    return %c0_i32, %c0_i32_0 : i32, i32
  }
  func.func @transform_2(%arg0: i32) -> (i32, i32) {
    %c0_i32 = arith.constant 0 : i32
    %c0_i32_0 = arith.constant 0 : i32
    %c0_i32_1 = arith.constant 0 : i32
    return %c0_i32, %c0_i32_0 : i32, i32
  }
  func.func @transform_3(%arg0: i32) -> (i32, i32) {
    %c0_i32 = arith.constant 0 : i32
    %c0_i32_0 = arith.constant 0 : i32
    %c0_i32_1 = arith.constant 0 : i32
    return %c0_i32, %c0_i32_0 : i32, i32
  }
  func.func @transform_4(%arg0: i32) -> (i32, i32) {
    %c0_i32 = arith.constant 0 : i32
    %c0_i32_0 = arith.constant 0 : i32
    %c0_i32_1 = arith.constant 0 : i32
    return %c0_i32, %c0_i32_0 : i32, i32
  }
  func.func @transform_5(%arg0: i32) -> (i32, i32, i32, i32) {
    %c0_i32 = arith.constant 0 : i32
    %c0_i32_0 = arith.constant 0 : i32
    %c0_i32_1 = arith.constant 0 : i32
    %c0_i32_2 = arith.constant 0 : i32
    %c0_i32_3 = arith.constant 0 : i32
    return %c0_i32, %c0_i32_0, %c0_i32_1, %c0_i32_2 : i32, i32, i32, i32
  }
  func.func @transform_6(%arg0: i32) -> (i32, i32) {
    %c0_i32 = arith.constant 0 : i32
    %c0_i32_0 = arith.constant 0 : i32
    %c0_i32_1 = arith.constant 0 : i32
    return %c0_i32, %c0_i32_0 : i32, i32
  }
  func.func @transform_7(%arg0: i32) -> (i32, i32) {
    %c0_i32 = arith.constant 0 : i32
    %c0_i32_0 = arith.constant 0 : i32
    %c0_i32_1 = arith.constant 0 : i32
    return %c0_i32, %c0_i32_0 : i32, i32
  }
  func.func @transform_8(%arg0: i32) -> (i32, i32, i32) {
    %c0_i32 = arith.constant 0 : i32
    %c0_i32_0 = arith.constant 0 : i32
    %c0_i32_1 = arith.constant 0 : i32
    %c0_i32_2 = arith.constant 0 : i32
    return %c0_i32, %c0_i32_0, %c0_i32_1 : i32, i32, i32
  }
  func.func @transform_9(%arg0: i32) -> (i32, i32) {
    %c0_i32 = arith.constant 0 : i32
    %c0_i32_0 = arith.constant 0 : i32
    %c0_i32_1 = arith.constant 0 : i32
    return %c0_i32, %c0_i32_0 : i32, i32
  }
  func.func @transform_10(%arg0: i32) -> (i32, i32) {
    %c0_i32 = arith.constant 0 : i32
    %c0_i32_0 = arith.constant 0 : i32
    %c0_i32_1 = arith.constant 0 : i32
    return %c0_i32, %c0_i32_0 : i32, i32
  }
  func.func @transform_11(%arg0: i32) -> (i32, i32) {
    %c0_i32 = arith.constant 0 : i32
    %c0_i32_0 = arith.constant 0 : i32
    %c0_i32_1 = arith.constant 0 : i32
    return %c0_i32, %c0_i32_0 : i32, i32
  }
  func.func @transform_12(%arg0: i32) -> (i32, i32) {
    %c0_i32 = arith.constant 0 : i32
    %c0_i32_0 = arith.constant 0 : i32
    %c0_i32_1 = arith.constant 0 : i32
    return %c0_i32, %c0_i32_0 : i32, i32
  }
  func.func @transform_13(%arg0: i32) -> (i32, i32) {
    %c0_i32 = arith.constant 0 : i32
    %c0_i32_0 = arith.constant 0 : i32
    %c0_i32_1 = arith.constant 0 : i32
    return %c0_i32, %c0_i32_0 : i32, i32
  }
  func.func @transform_14(%arg0: i32) -> (i32, i32) {
    %c0_i32 = arith.constant 0 : i32
    %c0_i32_0 = arith.constant 0 : i32
    %c0_i32_1 = arith.constant 0 : i32
    return %c0_i32, %c0_i32_0 : i32, i32
  }
  func.func @transform_15(%arg0: i32) -> (i32, i32) {
    %c0_i32 = arith.constant 0 : i32
    %c0_i32_0 = arith.constant 0 : i32
    %c0_i32_1 = arith.constant 0 : i32
    return %c0_i32, %c0_i32_0 : i32, i32
  }
  func.func @transform_16(%arg0: i32) -> (i32, i32) {
    %c0_i32 = arith.constant 0 : i32
    %c0_i32_0 = arith.constant 0 : i32
    %c0_i32_1 = arith.constant 0 : i32
    return %c0_i32, %c0_i32_0 : i32, i32
  }
  func.func @transform_17(%arg0: i32) -> (i32, i32) {
    %c0_i32 = arith.constant 0 : i32
    %c0_i32_0 = arith.constant 0 : i32
    %c0_i32_1 = arith.constant 0 : i32
    return %c0_i32, %c0_i32_0 : i32, i32
  }
  func.func @transform_18(%arg0: i32) -> (i32, i32) {
    %c0_i32 = arith.constant 0 : i32
    %c0_i32_0 = arith.constant 0 : i32
    %c0_i32_1 = arith.constant 0 : i32
    return %c0_i32, %c0_i32_0 : i32, i32
  }
  func.func @transform_19(%arg0: i32) -> (i32, i32) {
    %c0_i32 = arith.constant 0 : i32
    %c0_i32_0 = arith.constant 0 : i32
    %c0_i32_1 = arith.constant 0 : i32
    return %c0_i32, %c0_i32_0 : i32, i32
  }
  func.func @transform_20(%arg0: i32) -> (i32, i32) {
    %c0_i32 = arith.constant 0 : i32
    %c0_i32_0 = arith.constant 0 : i32
    return %c0_i32, %arg0 : i32, i32
  }
  func.func @transform_21(%arg0: i32) -> (i32, i32) {
    %c0_i32 = arith.constant 0 : i32
    %c0_i32_0 = arith.constant 0 : i32
    return %c0_i32, %arg0 : i32, i32
  }
  func.func @transform_22(%arg0: i32) -> (i32, i32) {
    %c0_i32 = arith.constant 0 : i32
    %c0_i32_0 = arith.constant 0 : i32
    return %c0_i32, %arg0 : i32, i32
  }
}

</mosaic_0001>

<bundles_post_ra>
// kernel: tabnet_da_forward.1
= control target key start
LH: loop header
LB: loop body
LE: loop exit
PB: predicated region body
PF: predicated region fallthrough
CT: control target
= control target key end

     0   :  { %s5778_s0 = inlined_call_operand.vmem [shape: f32[16,256], index: 0, kind: input, shape index: {}]   ;;  %s5779_s1 = inlined_call_operand.vmem [shape: f32[16,1], index: 1, kind: input, shape index: {}]   ;;  %s5780_s2 = inlined_call_operand.vmem [shape: f32[16,1], index: 2, kind: input, shape index: {}]   ;;  %s5781_s3 = inlined_call_operand.vmem [shape: f32[32,16], index: 3, kind: input, shape index: {}]   ;;  %s5782_s4 = inlined_call_operand.vmem [shape: f32[32,16], index: 4, kind: input, shape index: {}]   ;;  %s5783_s5 = inlined_call_operand.vmem [shape: f32[4,2,32,16], index: 5, kind: input, shape index: {}]   ;;  %s5784_s6 = inlined_call_operand.vmem [shape: f32[32,16], index: 6, kind: input, shape index: {}]   ;;  %s5785_s7 = inlined_call_operand.vmem [shape: f32[32,16], index: 7, kind: input, shape index: {}]   ;;  %s5786_s8 = inlined_call_operand.vmem [shape: f32[3,16,8], index: 8, kind: input, shape index: {}]   ;;  %s5787_s9 = inlined_call_operand.vmem [shape: f32[16,3], index: 9, kind: input, shape index: {}]   ;;  %s5788_s10 = inlined_call_operand.vmem [shape: f32[16,3], index: 10, kind: input, shape index: {}]   ;;  %s5789_s11 = inlined_call_operand.vmem [shape: f32[32,8], index: 11, kind: input, shape index: {}]   ;;  %s5790_s12 = inlined_call_operand.vmem [shape: f32[31,32], index: 12, kind: input, shape index: {}]   ;;  %s5791_s13 = inlined_call_operand.vmem [shape: f32[31,1], index: 13, kind: input, shape index: {}]   ;;  %s5792_s14 = inlined_call_operand.vmem [shape: f32[10,16], index: 14, kind: input, shape index: {}]   ;;  %s5793_s15 = inlined_call_operand.vmem [shape: f32[10,1], index: 15, kind: input, shape index: {}]   ;;  %s5794_s16 = inlined_call_operand.vmem [shape: f32[5,10], index: 16, kind: input, shape index: {}]   ;;  %s5795_s17 = inlined_call_operand.vmem [shape: f32[5,1], index: 17, kind: input, shape index: {}]   ;;  %s5796_s18 = inlined_call_operand.vmem [shape: f32[2,15], index: 18, kind: input, shape index: {}]   ;;  %s5797_s19 = inlined_call_operand.vmem [shape: f32[2,1], index: 19, kind: input, shape index: {}]   ;;  %s5798_s20 = inlined_call_operand.hbm [shape: f32[5,256], index: 20, kind: output, shape index: {0}]   ;;  %s5799_s21 = inlined_call_operand.hbm [shape: f32[2,256], index: 21, kind: output, shape index: {1}]   ;;  %s5800_s22 = inlined_call_operand.vmem [shape: f32[1,256], index: 22, kind: output, shape index: {2}]  }
   0x1   :  { %5827 = sst [smem:[#allocation48_spill]] %s5778_s0 }
   0x2   :  { %5828 = sst [smem:[#allocation49_spill]] %s5779_s1 }
   0x3   :  { %5829 = sst [smem:[#allocation50_spill]] %s5780_s2 }
   0x4   :  { %5830 = sst [smem:[#allocation51_spill]] %s5781_s3 }
   0x5   :  { %5831 = sst [smem:[#allocation52_spill]] %s5782_s4 }
   0x6   :  { %5832 = sst [smem:[#allocation53_spill]] %s5783_s5 }
   0x7   :  { %5833 = sst [smem:[#allocation54_spill]] %s5784_s6 }
   0x8   :  { %5834 = sst [smem:[#allocation55_spill]] %s5785_s7 }
   0x9   :  { %5835 = sst [smem:[#allocation56_spill]] %s5786_s8 }
   0xa   :  { %5836 = sst [smem:[#allocation57_spill]] %s5787_s9 }
   0xb   :  { %5837 = sst [smem:[#allocation58_spill]] %s5788_s10 }
   0xc   :  { %5838 = sst [smem:[#allocation59_spill]] %s5789_s11 }
   0xd   :  { %28 = vsyncpa [#allocation4], 0 }
   0xe   :  { %30 = vsyncpa [#allocation4 + $0x1], 0 }
   0xf   :  { %31 = vsyncpa [#allocation6], 0 }
  0x10   :  { %33 = vsyncpa [#allocation6 + $0x1], 0  ;;  %s4406_s3 = smov 0   ;;  %s4408_s28 = smov 0  }
  0x11   :  { %s4410_s29 = smov 0   ;;  %s4412_s30 = smov 0  }
  0x12 LB: > { %5839 = sst [smem:[#allocation9_spill]] %s4260_s3  ;;  %s4427_s4 = sadd.s32 4294967295, %s4272_s30   ;;  %s4272_s30 = sphi %s4412_s30, %s5932_s30   ;;  %s4268_s29 = sphi %s4410_s29, %s5935_s29   ;;  %s4264_s28 = sphi %s4408_s28, %s5934_s28   ;;  %s4260_s3 = sphi %s4406_s3, %s5933_s3  }
  0x13   : > { %5840 = sst [smem:[#allocation10_spill]] %s4264_s28  ;;  %s3656_s0 = sadd.s32 4294967294, %s4272_s30  }
  0x14   : > { %5841 = sst [smem:[#allocation11_spill]] %s4268_s29  ;;  %s4431_s23 = sadd.s32 1, %s4272_s30  }
  0x15   : > { %5842 = sst [smem:[#allocation12_spill]] %s4272_s30  ;;  %s46_s1 = sadd.s32 1, %s4268_s29 }
  0x16   : > { %5843 = sst [smem:[#allocation13_spill]] %s4431_s23  ;;  %s43_s5 = ssub.s32 %s4272_s30, %s4431_s23 }
  0x17   : > { %p53_p0 = scmp.ne.s32.totalorder %s4268_s29, %s4264_s28  ;;  %p44_p1 = scmp.eq.s32.totalorder %s43_s5, 0 }
  0x18   : > { %p54_p2 = scmp.eq.s32.totalorder %s4272_s30, 0  ;;  %p482_p3 = scmp.eq.s32.totalorder %s4427_s4, 1 }
  0x19   : > { %p487_p4 = scmp.ne.s32.totalorder %s4264_s28, %s4260_s3  ;;  %p488_p7 = scmp.eq.s32.totalorder %s3656_s0, 1 }
  0x1a   : > { %s4443_s24 = scalar_select %p44_p1, %s4268_s29, %s46_s1  }
  0x1b   : > { %p55_p5 = por %p54_p2, %p53_p0  ;;  %p4445_p6 = por %p482_p3, %p53_p0 }
  0x1c   : > { %5844 = sst [smem:[#allocation14_spill]] %s4443_s24  ;;  %p4449_p8 = por %p488_p7, %p487_p4 }
  0x1d   : > { %p3658_p9 = scmp.ge.s32.totalorder %s4272_s30, 2 }
  0x1e   : > { %s5846_s25 = scalar_select %p4449_p8, 1, 0 }
  0x1f   : > { %613 = sbr.rel (%p3658_p9) target bundleno = 48 (0x30), region = 92 }
  0x20   : > { %5847 = sst [smem:[#allocation15_spill]] %s5846_s25 }
  0x24   : > { %616 = sbr.rel (!%p55_p5) target bundleno = 48 (0x30), region = 96  ;;  %s618_s26 = sand.u32 (%p55_p5), 1, %s4268_s29  }
  0x25   : > { %s3660_s2 = sshll.u32 (%p55_p5), %s4272_s30, 3  ;;  %s3659_s27 = sshll.u32 (%p55_p5), %s618_s26, 4 }
  0x26   : > { %s5848_s24 = sld [smem:[#allocation48_spill]] (%p55_p5)  ;;  %s620_s0 = scalar_lea.vmem (%p55_p5), [#allocation2], %s3659_s27 }
  0x2c   : > { %s622_s23 = scalar_lea.vmem %s5848_s24, %s3660_s2 }
  0x2d   : > { %v653_v0 = vld [vmem:[%s622_s23] sm:$0xff]  ;;  %v655_v1 = vld [vmem:[%s622_s23 + $0x10] sm:$0xff] }
  0x2e   : > { %654 = vst [vmem:[%s620_s0] sm:$0xff] %v653_v0 }
  0x2f   : > { %656 = vst [vmem:[%s620_s0 + $0x8] sm:$0xff] %v655_v1 }
  0x30 PF: > { %p3661_p10 = scmp.ge.s32.totalorder %s4272_s30, 1  ;;  %p661_p11 = scmp.lt.s32.totalorder %s4272_s30, 3 }
  0x32   : > { %p662_p12 = pnand %p3661_p10, %p661_p11 }
  0x34   : > { %665 = sbr.rel (%p662_p12) target bundleno = 4472 (0x1178), region = 134 }
  0x39   : > { %s5849_s26 = sld [smem:[#allocation50_spill]]  ;;  %v5816_v4 = vmov 0   ;;  %s4503_s3 = sand.u32 1, %s4264_s28   ;;  %vm774_vm0 = vcmask 130048   ;;  %v4275_v40 = vmov 1   ;;  %vm1160_vm1 = vcmask 64512  }
  0x3a   : > { %s5850_s24 = sld [smem:[#allocation49_spill]]  ;;  %3956 = vset.pattern.permute.xlu1 %v5816_v4  ;;  %3955 = vset.pattern.permute.xlu0 %v5816_v4  ;;  %s3662_s27 = sshll.u32 %s4503_s3, 4 }
  0x3b   : > { %3957 = vset.pattern.permute.xlu2 %v5816_v4  ;;  %s5851_s7 = sld [smem:[#allocation55_spill]]  ;;  %s670_s1 = scalar_lea.vmem [#allocation2], %s3662_s27 }
  0x3c   : > { %s5852_s25 = sld [smem:[#allocation54_spill]]  ;;  %v741_v12 = vld [vmem:[%s670_s1 + $0x8] sm:$0xff]  ;;  %v740_v18 = vld [vmem:[%s670_s1] sm:$0xff]  ;;  %p737_p13 = scmp.lt.s32.totalorder %s4427_s4, 1 }
  0x3d   : > { %s5853_s23 = sld [smem:[#allocation51_spill]]  ;;  %s3663_s1 = sshll.u32 %s4503_s3, 3 }
  0x3e   : > { %s5854_s5 = sld [smem:[#allocation52_spill]] }
  0x3f   : > { %v757_v2 = vld [vmem:[%s5849_s26 + $0x8] sm:$0xff]  ;;  %v756_v5 = vld [vmem:[%s5849_s26] sm:$0xff]  ;;  %s5855_s2 = sld [smem:[#allocation53_spill]] }
  0x40   : > { %v743_v3 = vld [vmem:[%s5850_s24 + $0x8] sm:$0xff]  ;;  %765 = vperm.xlu1 %3956, %v757_v2   ;;  %v742_v6 = vld [vmem:[%s5850_s24] sm:$0xff]  ;;  %s5856_s10 = sld [smem:[#allocation58_spill]] }
  0x41   : > { %751 = vperm.xlu0 %3955, %v743_v3   ;;  %v4481_v7 = vld [vmem:[%s5851_s7 + $0x10] sm:$0xff]  ;;  %v4486_v8 = vld [vmem:[%s5851_s7 + $0x18] sm:$0xff]  ;;  %v4493_v9 = vld [vmem:[%s5851_s7 + $0x8] sm:$0xff]  ;;  %s5857_s9 = sld [smem:[#allocation57_spill]] }
  0x42   : > { %v4498_v10 = vld [vmem:[%s5852_s25] sm:$0xff]  ;;  %v4509_v11 = vld [vmem:[%s5852_s25 + $0x18] sm:$0xff]  ;;  %v4515_v13 = vld [vmem:[%s5852_s25 + $0x10] sm:$0xff]  ;;  %s5858_s8 = sld [smem:[#allocation56_spill]] }
  0x43   : > { %837 = vperm.xlu2 %3957, %v4509_v11   ;;  %v4525_v19 = vld [vmem:[%s5852_s25 + $0x8] sm:$0xff]  ;;  %v4533_v24 = vld [vmem:[%s5853_s23] sm:$0xff]  ;;  %v4538_v25 = vld [vmem:[%s5853_s23 + $0x18] sm:$0xff]  ;;  %s738_s0 = scalar_select %p737_p13, %s4427_s4, 1 }
  0x44   : > { %v4549_v26 = vld [vmem:[%s5851_s7] sm:$0xff]  ;;  %v4555_v27 = vld [vmem:[%s5853_s23 + $0x8] sm:$0xff]  ;;  %v4562_v28 = vld [vmem:[%s5853_s23 + $0x10] sm:$0xff]  ;;  %s5928_s11 = sld [smem:[#allocation59_spill]] }
  0x45   : > { %v4583_v62 = vld [vmem:[%s5854_s5] sm:$0xff]  ;;  %v4590_v63 = vld [vmem:[%s5854_s5 + $0x8] sm:$0xff]  ;;  %v4597_v0 = vld [vmem:[%s5854_s5 + $0x10] sm:$0xff]  ;;  %s739_s27 = scalar_lea.vmem %s5800_s22, %s738_s0  ;;  %s3888_s0 = sshll.u32 %s4427_s4, 3 }
  0x46   : > { %v4604_v1 = vld [vmem:[%s5854_s5 + $0x18] sm:$0xff]  ;;  %s3517_s29 = scalar_lea.hbm %s5798_s20, %s3888_s0 }
  0x47   : > { %s3521_s30 = sshll.u32 %s3517_s29, 4  ;;  %s3522_s30 = int_to_ptr.hbm [resolvable:$true] %s3521_s30 }
  0x48   : > { %760 = vperm.xlu1 %3956, %v756_v5  }
  0x49   : > { %746 = vperm.xlu0 %3955, %v742_v6  }
  0x4b   : > { %832 = vperm.xlu2 %3957, %v4515_v13  }
  0x50   : > { %860 = vperm.xlu1 %3956, %v4481_v7  }
  0x51   : > { %865 = vperm.xlu0 %3955, %v4486_v8  }
  0x53   : > { %827 = vperm.xlu2 %3957, %v4525_v19  }
  0x58   : > { %855 = vperm.xlu1 %3956, %v4493_v9  }
  0x59   : > { %822 = vperm.xlu0 %3955, %v4498_v10  }
  0x5b   : > { %850 = vperm.xlu2 %3957, %v4549_v26  }
  0x60   : > { %3959 = vset.pattern.permute.xlu1 %v4275_v40 }
  0x61   : > { %3958 = vset.pattern.permute.xlu0 %v4275_v40  ;;  %938 = vperm.xlu1 %3959, %v4515_v13  }
  0x62   : > { %942 = vperm.xlu0 %3958, %v4509_v11  }
  0x63   : > { %3960 = vset.pattern.permute.xlu2 %v4275_v40 }
  0x64   : > { %962 = vperm.xlu2 %3960, %v4486_v8  }
  0x69   : > { %958 = vperm.xlu1 %3959, %v4481_v7  }
  0x6a   : > { %930 = vperm.xlu0 %3958, %v4498_v10  }
  0x6c   : > { %934 = vperm.xlu2 %3960, %v4525_v19  }
  0x71   : > { %954 = vperm.xlu1 %3959, %v4493_v9  }
  0x74   : > { %950 = vperm.xlu2 %3960, %v4549_v26  }
  0x9d   : > { %v838_v29 = vpop.permute.xlu2 %837 }
  0xa5   : > { %v833_v37 = vpop.permute.xlu2 %832 }
  0xad   : > { %v828_v45 = vpop.permute.xlu2 %827 }
  0xb2   : > { %v766_v14 = vpop.permute.xlu1 %765 }
  0xb3   : > { %v752_v15 = vpop.permute.xlu0 %751 }
  0xb4   : > { %v755_v16 = vmul.f32 %v752_v15, %v741_v12 }
  0xb5   : > { %v851_v58 = vpop.permute.xlu2 %850 }
  0xb6   : > { %v4518_v17 = vadd.f32 %v766_v14, %v755_v16 }
  0xb8   : > { %801 = vmatpush.msra.mxu0 %v4518_v17  ;;  %3892 = vmatpush.msra.mxu1 %v4518_v17 }
  0xba   : > { %v761_v22 = vpop.permute.xlu1 %760 }
  0xbb   : > { %v747_v20 = vpop.permute.xlu0 %746 }
  0xbc   : > { %v754_v21 = vmul.f32 %v747_v20, %v740_v18 }
  0xbe   : > { %v4528_v23 = vadd.f32 %v761_v22, %v754_v21  ;;  %v963_v18 = vpop.permute.xlu2 %962 }
  0xc0   : > { %802 = vmatpush.msra.mxu0 %v4528_v23  ;;  %3893 = vmatpush.msra.mxu1 %v4528_v23 }
  0xc1   : > { %3665 = vmatmul.msk.f32.vlgmr.msra.gmra.mxu0 %vm774_vm0, %v4533_v24  ;;  %3668 = vmatmul.msk.f32.vlgmr.msra.gmra.mxu1 %vm774_vm0, %v4538_v25 }
  0xc2   : > { %v861_v39 = vpop.permute.xlu1 %860 }
  0xc3   : > { %v866_v33 = vpop.permute.xlu0 %865 }
  0xc9   : > { %3666 = vmatmul.msk.f32.gmra.mxu0 %vm774_vm0, %v4555_v27 }
  0xca   : > { %v856_v49 = vpop.permute.xlu1 %855 }
  0xcb   : > { %v823_v56 = vpop.permute.xlu0 %822 }
  0xd1   : > { %3667 = vmatmul.msk.f32.gmra.mxu0 %vm774_vm0, %v4562_v28 }
  0xd3   : > { %v939_v3 = vpop.permute.xlu1 %938 }
  0xd4   : > { %v943_v21 = vpop.permute.xlu0 %942 }
  0xdb   : > { %v959_v14 = vpop.permute.xlu1 %958 }
 0x13e   : > { %v804_v30 = vpop.f32.mrf.mxu0  ;;  %v813_v31 = vpop.f32.mrf.mxu1 }
 0x13f   : > { %v843_v32 = vmul.f32 %v838_v29, %v813_v31  ;;  %v840_v57 = vmul.f32 %v823_v56, %v804_v30  ;;  %v4276_v31 = vmov 2   ;;  %v985_v56 = vld [vmem:[%s5855_s2] sm:$0xff] }
 0x140   : > { %3961 = vset.pattern.permute.xlu0 %v4276_v31  ;;  %3962 = vset.pattern.permute.xlu1 %v4276_v31 }
 0x141   : > { %v871_v34 = vadd.f32 %v866_v33, %v843_v32  ;;  %v868_v59 = vadd.f32 %v851_v58, %v840_v57  ;;  %1043 = vperm.xlu0 %3961, %v4509_v11   ;;  %1039 = vperm.xlu1 %3962, %v4515_v13   ;;  %v986_v57 = vld [vmem:[%s5855_s2 + $0x8] sm:$0xff]  ;;  %v988_v58 = vld [vmem:[%s5855_s2 + $0x18] sm:$0xff] }
 0x142   : > { %3963 = vset.pattern.permute.xlu2 %v4276_v31 }
 0x143   : > { %v873_v35 = vsub.f32 0.0, %v871_v34  ;;  %1063 = vperm.xlu2 %3963, %v4486_v8  }
 0x145   : > { %v876_v36 = vmul.f32 1.442695, %v873_v35  ;;  %v935_v35 = vpop.permute.xlu2 %934 }
 0x146   : > { %v807_v38 = vpop.f32.mrf.mxu0 }
 0x147   : > { %4020 = vpow2.f32 %v876_v36  ;;  %v841_v46 = vmul.f32 %v828_v45, %v807_v38  ;;  %v955_v45 = vpop.permute.xlu1 %954 }
 0x149   : > { %v869_v50 = vadd.f32 %v856_v49, %v841_v46  ;;  %1031 = vperm.xlu0 %3961, %v4498_v10   ;;  %1059 = vperm.xlu1 %3962, %v4481_v7  }
 0x14b   : > { %1035 = vperm.xlu2 %3963, %v4525_v19  }
 0x14d   : > { %v4021_v41 = vpop.eup %4020 }
 0x14e   : > { %v879_v42 = vadd.f32 1.0, %v4021_v41  ;;  %v810_v43 = vpop.f32.mrf.mxu0 }
 0x14f   : > { %v842_v44 = vmul.f32 %v833_v37, %v810_v43  ;;  %v931_v37 = vpop.permute.xlu0 %930 }
 0x150   : > { %4022 = vrcp.f32 %v879_v42  ;;  %v951_v42 = vpop.permute.xlu2 %950 }
 0x151   : > { %v870_v47 = vadd.f32 %v861_v39, %v842_v44  ;;  %1055 = vperm.xlu1 %3962, %v4493_v9  }
 0x153   : > { %v872_v48 = vsub.f32 0.0, %v870_v47  ;;  %1051 = vperm.xlu2 %3963, %v4549_v26  }
 0x155   : > { %v874_v51 = vmul.f32 1.442695, %v872_v48 }
 0x156   : > { %v4023_v52 = vpop.eup %4022 }
 0x157   : > { %4024 = vpow2.f32 %v874_v51  ;;  %v4575_v53 = vmul.f32 %v4023_v52, %v869_v50 }
 0x159   : > { %914 = vmatpush.msrb.mxu1 %v4575_v53 }
 0x15d   : > { %v4025_v54 = vpop.eup %4024 }
 0x15e   : > { %v878_v55 = vadd.f32 1.0, %v4025_v54 }
 0x160   : > { %4026 = vrcp.f32 %v878_v55 }
 0x166   : > { %v4027_v60 = vpop.eup %4026 }
 0x167   : > { %v882_v61 = vmul.f32 %v4027_v60, %v868_v59 }
 0x169   : > { %915 = vmatpush.msrb.mxu1 %v882_v61 }
 0x16a   : > { %3669 = vmatmul.msk.f32.vlgmr.msrb.gmra.mxu1 %vm774_vm0, %v4583_v62 }
 0x172   : > { %3670 = vmatmul.msk.f32.gmra.mxu1 %vm774_vm0, %v4590_v63 }
 0x17a   : > { %3671 = vmatmul.msk.f32.gmra.mxu1 %vm774_vm0, %v4597_v0 }
 0x182   : > { %3672 = vmatmul.msk.f32.gmra.mxu1 %vm774_vm0, %v4604_v1 }
 0x1b3   : > { %v1040_v60 = vpop.permute.xlu1 %1039 }
 0x1e7   : > { %v917_v2 = vpop.f32.mrf.mxu1 }
 0x1e8   : > { %v945_v41 = vmul.f32 %v931_v37, %v917_v2 }
 0x1ea   : > { %v965_v46 = vadd.f32 %v951_v42, %v945_v41  ;;  %v4277_v41 = vmov 3  }
 0x1eb   : > { %3965 = vset.pattern.permute.xlu1 %v4277_v41  ;;  %3964 = vset.pattern.permute.xlu0 %v4277_v41 }
 0x1ec   : > { %1145 = vperm.xlu1 %3965, %v4486_v8   ;;  %1135 = vperm.xlu0 %3964, %v4509_v11  }
 0x1ed   : > { %3966 = vset.pattern.permute.xlu2 %v4277_v41 }
 0x1ee   : > { %1131 = vperm.xlu2 %3966, %v4525_v19  }
 0x1ef   : > { %v920_v5 = vpop.f32.mrf.mxu1 }
 0x1f0   : > { %v946_v43 = vmul.f32 %v935_v35, %v920_v5  ;;  %v1060_v5 = vpop.permute.xlu1 %1059 }
 0x1f2   : > { %v966_v47 = vadd.f32 %v955_v45, %v946_v43 }
 0x1f4   : > { %1141 = vperm.xlu1 %3965, %v4493_v9   ;;  %3968 = vset.pattern.permute.xlu0 %v5816_v4 }
 0x1f6   : > { %3967 = vset.pattern.permute.xlu2 %v5816_v4 }
 0x1f7   : > { %v923_v6 = vpop.f32.mrf.mxu1 }
 0x1f8   : > { %v947_v12 = vmul.f32 %v939_v3, %v923_v6  ;;  %v1056_v43 = vpop.permute.xlu1 %1055 }
 0x1fa   : > { %v967_v15 = vadd.f32 %v959_v14, %v947_v12  ;;  %v1064_v14 = vpop.permute.xlu2 %1063 }
 0x1fc   : > { %v969_v16 = vsub.f32 0.0, %v967_v15  ;;  %3969 = vset.pattern.permute.xlu1 %v5816_v4 }
 0x1fe   : > { %v971_v20 = vmul.f32 1.442695, %v969_v16  ;;  %v1044_v16 = vpop.permute.xlu0 %1043 }
 0x1ff   : > { %v926_v22 = vpop.f32.mrf.mxu1 }
 0x200   : > { %4028 = vpow2.f32 %v971_v20  ;;  %v948_v29 = vmul.f32 %v943_v21, %v926_v22 }
 0x202   : > { %v968_v30 = vadd.f32 %v963_v18, %v948_v29 }
 0x204   : > { %v970_v32 = vsub.f32 0.0, %v968_v30 }
 0x206   : > { %v4029_v33 = vpop.eup %4028  ;;  %v973_v34 = vmul.f32 1.442695, %v970_v32  ;;  %v1036_v32 = vpop.permute.xlu2 %1035 }
 0x207   : > { %v975_v36 = vadd.f32 1.0, %v4029_v33 }
 0x208   : > { %4030 = vpow2.f32 %v973_v34  ;;  %v1032_v34 = vpop.permute.xlu0 %1031 }
 0x209   : > { %4032 = vrcp.f32 %v975_v36 }
 0x20e   : > { %v4031_v38 = vpop.eup %4030 }
 0x20f   : > { %v976_v39 = vadd.f32 1.0, %v4031_v38  ;;  %v4033_v44 = vpop.eup %4032  ;;  %v1052_v38 = vpop.permute.xlu2 %1051 }
 0x210   : > { %v979_v48 = vmul.f32 %v4033_v44, %v965_v46 }
 0x211   : > { %4034 = vrcp.f32 %v976_v39 }
 0x212   : > { %v981_v52 = vadd.f32 %v979_v48, %v882_v61 }
 0x214   : > { %v983_v55 = vmul.f32 0.70710677, %v981_v52 }
 0x217   : > { %v4035_v49 = vpop.eup %4034 }
 0x218   : > { %v980_v50 = vmul.f32 %v4035_v49, %v966_v47 }
 0x21a   : > { %v982_v51 = vadd.f32 %v980_v50, %v4575_v53  ;;  %v987_v53 = vld [vmem:[%s5855_s2 + $0x10] sm:$0xff] }
 0x21c   : > { %v984_v54 = vmul.f32 0.70710677, %v982_v51 }
 0x21e   : > { %1015 = vmatpush.msra.mxu2 %v984_v54 }
 0x220   : > { %1016 = vmatpush.msra.mxu2 %v983_v55 }
 0x221   : > { %3673 = vmatmul.msk.f32.vlgmr.msra.gmra.mxu2 %vm774_vm0, %v985_v56  ;;  %v3677_v56 = vld [vmem:[%s5855_s2 + $0x20] sm:$0xff] }
 0x229   : > { %3674 = vmatmul.msk.f32.gmra.mxu2 %vm774_vm0, %v986_v57  ;;  %v3680_v57 = vld [vmem:[%s5855_s2 + $0x38] sm:$0xff] }
 0x231   : > { %3675 = vmatmul.msk.f32.gmra.mxu2 %vm774_vm0, %v987_v53 }
 0x239   : > { %3676 = vmatmul.msk.f32.gmra.mxu2 %vm774_vm0, %v988_v58 }
 0x2a4   : > { %v1018_v59 = vpop.f32.mrf.mxu2 }
 0x2a5   : > { %v1046_v37 = vmul.f32 %v1032_v34, %v1018_v59 }
 0x2a7   : > { %v1066_v44 = vadd.f32 %v1052_v38, %v1046_v37  ;;  %v1158_v37 = vld [vmem:[%s5858_s8] sm:$0xff]  ;;  %v1159_v38 = vld [vmem:[%s5858_s8 + $0x8] sm:$0xff] }
 0x2ac   : > { %v1021_v61 = vpop.f32.mrf.mxu2 }
 0x2ad   : > { %v1047_v39 = vmul.f32 %v1036_v32, %v1021_v61 }
 0x2af   : > { %v1067_v45 = vadd.f32 %v1056_v43, %v1047_v39  ;;  %v4278_v39 = vmov 4  }
 0x2b4   : > { %v1024_v2 = vpop.f32.mrf.mxu2 }
 0x2b5   : > { %v1048_v3 = vmul.f32 %v1040_v60, %v1024_v2  ;;  %v1136_v60 = vpop.permute.xlu0 %1135 }
 0x2b7   : > { %v1068_v6 = vadd.f32 %v1060_v5, %v1048_v3  ;;  %v1146_v3 = vpop.permute.xlu1 %1145 }
 0x2b9   : > { %v1070_v12 = vsub.f32 0.0, %v1068_v6 }
 0x2bb   : > { %v1072_v15 = vmul.f32 1.442695, %v1070_v12 }
 0x2bc   : > { %v1027_v18 = vpop.f32.mrf.mxu2 }
 0x2bd   : > { %4036 = vpow2.f32 %v1072_v15  ;;  %v1049_v20 = vmul.f32 %v1044_v16, %v1027_v18  ;;  %v4667_v15 = vld [vmem:[%s5857_s9 + $0x8] sm:$0xff]  ;;  %v4672_v16 = vld [vmem:[%s5857_s9] sm:$0xff] }
 0x2be   : > { %1199 = vperm.xlu0 %3968, %v4667_v15   ;;  %1194 = vperm.xlu2 %3967, %v4672_v16  }
 0x2bf   : > { %v1069_v21 = vadd.f32 %v1064_v14, %v1049_v20  ;;  %v4662_v14 = vld [vmem:[%s5856_s10] sm:$0xff]  ;;  %v4680_v20 = vld [vmem:[%s5856_s10 + $0x8] sm:$0xff]  ;;  %s3499_s10 = scalar_lea.sflag [#allocation4], %s4503_s3 }
 0x2c0   : > { %1208 = vperm.xlu1 %3969, %v4662_v14  }
 0x2c1   : > { %v1071_v22 = vsub.f32 0.0, %v1069_v21  ;;  %v1132_v21 = vpop.permute.xlu2 %1131 }
 0x2c3   : > { %v4037_v29 = vpop.eup %4036  ;;  %v1074_v30 = vmul.f32 1.442695, %v1071_v22 }
 0x2c4   : > { %v1076_v33 = vadd.f32 1.0, %v4037_v29 }
 0x2c5   : > { %4038 = vpow2.f32 %v1074_v30  ;;  %v1142_v30 = vpop.permute.xlu1 %1141 }
 0x2c6   : > { %4040 = vrcp.f32 %v1076_v33  ;;  %1213 = vperm.xlu2 %3967, %v4680_v20   ;;  %3972 = vset.pattern.permute.xlu0 %v4278_v39 }
 0x2c7   : > { %1563 = vperm.xlu0 %3972, %v4486_v8  }
 0x2c8   : > { %3970 = vset.pattern.permute.xlu1 %v4278_v39 }
 0x2c9   : > { %1543 = vperm.xlu1 %3970, %v4509_v11  }
 0x2cb   : > { %v4039_v35 = vpop.eup %4038 }
 0x2cc   : > { %v1077_v36 = vadd.f32 1.0, %v4039_v35  ;;  %v4041_v42 = vpop.eup %4040 }
 0x2cd   : > { %v1080_v46 = vmul.f32 %v4041_v42, %v1066_v44 }
 0x2ce   : > { %4042 = vrcp.f32 %v1077_v36  ;;  %3971 = vset.pattern.permute.xlu2 %v4278_v39 }
 0x2cf   : > { %v1082_v50 = vadd.f32 %v1080_v46, %v983_v55  ;;  %v3679_v55 = vld [vmem:[%s5855_s2 + $0x30] sm:$0xff]  ;;  %1539 = vperm.xlu2 %3971, %v4515_v13   ;;  %1551 = vperm.xlu0 %3972, %v4549_v26  }
 0x2d1   : > { %v1084_v52 = vmul.f32 0.70710677, %v1082_v50  ;;  %1559 = vperm.xlu1 %3970, %v4481_v7  }
 0x2d4   : > { %v4043_v47 = vpop.eup %4042 }
 0x2d5   : > { %v1081_v48 = vmul.f32 %v4043_v47, %v1067_v45 }
 0x2d7   : > { %v1083_v49 = vadd.f32 %v1081_v48, %v984_v54  ;;  %v3678_v54 = vld [vmem:[%s5855_s2 + $0x28] sm:$0xff]  ;;  %1535 = vperm.xlu2 %3971, %v4525_v19  }
 0x2d9   : > { %v1085_v51 = vmul.f32 0.70710677, %v1083_v49  ;;  %1531 = vperm.xlu1 %3970, %v4498_v10  }
 0x2db   : > { %1117 = vmatpush.msra.mxu3 %v1085_v51 }
 0x2dd   : > { %1118 = vmatpush.msra.mxu3 %v1084_v52 }
 0x2de   : > { %3681 = vmatmul.msk.f32.vlgmr.msra.gmra.mxu3 %vm774_vm0, %v3677_v56 }
 0x2df   : > { %1555 = vperm.xlu2 %3971, %v4493_v9  }
 0x2e6   : > { %3682 = vmatmul.msk.f32.gmra.mxu3 %vm774_vm0, %v3678_v54 }
 0x2ee   : > { %3683 = vmatmul.msk.f32.gmra.mxu3 %vm774_vm0, %v3679_v55 }
 0x2f6   : > { %3684 = vmatmul.msk.f32.gmra.mxu3 %vm774_vm0, %v3680_v57 }
 0x318   : > { %v1195_v41 = vpop.permute.xlu2 %1194 }
 0x320   : > { %v1214_v48 = vpop.permute.xlu2 %1213 }
 0x330   : > { %v1200_v43 = vpop.permute.xlu0 %1199 }
 0x332   : > { %v1209_v45 = vpop.permute.xlu1 %1208 }
 0x361   : > { %v1120_v53 = vpop.f32.mrf.mxu3 }
 0x369   : > { %v1122_v58 = vpop.f32.mrf.mxu3 }
 0x36a   : > { %v1138_v29 = vmul.f32 %v1132_v21, %v1122_v58 }
 0x36c   : > { %v1148_v32 = vadd.f32 %v1142_v30, %v1138_v29 }
 0x371   : > { %v1125_v59 = vpop.f32.mrf.mxu3 }
 0x379   : > { %v1127_v61 = vpop.f32.mrf.mxu3 }
 0x37a   : > { %v1139_v2 = vmul.f32 %v1136_v60, %v1127_v61  ;;  %v5819_v60 = vmov 0.0  }
 0x37c   : > { %v1149_v5 = vadd.f32 %v1146_v3, %v1139_v2 }
 0x37e   : > { %v1150_v6 = vsub.f32 0.0, %v1149_v5 }
 0x380   : > { %v1151_v12 = vmul.f32 1.442695, %v1150_v6 }
 0x382   : > { %4044 = vpow2.f32 %v1151_v12 }
 0x388   : > { %v4045_v18 = vpop.eup %4044 }
 0x389   : > { %v1153_v22 = vadd.f32 1.0, %v4045_v18 }
 0x38b   : > { %4046 = vrcp.f32 %v1153_v22 }
 0x391   : > { %v4047_v33 = vpop.eup %4046 }
 0x392   : > { %v1155_v34 = vmul.f32 %v4047_v33, %v1148_v32 }
 0x394   : > { %v1156_v35 = vadd.f32 %v1155_v34, %v1085_v51 }
 0x396   : > { %v1157_v36 = vmul.f32 0.70710677, %v1156_v35 }
 0x398   : > { %1182 = vmatpush.msrb.mxu0 %v1157_v36 }
 0x399   : > { %3685 = vmatmul.msk.f32.vlgmr.msrb.gmra.mxu0 %vm1160_vm1, %v1158_v37 }
 0x3a1   : > { %3686 = vmatmul.msk.f32.gmra.mxu0 %vm1160_vm1, %v1159_v38 }
 0x416   : > { %v1184_v42 = vpop.f32.mrf.mxu0 }
 0x417   : > { %v1202_v44 = vmul.f32 %v1195_v41, %v1184_v42 }
 0x419   : > { %v1216_v11 = vadd.f32 %v1209_v45, %v1202_v44 }
 0x41e   : > { %v1187_v46 = vpop.f32.mrf.mxu0 }
 0x41f   : > { %v1203_v47 = vmul.f32 %v1200_v43, %v1187_v46 }
 0x421   : > { %v1217_v49 = vadd.f32 %v1214_v48, %v1203_v47 }
 0x423   : > { %v1218_v8 = vmax.f32 %v1216_v11, %v1217_v49 }
 0x425   : > { %v1219_v13 = vrot.slane %v1218_v8, 4 }
 0x427   : > { %v1220_v50 = vmax.f32 %v1218_v8, %v1219_v13 }
 0x429   : > { %v1221_v7 = vrot.slane %v1220_v50, 2 }
 0x42b   : > { %v1222_v51 = vmax.f32 %v1220_v50, %v1221_v7 }
 0x42d   : > { %v1223_v26 = vrot.slane %v1222_v51, 1 }
 0x42f   : > { %v1224_v52 = vmax.f32 %v1222_v51, %v1223_v26 }
 0x431   : > { %v4699_v56 = vsub.f32 %v1216_v11, %v1224_v52  ;;  %v4701_v19 = vsub.f32 %v1217_v49, %v1224_v52 }
 0x433   : > { %v1227_v54 = vperm.slane %v4699_v56, 0  ;;  %v1240_v55 = vperm.slane %v4699_v56, 1  ;;  %v1253_v57 = vperm.slane %v4699_v56, 2  ;;  %v1266_v10 = vperm.slane %v4699_v56, 3 }
 0x434   : > { %v1279_v53 = vperm.slane %v4699_v56, 4  ;;  %v1292_v9 = vperm.slane %v4699_v56, 5  ;;  %v4710_v58 = vperm.slane %v4699_v56, 6  ;;  %v4713_v59 = vperm.slane %v4699_v56, 7 }
 0x435   : > { %vm1228_vm2 = vcmp.ge.f32.partialorder %v1227_v54, %v4699_v56  ;;  %vm1229_vm3 = vcmp.ge.f32.partialorder %v1227_v54, %v4701_v19  ;;  %vm1241_vm4 = vcmp.ge.f32.partialorder %v1240_v55, %v4699_v56  ;;  %vm1242_vm5 = vcmp.ge.f32.partialorder %v1240_v55, %v4701_v19 }
 0x436   : > { %v3687_v61 = vsel %vm1228_vm2, 1.0, %v5819_v60  ;;  %v3688_v2 = vsel %vm1229_vm3, 1.0, %v5819_v60  ;;  %v3689_v3 = vsel %vm1241_vm4, 1.0, %v5819_v60  ;;  %v3690_v5 = vsel %vm1242_vm5, 1.0, %v5819_v60 }
 0x437   : > { %v1236_v6 = vmul.f32 %v3687_v61, %v1227_v54  ;;  %v1237_v12 = vmul.f32 %v3688_v2, %v1227_v54  ;;  %v1247_v18 = vadd.f32 %v3689_v3, %v3687_v61  ;;  %v1248_v21 = vadd.f32 %v3690_v5, %v3688_v2 }
 0x438   : > { %v1249_v22 = vmul.f32 %v3689_v3, %v1240_v55  ;;  %v1250_v29 = vmul.f32 %v3690_v5, %v1240_v55  ;;  %vm1254_vm6 = vcmp.ge.f32.partialorder %v1253_v57, %v4699_v56  ;;  %vm1255_vm7 = vcmp.ge.f32.partialorder %v1253_v57, %v4701_v19 }
 0x439   : > { %v3691_v30 = vsel %vm1254_vm6, 1.0, %v5819_v60  ;;  %v3692_v32 = vsel %vm1255_vm7, 1.0, %v5819_v60  ;;  %vm1267_vm8 = vcmp.ge.f32.partialorder %v1266_v10, %v4699_v56  ;;  %vm1268_vm9 = vcmp.ge.f32.partialorder %v1266_v10, %v4701_v19 }
 0x43a   : > { %v1251_v33 = vadd.f32 %v1249_v22, %v1236_v6  ;;  %v1252_v34 = vadd.f32 %v1250_v29, %v1237_v12  ;;  %v1260_v35 = vadd.f32 %v3691_v30, %v1247_v18  ;;  %v1261_v36 = vadd.f32 %v3692_v32, %v1248_v21 }
 0x43b   : > { %v1262_v37 = vmul.f32 %v3691_v30, %v1253_v57  ;;  %v1263_v38 = vmul.f32 %v3692_v32, %v1253_v57  ;;  %v3693_v39 = vsel %vm1267_vm8, 1.0, %v5819_v60  ;;  %v3694_v41 = vsel %vm1268_vm9, 1.0, %v5819_v60 }
 0x43c   : > { %v1273_v42 = vadd.f32 %v3693_v39, %v1260_v35  ;;  %v1274_v43 = vadd.f32 %v3694_v41, %v1261_v36  ;;  %v1275_v44 = vmul.f32 %v3693_v39, %v1266_v10  ;;  %v1276_v45 = vmul.f32 %v3694_v41, %v1266_v10 }
 0x43d   : > { %v1264_v46 = vadd.f32 %v1262_v37, %v1251_v33  ;;  %v1265_v47 = vadd.f32 %v1263_v38, %v1252_v34  ;;  %vm1280_vm10 = vcmp.ge.f32.partialorder %v1279_v53, %v4699_v56  ;;  %vm1281_vm11 = vcmp.ge.f32.partialorder %v1279_v53, %v4701_v19 }
 0x43e   : > { %v3695_v48 = vsel %vm1280_vm10, 1.0, %v5819_v60  ;;  %v3696_v11 = vsel %vm1281_vm11, 1.0, %v5819_v60  ;;  %vm1293_vm12 = vcmp.ge.f32.partialorder %v1292_v9, %v4699_v56  ;;  %vm1294_vm13 = vcmp.ge.f32.partialorder %v1292_v9, %v4701_v19 }
 0x43f   : > { %v1277_v49 = vadd.f32 %v1275_v44, %v1264_v46  ;;  %v1278_v8 = vadd.f32 %v1276_v45, %v1265_v47  ;;  %v1286_v13 = vadd.f32 %v3695_v48, %v1273_v42  ;;  %v1287_v50 = vadd.f32 %v3696_v11, %v1274_v43 }
 0x440   : > { %v1288_v7 = vmul.f32 %v3695_v48, %v1279_v53  ;;  %v1289_v51 = vmul.f32 %v3696_v11, %v1279_v53  ;;  %v3697_v26 = vsel %vm1293_vm12, 1.0, %v5819_v60  ;;  %v3698_v52 = vsel %vm1294_vm13, 1.0, %v5819_v60 }
 0x441   : > { %v1299_v54 = vadd.f32 %v3697_v26, %v1286_v13  ;;  %v1300_v55 = vadd.f32 %v3698_v52, %v1287_v50  ;;  %v1301_v57 = vmul.f32 %v3697_v26, %v1292_v9  ;;  %v1302_v10 = vmul.f32 %v3698_v52, %v1292_v9 }
 0x442   : > { %v1290_v61 = vadd.f32 %v1288_v7, %v1277_v49  ;;  %v1291_v2 = vadd.f32 %v1289_v51, %v1278_v8  ;;  %vm1306_vm14 = vcmp.ge.f32.partialorder %v4710_v58, %v4699_v56  ;;  %vm1307_vm15 = vcmp.ge.f32.partialorder %v4710_v58, %v4701_v19 }
 0x443   : > { %v3699_v3 = vsel %vm1306_vm14, 1.0, %v5819_v60  ;;  %v3700_v53 = vsel %vm1307_vm15, 1.0, %v5819_v60  ;;  %vm1319_vm2 = vcmp.ge.f32.partialorder %v4713_v59, %v4699_v56  ;;  %vm1320_vm3 = vcmp.ge.f32.partialorder %v4713_v59, %v4701_v19 }
 0x444   : > { %v1303_v5 = vadd.f32 %v1301_v57, %v1290_v61  ;;  %v1304_v9 = vadd.f32 %v1302_v10, %v1291_v2  ;;  %v1312_v6 = vadd.f32 %v3699_v3, %v1299_v54  ;;  %v1313_v12 = vadd.f32 %v3700_v53, %v1300_v55 }
 0x445   : > { %v1314_v18 = vmul.f32 %v3699_v3, %v4710_v58  ;;  %v1315_v21 = vmul.f32 %v3700_v53, %v4710_v58  ;;  %v3701_v22 = vsel %vm1319_vm2, 1.0, %v5819_v60  ;;  %v3702_v29 = vsel %vm1320_vm3, 1.0, %v5819_v60 }
 0x446   : > { %v1325_v30 = vadd.f32 %v3701_v22, %v1312_v6  ;;  %v1326_v32 = vadd.f32 %v3702_v29, %v1313_v12  ;;  %v1327_v33 = vmul.f32 %v3701_v22, %v4713_v59  ;;  %v1328_v34 = vmul.f32 %v3702_v29, %v4713_v59 }
 0x447   : > { %v1316_v35 = vadd.f32 %v1314_v18, %v1303_v5  ;;  %v1317_v36 = vadd.f32 %v1315_v21, %v1304_v9  ;;  %v1331_v37 = vperm.slane %v4701_v19, 0  ;;  %v1344_v38 = vperm.slane %v4701_v19, 1 }
 0x448   : > { %v1357_v39 = vperm.slane %v4701_v19, 2  ;;  %v1370_v58 = vperm.slane %v4701_v19, 3  ;;  %v1383_v41 = vperm.slane %v4701_v19, 4  ;;  %v1396_v42 = vperm.slane %v4701_v19, 5 }
 0x449   : > { %v1329_v43 = vadd.f32 %v1327_v33, %v1316_v35  ;;  %v1330_v44 = vadd.f32 %v1328_v34, %v1317_v36  ;;  %vm1332_vm4 = vcmp.ge.f32.partialorder %v1331_v37, %v4699_v56  ;;  %vm1333_vm5 = vcmp.ge.f32.partialorder %v1331_v37, %v4701_v19 }
 0x44a   : > { %v3703_v59 = vsel %vm1332_vm4, 1.0, %v5819_v60  ;;  %v3704_v45 = vsel %vm1333_vm5, 1.0, %v5819_v60  ;;  %vm1345_vm6 = vcmp.ge.f32.partialorder %v1344_v38, %v4699_v56  ;;  %vm1346_vm7 = vcmp.ge.f32.partialorder %v1344_v38, %v4701_v19 }
 0x44b   : > { %v1338_v46 = vadd.f32 %v3703_v59, %v1325_v30  ;;  %v1339_v47 = vadd.f32 %v3704_v45, %v1326_v32  ;;  %v1340_v48 = vmul.f32 %v3703_v59, %v1331_v37  ;;  %v1341_v11 = vmul.f32 %v3704_v45, %v1331_v37 }
 0x44c   : > { %v3705_v49 = vsel %vm1345_vm6, 1.0, %v5819_v60  ;;  %v3706_v8 = vsel %vm1346_vm7, 1.0, %v5819_v60  ;;  %vm1358_vm8 = vcmp.ge.f32.partialorder %v1357_v39, %v4699_v56  ;;  %vm1359_vm9 = vcmp.ge.f32.partialorder %v1357_v39, %v4701_v19 }
 0x44d   : > { %v1342_v13 = vadd.f32 %v1340_v48, %v1329_v43  ;;  %v1343_v50 = vadd.f32 %v1341_v11, %v1330_v44  ;;  %v1351_v7 = vadd.f32 %v3705_v49, %v1338_v46  ;;  %v1352_v51 = vadd.f32 %v3706_v8, %v1339_v47 }
 0x44e   : > { %v1353_v26 = vmul.f32 %v3705_v49, %v1344_v38  ;;  %v1354_v52 = vmul.f32 %v3706_v8, %v1344_v38  ;;  %v3707_v54 = vsel %vm1358_vm8, 1.0, %v5819_v60  ;;  %v3708_v55 = vsel %vm1359_vm9, 1.0, %v5819_v60 }
 0x44f   : > { %v1364_v57 = vadd.f32 %v3707_v54, %v1351_v7  ;;  %v1365_v10 = vadd.f32 %v3708_v55, %v1352_v51  ;;  %v1366_v61 = vmul.f32 %v3707_v54, %v1357_v39  ;;  %v1367_v2 = vmul.f32 %v3708_v55, %v1357_v39 }
 0x450   : > { %v1355_v3 = vadd.f32 %v1353_v26, %v1342_v13  ;;  %v1356_v53 = vadd.f32 %v1354_v52, %v1343_v50  ;;  %vm1371_vm10 = vcmp.ge.f32.partialorder %v1370_v58, %v4699_v56  ;;  %vm1372_vm11 = vcmp.ge.f32.partialorder %v1370_v58, %v4701_v19 }
 0x451   : > { %v3709_v5 = vsel %vm1371_vm10, 1.0, %v5819_v60  ;;  %v3710_v9 = vsel %vm1372_vm11, 1.0, %v5819_v60  ;;  %vm1384_vm12 = vcmp.ge.f32.partialorder %v1383_v41, %v4699_v56  ;;  %vm1385_vm13 = vcmp.ge.f32.partialorder %v1383_v41, %v4701_v19 }
 0x452   : > { %v1368_v6 = vadd.f32 %v1366_v61, %v1355_v3  ;;  %v1369_v12 = vadd.f32 %v1367_v2, %v1356_v53  ;;  %v1377_v18 = vadd.f32 %v3709_v5, %v1364_v57  ;;  %v1378_v21 = vadd.f32 %v3710_v9, %v1365_v10 }
 0x453   : > { %v1379_v22 = vmul.f32 %v3709_v5, %v1370_v58  ;;  %v1380_v29 = vmul.f32 %v3710_v9, %v1370_v58  ;;  %v3711_v30 = vsel %vm1384_vm12, 1.0, %v5819_v60  ;;  %v3712_v32 = vsel %vm1385_vm13, 1.0, %v5819_v60 }
 0x454   : > { %v1390_v33 = vadd.f32 %v3711_v30, %v1377_v18  ;;  %v1391_v34 = vadd.f32 %v3712_v32, %v1378_v21  ;;  %v1392_v35 = vmul.f32 %v3711_v30, %v1383_v41  ;;  %v1393_v36 = vmul.f32 %v3712_v32, %v1383_v41 }
 0x455   : > { %v1381_v37 = vadd.f32 %v1379_v22, %v1368_v6  ;;  %v1382_v38 = vadd.f32 %v1380_v29, %v1369_v12  ;;  %vm1397_vm14 = vcmp.ge.f32.partialorder %v1396_v42, %v4699_v56  ;;  %vm1398_vm15 = vcmp.ge.f32.partialorder %v1396_v42, %v4701_v19 }
 0x456   : > { %v3713_v39 = vsel %vm1397_vm14, 1.0, %v5819_v60  ;;  %v3714_v43 = vsel %vm1398_vm15, 1.0, %v5819_v60  ;;  %v1409_v58 = vperm.slane %v4701_v19, 6  ;;  %v1422_v44 = vperm.slane %v4701_v19, 7 }
 0x457   : > { %v1394_v59 = vadd.f32 %v1392_v35, %v1381_v37  ;;  %v1395_v45 = vadd.f32 %v1393_v36, %v1382_v38  ;;  %v1403_v46 = vadd.f32 %v3713_v39, %v1390_v33  ;;  %v1404_v47 = vadd.f32 %v3714_v43, %v1391_v34 }
 0x458   : > { %v1405_v48 = vmul.f32 %v3713_v39, %v1396_v42  ;;  %v1406_v41 = vmul.f32 %v3714_v43, %v1396_v42  ;;  %vm1410_vm2 = vcmp.ge.f32.partialorder %v1409_v58, %v4699_v56  ;;  %vm1411_vm3 = vcmp.ge.f32.partialorder %v1409_v58, %v4701_v19 }
 0x459   : > { %v3715_v11 = vsel %vm1410_vm2, 1.0, %v5819_v60  ;;  %v3716_v49 = vsel %vm1411_vm3, 1.0, %v5819_v60  ;;  %vm1423_vm4 = vcmp.ge.f32.partialorder %v1422_v44, %v4699_v56  ;;  %vm1424_vm5 = vcmp.ge.f32.partialorder %v1422_v44, %v4701_v19 }
 0x45a   : > { %v1407_v8 = vadd.f32 %v1405_v48, %v1394_v59  ;;  %v1408_v13 = vadd.f32 %v1406_v41, %v1395_v45  ;;  %v1416_v50 = vadd.f32 %v3715_v11, %v1403_v46  ;;  %v1417_v7 = vadd.f32 %v3716_v49, %v1404_v47 }
 0x45b   : > { %v1418_v51 = vmul.f32 %v3715_v11, %v1409_v58  ;;  %v1419_v26 = vmul.f32 %v3716_v49, %v1409_v58  ;;  %v3717_v42 = vsel %vm1423_vm4, 1.0, %v5819_v60  ;;  %v3718_v52 = vsel %vm1424_vm5, 1.0, %v5819_v60 }
 0x45c   : > { %v1429_v54 = vadd.f32 %v3717_v42, %v1416_v50  ;;  %v1430_v55 = vadd.f32 %v3718_v52, %v1417_v7  ;;  %v1431_v61 = vmul.f32 %v3717_v42, %v1422_v44  ;;  %v1432_v2 = vmul.f32 %v3718_v52, %v1422_v44 }
 0x45d   : > { %v1420_v57 = vadd.f32 %v1418_v51, %v1407_v8  ;;  %v1421_v10 = vadd.f32 %v1419_v26, %v1408_v13 }
 0x45e   : > { %v1435_v3 = vmul.f32 %v1429_v54, %v4699_v56  ;;  %v1436_v53 = vmul.f32 %v1430_v55, %v4701_v19 }
 0x45f   : > { %v1433_v5 = vadd.f32 %v1431_v61, %v1420_v57  ;;  %v1434_v9 = vadd.f32 %v1432_v2, %v1421_v10 }
 0x460   : > { %v1437_v6 = vadd.f32 1.0, %v1435_v3  ;;  %v1438_v12 = vadd.f32 1.0, %v1436_v53 }
 0x462   : > { %vm1439_vm6 = vcmp.gt.f32.partialorder %v1437_v6, %v1433_v5  ;;  %vm1440_vm7 = vcmp.gt.f32.partialorder %v1438_v12, %v1434_v9  ;;  %v1544_v12 = vpop.permute.xlu1 %1543 }
 0x463   : > { %v3719_v18 = vsel %vm1439_vm6, 1.0, %v5819_v60  ;;  %v3720_v21 = vsel %vm1440_vm7, 1.0, %v5819_v60 }
 0x464   : > { %v1445_v22 = vadd.f32 %v3720_v21, %v3719_v18  ;;  %v1452_v29 = vmul.f32 %v3719_v18, %v4699_v56  ;;  %v1453_v30 = vmul.f32 %v3720_v21, %v4701_v19  ;;  %v1540_v21 = vpop.permute.xlu2 %1539 }
 0x466   : > { %v1446_v32 = vrot.slane %v1445_v22, 4  ;;  %v1454_v33 = vadd.f32 %v1453_v30, %v1452_v29 }
 0x468   : > { %v1447_v34 = vadd.f32 %v1446_v32, %v1445_v22  ;;  %v1455_v35 = vrot.slane %v1454_v33, 4 }
 0x46a   : > { %v1448_v36 = vrot.slane %v1447_v34, 2  ;;  %v1456_v38 = vadd.f32 %v1455_v35, %v1454_v33  ;;  %v1560_v30 = vpop.permute.xlu1 %1559 }
 0x46c   : > { %v1449_v37 = vadd.f32 %v1448_v36, %v1447_v34  ;;  %v1457_v58 = vrot.slane %v1456_v38, 2  ;;  %v4280_v34 = vmov 5  }
 0x46d   : > { %3973 = vset.pattern.permute.xlu1 %v4280_v34  ;;  %3975 = vset.pattern.permute.xlu0 %v4280_v34 }
 0x46e   : > { %v1450_v39 = vrot.slane %v1449_v37, 1  ;;  %v1458_v44 = vadd.f32 %v1457_v58, %v1456_v38  ;;  %3974 = vset.pattern.permute.xlu2 %v4280_v34  ;;  %v1564_v38 = vpop.permute.xlu0 %1563 }
 0x470   : > { %v1451_v43 = vadd.f32 %v1450_v39, %v1449_v37  ;;  %v1459_v45 = vrot.slane %v1458_v44, 1  ;;  %v4840_v37 = vld [vmem:[%s5852_s25 + $0x10] sm:$0xff] }
 0x471   : > { %1620 = vperm.xlu2 %3974, %v4840_v37  }
 0x472   : > { %4048 = vrcp.f32 %v1451_v43  ;;  %v1473_v48 = vand.u32 2147483648, %v1451_v43  ;;  %v1460_v41 = vadd.f32 %v1459_v45, %v1458_v44  ;;  %v1471_v49 = vand.u32 2147483647, %v1451_v43  ;;  %v4846_v44 = vld [vmem:[%s5851_s7 + $0x10] sm:$0xff]  ;;  %v4858_v45 = vld [vmem:[%s5852_s25 + $0x8] sm:$0xff] }
 0x473   : > { %vm1467_vm9 = vweird.f32 %v1451_v43 }
 0x474   : > { %v1474_v13 = vor.u32 1.1754944e-38, %v1473_v48  ;;  %v3721_v50 = vadd.f32 -1.0, %v1460_v41  ;;  %vm1472_vm11 = vcmp.eq.f32.partialorder %v1471_v49, 8.507059e+37 }
 0x478   : > { %v4049_v59 = vpop.eup %4048 }
 0x479   : > { %v1463_v46 = vmul.f32 %v4049_v59, %v1451_v43  ;;  %vm1468_vm8 = vweird.f32 %v4049_v59  ;;  %1616 = vperm.xlu2 %3974, %v4858_v45  }
 0x47a   : > { %vm1469_vm10 = vmor %vm1467_vm9, %vm1468_vm8 }
 0x47b   : > { %v1464_v47 = vsub.f32 1.0, %v1463_v46 }
 0x47d   : > { %v1465_v11 = vmul.f32 %v4049_v59, %v1464_v47  ;;  %v1536_v47 = vpop.permute.xlu2 %1535 }
 0x47f   : > { %v1466_v8 = vadd.f32 %v4049_v59, %v1465_v11  ;;  %v4864_v11 = vld [vmem:[%s5852_s25] sm:$0xff] }
 0x481   : > { %v1470_v7 = vsel %vm1469_vm10, %v4049_v59, %v1466_v8  ;;  %v4852_v59 = vld [vmem:[%s5851_s7] sm:$0xff]  ;;  %v4870_v8 = vld [vmem:[%s5851_s7 + $0x8] sm:$0xff] }
 0x482   : > { %v1475_v51 = vsel %vm1472_vm11, %v1474_v13, %v1470_v7  ;;  %1636 = vperm.xlu2 %3974, %v4870_v8   ;;  %v1532_v13 = vpop.permute.xlu1 %1531 }
 0x483   : > { %v1476_v26 = vmul.f32 %v3721_v50, %v1475_v51 }
 0x485   : > { %v1478_v42 = vsub.f32 %v4701_v19, %v1476_v26  ;;  %v1477_v52 = vsub.f32 %v4699_v56, %v1476_v26  ;;  %v1556_v7 = vpop.permute.xlu2 %1555  ;;  %v1552_v26 = vpop.permute.xlu0 %1551 }
 0x487   : > { %v4803_v54 = vmax.f32 %v1478_v42, 0.0  ;;  %v4805_v55 = vmax.f32 %v1477_v52, 0.0 }
 0x489   : > { %5859 = vst [vmem:[#allocation16_spill] sm:$0xff] %v4803_v54  ;;  %v1482_v57 = vadd.f32 1e-15, %v4803_v54  ;;  %v1500_v10 = vmul.f32 %v4803_v54, %v4518_v17  ;;  %v1481_v61 = vadd.f32 1e-15, %v4805_v55  ;;  %v1499_v2 = vmul.f32 %v4805_v55, %v4528_v23 }
 0x48a   : > { %5860 = vst [vmem:[#allocation17_spill] sm:$0xff] %v4805_v55 }
 0x48b   : > { %4050 = vlog2.f32 %v1482_v57  ;;  %1515 = vmatpush.msra.mxu1 %v1500_v10 }
 0x48c   : > { %4052 = vlog2.f32 %v1481_v61 }
 0x48d   : > { %1516 = vmatpush.msra.mxu1 %v1499_v2 }
 0x48e   : > { %3722 = vmatmul.msk.f32.vlgmr.msra.gmra.mxu1 %vm774_vm0, %v4533_v24 }
 0x491   : > { %v4051_v56 = vpop.eup %4050 }
 0x492   : > { %v4053_v19 = vpop.eup %4052  ;;  %v1486_v3 = vmul.f32 0.6931472, %v4051_v56  ;;  %v4281_v56 = vmov 6  }
 0x493   : > { %v1484_v53 = vmul.f32 0.6931472, %v4053_v19  ;;  %3977 = vset.pattern.permute.xlu2 %v4281_v56 }
 0x494   : > { %v1488_v5 = vmul.f32 %v1486_v3, %v4803_v54  ;;  %1722 = vperm.xlu2 %3977, %v4840_v37  }
 0x495   : > { %v1487_v9 = vmul.f32 %v1484_v53, %v4805_v55 }
 0x496   : > { %3723 = vmatmul.msk.f32.gmra.mxu1 %vm774_vm0, %v4555_v27  ;;  %v4828_v27 = vld [vmem:[%s5852_s25 + $0x18] sm:$0xff] }
 0x497   : > { %v4819_v6 = vadd.f32 %v1488_v5, %v1487_v9  ;;  %1624 = vperm.xlu1 %3973, %v4828_v27  }
 0x49c   : > { %1718 = vperm.xlu2 %3977, %v4858_v45  }
 0x49e   : > { %3724 = vmatmul.msk.f32.gmra.mxu1 %vm774_vm0, %v4562_v28 }
 0x49f   : > { %1640 = vperm.xlu1 %3973, %v4846_v44  }
 0x4a4   : > { %1738 = vperm.xlu2 %3977, %v4870_v8  }
 0x4a6   : > { %3725 = vmatmul.msk.f32.gmra.mxu1 %vm774_vm0, %v4538_v25  ;;  %v4834_v25 = vld [vmem:[%s5851_s7 + $0x18] sm:$0xff] }
 0x4a7   : > { %1644 = vperm.xlu0 %3975, %v4834_v25   ;;  %1612 = vperm.xlu1 %3973, %v4864_v11  }
 0x4af   : > { %1632 = vperm.xlu0 %3975, %v4852_v59   ;;  %3976 = vset.pattern.permute.xlu1 %v4281_v56 }
 0x4b0   : > { %1726 = vperm.xlu1 %3976, %v4828_v27  }
 0x4b7   : > { %3978 = vset.pattern.permute.xlu0 %v4281_v56  ;;  %v3733_v56 = vld [vmem:[%s5855_s2 + $0x58] sm:$0xff] }
 0x4b8   : > { %1746 = vperm.xlu0 %3978, %v4834_v25   ;;  %1742 = vperm.xlu1 %3976, %v4846_v44  }
 0x4c0   : > { %1734 = vperm.xlu0 %3978, %v4852_v59   ;;  %1714 = vperm.xlu1 %3976, %v4864_v11  }
 0x4cb   : > { %v1621_v19 = vpop.permute.xlu2 %1620 }
 0x4d3   : > { %v1617_v34 = vpop.permute.xlu2 %1616 }
 0x50b   : > { %v1518_v24 = vpop.f32.mrf.mxu1 }
 0x50c   : > { %v1546_v51 = vmul.f32 %v1532_v13, %v1518_v24 }
 0x50e   : > { %v1566_v10 = vadd.f32 %v1552_v26, %v1546_v51  ;;  %v4284_v26 = vmov 9  }
 0x513   : > { %v1521_v18 = vpop.f32.mrf.mxu1 }
 0x514   : > { %v1547_v50 = vmul.f32 %v1536_v47, %v1521_v18  ;;  %v4283_v18 = vmov 8   ;;  %v1637_v47 = vpop.permute.xlu2 %1636 }
 0x516   : > { %v1567_v52 = vadd.f32 %v1556_v7, %v1547_v50 }
 0x51b   : > { %v1524_v22 = vpop.f32.mrf.mxu1 }
 0x51c   : > { %v1548_v29 = vmul.f32 %v1540_v21, %v1524_v22 }
 0x51e   : > { %v1568_v32 = vadd.f32 %v1560_v30, %v1548_v29  ;;  %v1645_v29 = vpop.permute.xlu0 %1644 }
 0x520   : > { %v1570_v33 = vsub.f32 0.0, %v1568_v32 }
 0x522   : > { %v1572_v28 = vmul.f32 1.442695, %v1570_v33 }
 0x523   : > { %v1527_v35 = vpop.f32.mrf.mxu1 }
 0x524   : > { %v1549_v36 = vmul.f32 %v1544_v12, %v1527_v35  ;;  %4054 = vpow2.f32 %v1572_v28 }
 0x526   : > { %v1569_v39 = vadd.f32 %v1564_v38, %v1549_v36 }
 0x528   : > { %v1571_v43 = vsub.f32 0.0, %v1569_v39 }
 0x52a   : > { %v1574_v58 = vmul.f32 1.442695, %v1571_v43  ;;  %v4055_v46 = vpop.eup %4054  ;;  %v1633_v43 = vpop.permute.xlu0 %1632 }
 0x52b   : > { %v1576_v48 = vadd.f32 1.0, %v4055_v46 }
 0x52c   : > { %4056 = vpow2.f32 %v1574_v58 }
 0x52d   : > { %4058 = vrcp.f32 %v1576_v48 }
 0x532   : > { %v4057_v41 = vpop.eup %4056 }
 0x533   : > { %v1577_v49 = vadd.f32 1.0, %v4057_v41  ;;  %v4059_v42 = vpop.eup %4058 }
 0x534   : > { %v4876_v2 = vmul.f32 %v4059_v42, %v1566_v10  ;;  %v3731_v10 = vld [vmem:[%s5855_s2 + $0x48] sm:$0xff] }
 0x535   : > { %4060 = vrcp.f32 %v1577_v49 }
 0x53b   : > { %v4061_v57 = vpop.eup %4060 }
 0x53c   : > { %v4873_v61 = vmul.f32 %v4061_v57, %v1567_v52  ;;  %v3730_v57 = vld [vmem:[%s5855_s2 + $0x40] sm:$0xff] }
 0x53e   : > { %1596 = vmatpush.msrb.mxu2 %v4873_v61 }
 0x540   : > { %1597 = vmatpush.msrb.mxu2 %v4876_v2 }
 0x541   : > { %3726 = vmatmul.msk.f32.vlgmr.msrb.gmra.mxu2 %vm774_vm0, %v4583_v62 }
 0x549   : > { %3727 = vmatmul.msk.f32.gmra.mxu2 %vm774_vm0, %v4590_v63  ;;  %v4282_v63 = vmov 7  }
 0x54a   : > { %3979 = vset.pattern.permute.xlu1 %v4282_v63  ;;  %3980 = vset.pattern.permute.xlu2 %v4282_v63 }
 0x54b   : > { %1828 = vperm.xlu1 %3979, %v4828_v27   ;;  %1848 = vperm.xlu2 %3980, %v4834_v25  }
 0x54c   : > { %3981 = vset.pattern.permute.xlu0 %v4282_v63 }
 0x54d   : > { %1820 = vperm.xlu0 %3981, %v4858_v45  }
 0x551   : > { %3728 = vmatmul.msk.f32.gmra.mxu2 %vm774_vm0, %v4597_v0  ;;  %v1625_v0 = vpop.permute.xlu1 %1624 }
 0x553   : > { %1840 = vperm.xlu1 %3979, %v4870_v8   ;;  %3982 = vset.pattern.permute.xlu2 %v4275_v40 }
 0x554   : > { %1906 = vperm.xlu2 %3982, %v4672_v16  }
 0x555   : > { %3984 = vset.pattern.permute.xlu0 %v4275_v40 }
 0x556   : > { %1920 = vperm.xlu0 %3984, %v4680_v20  }
 0x559   : > { %3729 = vmatmul.msk.f32.gmra.mxu2 %vm774_vm0, %v4604_v1  ;;  %v1641_v5 = vpop.permute.xlu1 %1640 }
 0x55b   : > { %3983 = vset.pattern.permute.xlu1 %v4275_v40 }
 0x55c   : > { %1910 = vperm.xlu1 %3983, %v4667_v15   ;;  %1916 = vperm.xlu2 %3982, %v4662_v14  }
 0x55e   : > { %3987 = vset.pattern.permute.xlu0 %v4283_v18 }
 0x55f   : > { %2246 = vperm.xlu0 %3987, %v4858_v45  }
 0x561   : > { %v1613_v35 = vpop.permute.xlu1 %1612 }
 0x564   : > { %3985 = vset.pattern.permute.xlu1 %v4283_v18  ;;  %3986 = vset.pattern.permute.xlu2 %v4283_v18 }
 0x565   : > { %2254 = vperm.xlu1 %3985, %v4828_v27   ;;  %2250 = vperm.xlu2 %3986, %v4840_v37  }
 0x567   : > { %3989 = vset.pattern.permute.xlu0 %v4284_v26 }
 0x568   : > { %2331 = vperm.xlu0 %3989, %v4840_v37  }
 0x56d   : > { %2274 = vperm.xlu1 %3985, %v4834_v25   ;;  %2270 = vperm.xlu2 %3986, %v4846_v44  }
 0x570   : > { %2347 = vperm.xlu0 %3989, %v4870_v8  }
 0x575   : > { %2242 = vperm.xlu1 %3985, %v4864_v11   ;;  %2266 = vperm.xlu2 %3986, %v4870_v8  }
 0x57d   : > { %2262 = vperm.xlu1 %3985, %v4852_v59   ;;  %3988 = vset.pattern.permute.xlu2 %v4284_v26 }
 0x57e   : > { %2335 = vperm.xlu2 %3988, %v4828_v27  }
 0x585   : > { %3990 = vset.pattern.permute.xlu1 %v4284_v26 }
 0x586   : > { %2355 = vperm.xlu1 %3990, %v4834_v25   ;;  %2351 = vperm.xlu2 %3988, %v4846_v44  }
 0x58e   : > { %2327 = vperm.xlu1 %3990, %v4858_v45   ;;  %2323 = vperm.xlu2 %3988, %v4864_v11  }
 0x596   : > { %2343 = vperm.xlu1 %3990, %v4852_v59  }
 0x5c4   : > { %v1599_v62 = vpop.f32.mrf.mxu2 }
 0x5c5   : > { %v1627_v39 = vmul.f32 %v1613_v35, %v1599_v62  ;;  %v5818_v62 = vmov 11  }
 0x5c7   : > { %v1647_v48 = vadd.f32 %v1633_v43, %v1627_v39 }
 0x5cc   : > { %v1602_v1 = vpop.f32.mrf.mxu2 }
 0x5cd   : > { %v1628_v58 = vmul.f32 %v1617_v34, %v1602_v1  ;;  %v4287_v1 = vmov 12  }
 0x5cf   : > { %v1648_v41 = vadd.f32 %v1637_v47, %v1628_v58  ;;  %v1747_v58 = vpop.permute.xlu0 %1746 }
 0x5d4   : > { %v1605_v3 = vpop.f32.mrf.mxu2 }
 0x5d5   : > { %v1629_v53 = vmul.f32 %v1621_v19, %v1605_v3  ;;  %v4288_v3 = vmov 13  }
 0x5d7   : > { %v1649_v9 = vadd.f32 %v1641_v5, %v1629_v53 }
 0x5d9   : > { %v1651_v24 = vsub.f32 0.0, %v1649_v9 }
 0x5db   : > { %v1653_v12 = vmul.f32 1.442695, %v1651_v24 }
 0x5dc   : > { %v1608_v21 = vpop.f32.mrf.mxu2 }
 0x5dd   : > { %4062 = vpow2.f32 %v1653_v12  ;;  %v1630_v22 = vmul.f32 %v1625_v0, %v1608_v21  ;;  %v4960_v0 = vpop.permute.xlu1 %1726 }
 0x5df   : > { %v1650_v30 = vadd.f32 %v1645_v29, %v1630_v22 }
 0x5e1   : > { %v1652_v32 = vsub.f32 0.0, %v1650_v30 }
 0x5e3   : > { %v4063_v40 = vpop.eup %4062  ;;  %v1655_v33 = vmul.f32 1.442695, %v1652_v32  ;;  %v4289_v32 = vmov 14  }
 0x5e4   : > { %v1657_v28 = vadd.f32 1.0, %v4063_v40 }
 0x5e5   : > { %4064 = vpow2.f32 %v1655_v33  ;;  %v1743_v19 = vpop.permute.xlu1 %1742 }
 0x5e6   : > { %4066 = vrcp.f32 %v1657_v28 }
 0x5eb   : > { %v4065_v36 = vpop.eup %4064 }
 0x5ec   : > { %v1658_v38 = vadd.f32 1.0, %v4065_v36  ;;  %v4067_v46 = vpop.eup %4066 }
 0x5ed   : > { %v1661_v49 = vmul.f32 %v4067_v46, %v1647_v48 }
 0x5ee   : > { %4068 = vrcp.f32 %v1658_v38 }
 0x5ef   : > { %v1663_v51 = vadd.f32 %v1661_v49, %v4876_v2  ;;  %v3732_v2 = vld [vmem:[%s5855_s2 + $0x50] sm:$0xff] }
 0x5f1   : > { %v4923_v52 = vmul.f32 0.70710677, %v1663_v51 }
 0x5f4   : > { %v4069_v13 = vpop.eup %4068 }
 0x5f5   : > { %v1662_v50 = vmul.f32 %v4069_v13, %v1648_v41 }
 0x5f7   : > { %v1664_v7 = vadd.f32 %v1662_v50, %v4873_v61  ;;  %v4285_v61 = vmov 10  }
 0x5f8   : > { %3992 = vset.pattern.permute.xlu0 %v4285_v61  ;;  %3991 = vset.pattern.permute.xlu2 %v4285_v61 }
 0x5f9   : > { %v4919_v42 = vmul.f32 0.70710677, %v1664_v7  ;;  %2433 = vperm.xlu0 %3992, %v4840_v37   ;;  %2437 = vperm.xlu2 %3991, %v4828_v27  }
 0x5fa   : > { %3993 = vset.pattern.permute.xlu1 %v4285_v61 }
 0x5fb   : > { %1698 = vmatpush.msrb.mxu3 %v4919_v42  ;;  %2457 = vperm.xlu1 %3993, %v4834_v25  }
 0x5fd   : > { %1699 = vmatpush.msrb.mxu3 %v4923_v52 }
 0x5fe   : > { %3734 = vmatmul.msk.f32.vlgmr.msrb.gmra.mxu3 %vm774_vm0, %v3730_v57 }
 0x601   : > { %2449 = vperm.xlu0 %3992, %v4870_v8   ;;  %2453 = vperm.xlu2 %3991, %v4846_v44  }
 0x603   : > { %2429 = vperm.xlu1 %3993, %v4858_v45  }
 0x606   : > { %3735 = vmatmul.msk.f32.gmra.mxu3 %vm774_vm0, %v3731_v10 }
 0x609   : > { %3995 = vset.pattern.permute.xlu0 %v5818_v62  ;;  %2425 = vperm.xlu2 %3991, %v4864_v11  }
 0x60a   : > { %2559 = vperm.xlu0 %3995, %v4834_v25  }
 0x60b   : > { %2445 = vperm.xlu1 %3993, %v4852_v59  }
 0x60e   : > { %3736 = vmatmul.msk.f32.gmra.mxu3 %vm774_vm0, %v3732_v2 }
 0x611   : > { %3994 = vset.pattern.permute.xlu2 %v5818_v62 }
 0x612   : > { %3999 = vset.pattern.permute.xlu0 %v4276_v31  ;;  %2539 = vperm.xlu2 %3994, %v4828_v27  }
 0x613   : > { %2627 = vperm.xlu0 %3999, %v4662_v14   ;;  %3996 = vset.pattern.permute.xlu1 %v5818_v62  ;;  %v4969_v14 = vpop.permute.xlu1 %1714 }
 0x614   : > { %2531 = vperm.xlu1 %3996, %v4858_v45  }
 0x616   : > { %3737 = vmatmul.msk.f32.gmra.mxu3 %vm774_vm0, %v3733_v56 }
 0x61a   : > { %2551 = vperm.xlu2 %3994, %v4870_v8  }
 0x61b   : > { %4002 = vset.pattern.permute.xlu0 %v4287_v1  ;;  %v4976_v53 = vpop.permute.xlu1 %1828 }
 0x61c   : > { %2977 = vperm.xlu0 %4002, %v4846_v44   ;;  %3997 = vset.pattern.permute.xlu1 %v4276_v31 }
 0x61d   : > { %2617 = vperm.xlu1 %3997, %v4672_v16  }
 0x622   : > { %3998 = vset.pattern.permute.xlu2 %v4276_v31  ;;  %v1723_v31 = vpop.permute.xlu2 %1722 }
 0x623   : > { %2621 = vperm.xlu2 %3998, %v4667_v15   ;;  %v4981_v5 = vpop.permute.xlu1 %1840 }
 0x624   : > { %4003 = vset.pattern.permute.xlu0 %v4288_v3 }
 0x625   : > { %3042 = vperm.xlu0 %4003, %v4828_v27   ;;  %2631 = vperm.xlu1 %3997, %v4680_v20  }
 0x62a   : > { %v4989_v16 = vpop.permute.xlu2 %1718 }
 0x62b   : > { %4000 = vset.pattern.permute.xlu2 %v4287_v1  ;;  %v4985_v15 = vpop.permute.xlu1 %1910 }
 0x62c   : > { %2961 = vperm.xlu2 %4000, %v4828_v27  }
 0x62d   : > { %3030 = vperm.xlu0 %4003, %v4864_v11   ;;  %4001 = vset.pattern.permute.xlu1 %v4287_v1 }
 0x62e   : > { %2957 = vperm.xlu1 %4001, %v4840_v37  }
 0x632   : > { %v4995_v9 = vpop.permute.xlu2 %1738 }
 0x633   : > { %v4993_v20 = vpop.permute.xlu1 %2254 }
 0x634   : > { %2981 = vperm.xlu2 %4000, %v4834_v25  }
 0x635   : > { %4006 = vset.pattern.permute.xlu0 %v4289_v32 }
 0x636   : > { %2953 = vperm.xlu1 %4001, %v4858_v45   ;;  %3144 = vperm.xlu0 %4006, %v4828_v27  }
 0x63a   : > { %v5001_v12 = vpop.permute.xlu2 %1848 }
 0x63b   : > { %v4999_v24 = vpop.permute.xlu1 %2274 }
 0x63c   : > { %2949 = vperm.xlu2 %4000, %v4864_v11  }
 0x63e   : > { %2973 = vperm.xlu1 %4001, %v4870_v8   ;;  %3132 = vperm.xlu0 %4006, %v4864_v11  }
 0x642   : > { %v5009_v21 = vpop.permute.xlu2 %1906 }
 0x643   : > { %v5005_v18 = vpop.permute.xlu1 %2242 }
 0x644   : > { %2969 = vperm.xlu2 %4000, %v4852_v59  }
 0x646   : > { %4004 = vset.pattern.permute.xlu1 %v4288_v3  ;;  %4009 = vset.pattern.permute.xlu0 %v4282_v63 }
 0x647   : > { %3038 = vperm.xlu1 %4004, %v4840_v37   ;;  %1824 = vperm.xlu0 %4009, %v4840_v37  }
 0x64a   : > { %v5013_v30 = vpop.permute.xlu2 %1916 }
 0x64b   : > { %v5011_v22 = vpop.permute.xlu1 %2262 }
 0x64c   : > { %4005 = vset.pattern.permute.xlu2 %v4288_v3 }
 0x64d   : > { %3062 = vperm.xlu2 %4005, %v4834_v25  }
 0x64f   : > { %3058 = vperm.xlu1 %4004, %v4846_v44  }
 0x652   : > { %v5020_v34 = vpop.permute.xlu2 %2250 }
 0x653   : > { %v5018_v33 = vpop.permute.xlu1 %2355 }
 0x655   : > { %3034 = vperm.xlu2 %4005, %v4858_v45  }
 0x657   : > { %3054 = vperm.xlu1 %4004, %v4870_v8  }
 0x65a   : > { %v5027_v38 = vpop.permute.xlu2 %2270 }
 0x65b   : > { %v5025_v36 = vpop.permute.xlu1 %2327 }
 0x65d   : > { %3050 = vperm.xlu2 %4005, %v4852_v59  }
 0x65f   : > { %4007 = vset.pattern.permute.xlu1 %v4289_v32 }
 0x660   : > { %3140 = vperm.xlu1 %4007, %v4840_v37  }
 0x662   : > { %v5034_v46 = vpop.permute.xlu2 %2266 }
 0x663   : > { %v5036_v48 = vpop.permute.xlu1 %2343 }
 0x665   : > { %4008 = vset.pattern.permute.xlu2 %v4289_v32 }
 0x666   : > { %3164 = vperm.xlu2 %4008, %v4834_v25  }
 0x668   : > { %3160 = vperm.xlu1 %4007, %v4846_v44  }
 0x66a   : > { %v5042_v50 = vpop.permute.xlu2 %2335 }
 0x66d   : > { %v5045_v7 = vpop.permute.xlu1 %2457 }
 0x66e   : > { %3136 = vperm.xlu2 %4008, %v4858_v45  }
 0x670   : > { %3156 = vperm.xlu1 %4007, %v4870_v8  }
 0x672   : > { %v5048_v10 = vpop.permute.xlu2 %2351 }
 0x676   : > { %3152 = vperm.xlu2 %4008, %v4852_v59  }
 0x678   : > { %4010 = vset.pattern.permute.xlu1 %v5818_v62 }
 0x679   : > { %2535 = vperm.xlu1 %4010, %v4840_v37   ;;  %v1735_v37 = vpop.permute.xlu0 %1734 }
 0x67e   : > { %4011 = vset.pattern.permute.xlu2 %v4282_v63 }
 0x67f   : > { %1844 = vperm.xlu2 %4011, %v4846_v44  }
 0x681   : > { %v1701_v29 = vpop.f32.mrf.mxu3  ;;  %2555 = vperm.xlu1 %4010, %v4846_v44  }
 0x682   : > { %v1729_v57 = vmul.f32 %v4969_v14, %v1701_v29  ;;  %v5056_v14 = vpop.permute.xlu2 %2323 }
 0x684   : > { %v1749_v56 = vadd.f32 %v1735_v37, %v1729_v57 }
 0x689   : > { %v1704_v40 = vpop.f32.mrf.mxu3  ;;  %4014 = vset.pattern.permute.xlu1 %v4282_v63  ;;  %v3738_v63 = vld [vmem:[%s5855_s2 + $0x60] sm:$0xff] }
 0x68a   : > { %v1730_v61 = vmul.f32 %v4989_v16, %v1704_v40  ;;  %1816 = vperm.xlu1 %4014, %v4864_v11  }
 0x68c   : > { %v1750_v44 = vadd.f32 %v4995_v9, %v1730_v61  ;;  %v5070_v9 = vpop.permute.xlu0 %1820 }
 0x691   : > { %v1707_v28 = vpop.f32.mrf.mxu3 }
 0x692   : > { %v1731_v35 = vmul.f32 %v1723_v31, %v1707_v28  ;;  %1836 = vperm.xlu1 %4014, %v4852_v59   ;;  %v3739_v59 = vld [vmem:[%s5855_s2 + $0x68] sm:$0xff] }
 0x694   : > { %v1751_v27 = vadd.f32 %v1743_v19, %v1731_v35  ;;  %v5054_v19 = vpop.permute.xlu1 %2429  ;;  %v5083_v40 = vpop.permute.xlu0 %1920  ;;  %v3740_v35 = vld [vmem:[%s5855_s2 + $0x70] sm:$0xff] }
 0x696   : > { %v1753_v25 = vsub.f32 0.0, %v1751_v27 }
 0x698   : > { %v1755_v39 = vmul.f32 1.442695, %v1753_v25 }
 0x699   : > { %v1710_v43 = vpop.f32.mrf.mxu3 }
 0x69a   : > { %4070 = vpow2.f32 %v1755_v39  ;;  %v1732_v45 = vmul.f32 %v4960_v0, %v1710_v43  ;;  %v3741_v43 = vld [vmem:[%s5855_s2 + $0x78] sm:$0xff] }
 0x69c   : > { %v1752_v47 = vadd.f32 %v1747_v58, %v1732_v45  ;;  %v5072_v32 = vpop.permute.xlu1 %2445  ;;  %v5093_v25 = vpop.permute.xlu0 %2246 }
 0x69e   : > { %v1754_v8 = vsub.f32 0.0, %v1752_v47 }
 0x6a0   : > { %v4071_v41 = vpop.eup %4070  ;;  %v1757_v49 = vmul.f32 1.442695, %v1754_v8 }
 0x6a1   : > { %v1759_v13 = vadd.f32 1.0, %v4071_v41 }
 0x6a2   : > { %4072 = vpow2.f32 %v1757_v49 }
 0x6a3   : > { %4074 = vrcp.f32 %v1759_v13 }
 0x6a4   : > { %v5085_v28 = vpop.permute.xlu1 %2531  ;;  %v5103_v58 = vpop.permute.xlu0 %2331 }
 0x6a8   : > { %v4073_v51 = vpop.eup %4072 }
 0x6a9   : > { %v1760_v26 = vadd.f32 1.0, %v4073_v51  ;;  %v4075_v2 = vpop.eup %4074 }
 0x6aa   : > { %v1763_v0 = vmul.f32 %v4075_v2, %v1749_v56 }
 0x6ab   : > { %4076 = vrcp.f32 %v1760_v26 }
 0x6ac   : > { %v1765_v29 = vadd.f32 %v1763_v0, %v4923_v52  ;;  %v5095_v39 = vpop.permute.xlu1 %2617  ;;  %v5109_v41 = vpop.permute.xlu0 %2347 }
 0x6ad   : > { %5861 = vst [vmem:[#allocation18_spill] sm:$0xff] %v5095_v39 }
 0x6ae   : > { %v5064_v11 = vmul.f32 0.70710677, %v1765_v29 }
 0x6b1   : > { %v4077_v1 = vpop.eup %4076 }
 0x6b2   : > { %v1764_v3 = vmul.f32 %v4077_v1, %v1750_v44 }
 0x6b4   : > { %v1766_v31 = vadd.f32 %v1764_v3, %v4919_v42  ;;  %v5075_v42 = vpop.permute.xlu2 %2437  ;;  %v5105_v47 = vpop.permute.xlu1 %2631 }
 0x6b5   : > { %5862 = vst [vmem:[#allocation19_spill] sm:$0xff] %v5105_v47  ;;  %v5117_v26 = vpop.permute.xlu0 %2433 }
 0x6b6   : > { %v5060_v16 = vmul.f32 0.70710677, %v1766_v31 }
 0x6b8   : > { %1800 = vmatpush.msra.mxu0 %v5060_v16 }
 0x6ba   : > { %1801 = vmatpush.msra.mxu0 %v5064_v11 }
 0x6bb   : > { %3742 = vmatmul.msk.f32.vlgmr.msra.gmra.mxu0 %vm774_vm0, %v3738_v63 }
 0x6bc   : > { %v5081_v52 = vpop.permute.xlu2 %2453  ;;  %v5111_v49 = vpop.permute.xlu1 %2957 }
 0x6bd   : > { %5864 = vst [vmem:[#allocation21_spill] sm:$0xff] %v5111_v49  ;;  %v5123_v61 = vpop.permute.xlu0 %2449 }
 0x6c3   : > { %3743 = vmatmul.msk.f32.gmra.mxu0 %vm774_vm0, %v3739_v59 }
 0x6c4   : > { %v5091_v27 = vpop.permute.xlu2 %2425  ;;  %v5119_v57 = vpop.permute.xlu1 %2953 }
 0x6c5   : > { %5867 = vst [vmem:[#allocation24_spill] sm:$0xff] %v5119_v57  ;;  %v5129_v44 = vpop.permute.xlu0 %2559 }
 0x6cb   : > { %3744 = vmatmul.msk.f32.gmra.mxu0 %vm774_vm0, %v3740_v35 }
 0x6cc   : > { %v5101_v45 = vpop.permute.xlu2 %2539  ;;  %v5125_v2 = vpop.permute.xlu1 %2973 }
 0x6cd   : > { %5869 = vst [vmem:[#allocation26_spill] sm:$0xff] %v5125_v2  ;;  %v5135_v3 = vpop.permute.xlu0 %2627 }
 0x6ce   : > { %5873 = vst [vmem:[#allocation30_spill] sm:$0xff] %v5135_v3 }
 0x6d3   : > { %3745 = vmatmul.msk.f32.gmra.mxu0 %vm774_vm0, %v3741_v43 }
 0x6d4   : > { %v5107_v8 = vpop.permute.xlu2 %2551  ;;  %v5131_v0 = vpop.permute.xlu1 %3038 }
 0x6d5   : > { %5863 = vst [vmem:[#allocation20_spill] sm:$0xff] %v5107_v8  ;;  %v5141_v63 = vpop.permute.xlu0 %2977 }
 0x6d6   : > { %5871 = vst [vmem:[#allocation28_spill] sm:$0xff] %v5131_v0 }
 0x6d7   : > { %5876 = vst [vmem:[#allocation33_spill] sm:$0xff] %v5141_v63 }
 0x6dc   : > { %v5113_v13 = vpop.permute.xlu2 %2621  ;;  %v5137_v31 = vpop.permute.xlu1 %3058 }
 0x6dd   : > { %5865 = vst [vmem:[#allocation22_spill] sm:$0xff] %v5113_v13  ;;  %v5147_v43 = vpop.permute.xlu0 %3042 }
 0x6de   : > { %5874 = vst [vmem:[#allocation31_spill] sm:$0xff] %v5137_v31 }
 0x6df   : > { %5879 = vst [vmem:[#allocation36_spill] sm:$0xff] %v5147_v43 }
 0x6e4   : > { %v5115_v51 = vpop.permute.xlu2 %2961  ;;  %v5143_v59 = vpop.permute.xlu1 %3054 }
 0x6e5   : > { %5866 = vst [vmem:[#allocation23_spill] sm:$0xff] %v5115_v51  ;;  %v5153_v60 = vpop.permute.xlu0 %3030 }
 0x6e6   : > { %5877 = vst [vmem:[#allocation34_spill] sm:$0xff] %v5143_v59 }
 0x6e7   : > { %5882 = vst [vmem:[#allocation39_spill] sm:$0xff] %v5153_v60 }
 0x6ec   : > { %v5121_v37 = vpop.permute.xlu2 %2981  ;;  %v5149_v4 = vpop.permute.xlu1 %3140 }
 0x6ed   : > { %5868 = vst [vmem:[#allocation25_spill] sm:$0xff] %v5121_v37  ;;  %v5159_v31 = vpop.permute.xlu0 %3144 }
 0x6ee   : > { %5880 = vst [vmem:[#allocation37_spill] sm:$0xff] %v5149_v4 }
 0x6ef   : > { %5885 = vst [vmem:[#allocation42_spill] sm:$0xff] %v5159_v31 }
 0x6f4   : > { %v5127_v56 = vpop.permute.xlu2 %2949  ;;  %v5155_v0 = vpop.permute.xlu1 %3160 }
 0x6f5   : > { %5870 = vst [vmem:[#allocation27_spill] sm:$0xff] %v5127_v56 }
 0x6f6   : > { %5883 = vst [vmem:[#allocation40_spill] sm:$0xff] %v5155_v0 }
 0x6fc   : > { %v5133_v1 = vpop.permute.xlu2 %2969 }
 0x6fd   : > { %5872 = vst [vmem:[#allocation29_spill] sm:$0xff] %v5133_v1 }
 0x704   : > { %v5139_v29 = vpop.permute.xlu2 %3062 }
 0x705   : > { %5875 = vst [vmem:[#allocation32_spill] sm:$0xff] %v5139_v29  ;;  %v5161_v29 = vpop.permute.xlu1 %3156 }
 0x706   : > { %5886 = vst [vmem:[#allocation43_spill] sm:$0xff] %v5161_v29 }
 0x70c   : > { %v5145_v35 = vpop.permute.xlu2 %3034 }
 0x70d   : > { %5878 = vst [vmem:[#allocation35_spill] sm:$0xff] %v5145_v35  ;;  %v5165_v35 = vpop.permute.xlu0 %3132  ;;  %v5167_v43 = vpop.permute.xlu1 %2535 }
 0x70e   : > { %5888 = vst [vmem:[#allocation45_spill] sm:$0xff] %v5165_v35 }
 0x714   : > { %v5151_v62 = vpop.permute.xlu2 %3050 }
 0x715   : > { %5881 = vst [vmem:[#allocation38_spill] sm:$0xff] %v5151_v62  ;;  %v1825_v56 = vpop.permute.xlu0 %1824  ;;  %v5171_v60 = vpop.permute.xlu1 %2555 }
 0x71c   : > { %v5157_v1 = vpop.permute.xlu2 %3164 }
 0x71d   : > { %5884 = vst [vmem:[#allocation41_spill] sm:$0xff] %v5157_v1  ;;  %v1817_v63 = vpop.permute.xlu1 %1816 }
 0x724   : > { %v5163_v2 = vpop.permute.xlu2 %3136 }
 0x725   : > { %5887 = vst [vmem:[#allocation44_spill] sm:$0xff] %v5163_v2  ;;  %v1837_v39 = vpop.permute.xlu1 %1836 }
 0x72c   : > { %v5169_v4 = vpop.permute.xlu2 %3152 }
 0x72d   : > { %5889 = vst [vmem:[#allocation46_spill] sm:$0xff] %v5169_v4 }
 0x734   : > { %v1845_v57 = vpop.permute.xlu2 %1844 }
 0x738   : > { %v1803_v59 = vpop.f32.mrf.mxu0 }
 0x739   : > { %v1831_v3 = vmul.f32 %v1817_v63, %v1803_v59 }
 0x740   : > { %v1806_v62 = vpop.f32.mrf.mxu0 }
 0x748   : > { %v1809_v0 = vpop.f32.mrf.mxu0 }
 0x749   : > { %v1833_v1 = vmul.f32 %v1825_v56, %v1809_v0  ;;  %v1851_v56 = vadd.f32 %v1837_v39, %v1831_v3  ;;  %v3747_v39 = vld [vmem:[%s5858_s8 + $0x18] sm:$0xff] }
 0x74b   : > { %v1853_v37 = vadd.f32 %v1845_v57, %v1833_v1  ;;  %v5821_v1 = vsub.f32 1.3, %v4803_v54 }
 0x74d   : > { %v1855_v31 = vsub.f32 0.0, %v1853_v37 }
 0x74f   : > { %v1857_v51 = vmul.f32 1.442695, %v1855_v31 }
 0x750   : > { %v1812_v29 = vpop.f32.mrf.mxu0 }
 0x751   : > { %4078 = vpow2.f32 %v1857_v51  ;;  %v1834_v2 = vmul.f32 %v4976_v53, %v1812_v29  ;;  %v1832_v53 = vmul.f32 %v5070_v9, %v1806_v62 }
 0x753   : > { %v1854_v35 = vadd.f32 %v5001_v12, %v1834_v2  ;;  %v1852_v51 = vadd.f32 %v4981_v5, %v1832_v53 }
 0x755   : > { %v1856_v49 = vsub.f32 0.0, %v1854_v35 }
 0x757   : > { %v4079_v47 = vpop.eup %4078  ;;  %v1859_v4 = vmul.f32 1.442695, %v1856_v49 }
 0x758   : > { %v1861_v13 = vadd.f32 1.0, %v4079_v47 }
 0x759   : > { %4080 = vpow2.f32 %v1859_v4  ;;  %v3746_v4 = vld [vmem:[%s5858_s8 + $0x10] sm:$0xff] }
 0x75a   : > { %4082 = vrcp.f32 %v1861_v13  ;;  %v5822_v13 = vsub.f32 1.3, %v4805_v55 }
 0x75f   : > { %v4081_v8 = vpop.eup %4080 }
 0x760   : > { %v4083_v57 = vpop.eup %4082  ;;  %v1862_v37 = vadd.f32 1.0, %v4081_v8 }
 0x761   : > { %v5175_v0 = vmul.f32 %v4083_v57, %v1851_v56 }
 0x762   : > { %4084 = vrcp.f32 %v1862_v37 }
 0x763   : > { %5890 = vst [vmem:[#allocation47_spill] sm:$0xff] %v5175_v0 }
 0x768   : > { %v4085_v12 = vpop.eup %4084 }
 0x769   : > { %v1866_v2 = vmul.f32 %v4085_v12, %v1852_v51 }
 0x76b   : > { %v1868_v49 = vadd.f32 %v1866_v2, %v5060_v16 }
 0x76d   : > { %v1870_v47 = vmul.f32 0.70710677, %v1868_v49 }
 0x76f   : > { %1897 = vmatpush.msrb.mxu1 %v1870_v47 }
 0x770   : > { %3748 = vmatmul.msk.f32.vlgmr.msrb.gmra.mxu1 %vm1160_vm1, %v3746_v4 }
 0x778   : > { %3749 = vmatmul.msk.f32.gmra.mxu1 %vm1160_vm1, %v3747_v39  ;;  %v5891_v39 = vmov 0.0  }
 0x7ed   : > { %v1899_v62 = vpop.f32.mrf.mxu1 }
 0x7ee   : > { %v1913_v5 = vmul.f32 %v5009_v21, %v1899_v62 }
 0x7f0   : > { %v1923_v16 = vadd.f32 %v5013_v30, %v1913_v5 }
 0x7f2   : > { %v1925_v31 = vmul.f32 %v1923_v16, %v5822_v13 }
 0x7f5   : > { %v1902_v9 = vpop.f32.mrf.mxu1 }
 0x7f6   : > { %v1914_v8 = vmul.f32 %v4985_v15, %v1902_v9 }
 0x7f8   : > { %v1924_v3 = vadd.f32 %v5083_v40, %v1914_v8 }
 0x7fa   : > { %v1926_v29 = vmul.f32 %v1924_v3, %v5821_v1 }
 0x7fc   : > { %v1927_v63 = vmax.f32 %v1925_v31, %v1926_v29 }
 0x7fe   : > { %v1928_v59 = vrot.slane %v1927_v63, 4 }
 0x800   : > { %v1929_v21 = vmax.f32 %v1927_v63, %v1928_v59 }
 0x802   : > { %v1930_v35 = vrot.slane %v1929_v21, 2 }
 0x804   : > { %v1931_v56 = vmax.f32 %v1929_v21, %v1930_v35 }
 0x806   : > { %v1932_v30 = vrot.slane %v1931_v56, 1 }
 0x808   : > { %v1933_v57 = vmax.f32 %v1931_v56, %v1932_v30 }
 0x80a   : > { %v5198_v15 = vsub.f32 %v1925_v31, %v1933_v57  ;;  %v5200_v37 = vsub.f32 %v1926_v29, %v1933_v57 }
 0x80c   : > { %v1936_v53 = vperm.slane %v5198_v15, 0  ;;  %v1949_v40 = vperm.slane %v5198_v15, 1  ;;  %v1962_v51 = vperm.slane %v5198_v15, 2  ;;  %v1975_v12 = vperm.slane %v5198_v15, 3 }
 0x80d   : > { %v1988_v2 = vperm.slane %v5198_v15, 4  ;;  %v2001_v49 = vperm.slane %v5198_v15, 5  ;;  %v5209_v47 = vperm.slane %v5198_v15, 6  ;;  %v5212_v4 = vperm.slane %v5198_v15, 7 }
 0x80e   : > { %vm1937_vm12 = vcmp.ge.f32.partialorder %v1936_v53, %v5198_v15  ;;  %vm1938_vm13 = vcmp.ge.f32.partialorder %v1936_v53, %v5200_v37  ;;  %vm1950_vm14 = vcmp.ge.f32.partialorder %v1949_v40, %v5198_v15  ;;  %vm1951_vm15 = vcmp.ge.f32.partialorder %v1949_v40, %v5200_v37 }
 0x80f   : > { %v3750_v62 = vsel %vm1937_vm12, 1.0, %v5891_v39  ;;  %v3751_v5 = vsel %vm1938_vm13, 1.0, %v5891_v39  ;;  %v3752_v9 = vsel %vm1950_vm14, 1.0, %v5891_v39  ;;  %v3753_v16 = vsel %vm1951_vm15, 1.0, %v5891_v39 }
 0x810   : > { %v1945_v8 = vmul.f32 %v3750_v62, %v1936_v53  ;;  %v1946_v3 = vmul.f32 %v3751_v5, %v1936_v53  ;;  %v1956_v31 = vadd.f32 %v3752_v9, %v3750_v62  ;;  %v1957_v29 = vadd.f32 %v3753_v16, %v3751_v5 }
 0x811   : > { %v1958_v63 = vmul.f32 %v3752_v9, %v1949_v40  ;;  %v1959_v59 = vmul.f32 %v3753_v16, %v1949_v40  ;;  %vm1963_vm2 = vcmp.ge.f32.partialorder %v1962_v51, %v5198_v15  ;;  %vm1964_vm3 = vcmp.ge.f32.partialorder %v1962_v51, %v5200_v37 }
 0x812   : > { %v3754_v21 = vsel %vm1963_vm2, 1.0, %v5891_v39  ;;  %v3755_v35 = vsel %vm1964_vm3, 1.0, %v5891_v39  ;;  %vm1976_vm4 = vcmp.ge.f32.partialorder %v1975_v12, %v5198_v15  ;;  %vm1977_vm5 = vcmp.ge.f32.partialorder %v1975_v12, %v5200_v37 }
 0x813   : > { %v1960_v56 = vadd.f32 %v1958_v63, %v1945_v8  ;;  %v1961_v30 = vadd.f32 %v1959_v59, %v1946_v3  ;;  %v1969_v57 = vadd.f32 %v3754_v21, %v1956_v31  ;;  %v1970_v53 = vadd.f32 %v3755_v35, %v1957_v29 }
 0x814   : > { %v1971_v62 = vmul.f32 %v3754_v21, %v1962_v51  ;;  %v1972_v5 = vmul.f32 %v3755_v35, %v1962_v51  ;;  %v3756_v40 = vsel %vm1976_vm4, 1.0, %v5891_v39  ;;  %v3757_v9 = vsel %vm1977_vm5, 1.0, %v5891_v39 }
 0x815   : > { %v1982_v16 = vadd.f32 %v3756_v40, %v1969_v57  ;;  %v1983_v1 = vadd.f32 %v3757_v9, %v1970_v53  ;;  %v1984_v13 = vmul.f32 %v3756_v40, %v1975_v12  ;;  %v1985_v54 = vmul.f32 %v3757_v9, %v1975_v12 }
 0x816   : > { %v1973_v55 = vadd.f32 %v1971_v62, %v1960_v56  ;;  %v1974_v0 = vadd.f32 %v1972_v5, %v1961_v30  ;;  %vm1989_vm6 = vcmp.ge.f32.partialorder %v1988_v2, %v5198_v15  ;;  %vm1990_vm7 = vcmp.ge.f32.partialorder %v1988_v2, %v5200_v37 }
 0x817   : > { %v3758_v8 = vsel %vm1989_vm6, 1.0, %v5891_v39  ;;  %v3759_v3 = vsel %vm1990_vm7, 1.0, %v5891_v39  ;;  %vm2002_vm8 = vcmp.ge.f32.partialorder %v2001_v49, %v5198_v15  ;;  %vm2003_vm9 = vcmp.ge.f32.partialorder %v2001_v49, %v5200_v37 }
 0x818   : > { %v1986_v51 = vadd.f32 %v1984_v13, %v1973_v55  ;;  %v1987_v31 = vadd.f32 %v1985_v54, %v1974_v0  ;;  %v1995_v29 = vadd.f32 %v3758_v8, %v1982_v16  ;;  %v1996_v63 = vadd.f32 %v3759_v3, %v1983_v1 }
 0x819   : > { %v1997_v59 = vmul.f32 %v3758_v8, %v1988_v2  ;;  %v1998_v12 = vmul.f32 %v3759_v3, %v1988_v2  ;;  %v3760_v21 = vsel %vm2002_vm8, 1.0, %v5891_v39  ;;  %v3761_v35 = vsel %vm2003_vm9, 1.0, %v5891_v39 }
 0x81a   : > { %v2008_v56 = vadd.f32 %v3760_v21, %v1995_v29  ;;  %v2009_v30 = vadd.f32 %v3761_v35, %v1996_v63  ;;  %v2010_v57 = vmul.f32 %v3760_v21, %v2001_v49  ;;  %v2011_v53 = vmul.f32 %v3761_v35, %v2001_v49 }
 0x81b   : > { %v1999_v62 = vadd.f32 %v1997_v59, %v1986_v51  ;;  %v2000_v5 = vadd.f32 %v1998_v12, %v1987_v31  ;;  %vm2015_vm10 = vcmp.ge.f32.partialorder %v5209_v47, %v5198_v15  ;;  %vm2016_vm11 = vcmp.ge.f32.partialorder %v5209_v47, %v5200_v37 }
 0x81c   : > { %v3762_v54 = vsel %vm2015_vm10, 1.0, %v5891_v39  ;;  %v3763_v55 = vsel %vm2016_vm11, 1.0, %v5891_v39  ;;  %vm2028_vm12 = vcmp.ge.f32.partialorder %v5212_v4, %v5198_v15  ;;  %vm2029_vm13 = vcmp.ge.f32.partialorder %v5212_v4, %v5200_v37 }
 0x81d   : > { %v2012_v0 = vadd.f32 %v2010_v57, %v1999_v62  ;;  %v2013_v13 = vadd.f32 %v2011_v53, %v2000_v5  ;;  %v2021_v1 = vadd.f32 %v3762_v54, %v2008_v56  ;;  %v2022_v2 = vadd.f32 %v3763_v55, %v2009_v30 }
 0x81e   : > { %v2023_v49 = vmul.f32 %v3762_v54, %v5209_v47  ;;  %v2024_v40 = vmul.f32 %v3763_v55, %v5209_v47  ;;  %v3764_v9 = vsel %vm2028_vm12, 1.0, %v5891_v39  ;;  %v3765_v16 = vsel %vm2029_vm13, 1.0, %v5891_v39 }
 0x81f   : > { %v2034_v8 = vadd.f32 %v3764_v9, %v2021_v1  ;;  %v2035_v3 = vadd.f32 %v3765_v16, %v2022_v2  ;;  %v2036_v51 = vmul.f32 %v3764_v9, %v5212_v4  ;;  %v2037_v31 = vmul.f32 %v3765_v16, %v5212_v4 }
 0x820   : > { %v2025_v29 = vadd.f32 %v2023_v49, %v2012_v0  ;;  %v2026_v63 = vadd.f32 %v2024_v40, %v2013_v13  ;;  %v2040_v59 = vperm.slane %v5200_v37, 0  ;;  %v2053_v12 = vperm.slane %v5200_v37, 1 }
 0x821   : > { %v2066_v21 = vperm.slane %v5200_v37, 2  ;;  %v2079_v47 = vperm.slane %v5200_v37, 3  ;;  %v2092_v35 = vperm.slane %v5200_v37, 4  ;;  %v2105_v56 = vperm.slane %v5200_v37, 5 }
 0x822   : > { %v2038_v30 = vadd.f32 %v2036_v51, %v2025_v29  ;;  %v2039_v57 = vadd.f32 %v2037_v31, %v2026_v63  ;;  %vm2041_vm14 = vcmp.ge.f32.partialorder %v2040_v59, %v5198_v15  ;;  %vm2042_vm15 = vcmp.ge.f32.partialorder %v2040_v59, %v5200_v37 }
 0x823   : > { %v3766_v4 = vsel %vm2041_vm14, 1.0, %v5891_v39  ;;  %v3767_v53 = vsel %vm2042_vm15, 1.0, %v5891_v39  ;;  %vm2054_vm2 = vcmp.ge.f32.partialorder %v2053_v12, %v5198_v15  ;;  %vm2055_vm3 = vcmp.ge.f32.partialorder %v2053_v12, %v5200_v37 }
 0x824   : > { %v2047_v62 = vadd.f32 %v3766_v4, %v2034_v8  ;;  %v2048_v5 = vadd.f32 %v3767_v53, %v2035_v3  ;;  %v2049_v54 = vmul.f32 %v3766_v4, %v2040_v59  ;;  %v2050_v55 = vmul.f32 %v3767_v53, %v2040_v59 }
 0x825   : > { %v3768_v0 = vsel %vm2054_vm2, 1.0, %v5891_v39  ;;  %v3769_v13 = vsel %vm2055_vm3, 1.0, %v5891_v39  ;;  %vm2067_vm4 = vcmp.ge.f32.partialorder %v2066_v21, %v5198_v15  ;;  %vm2068_vm5 = vcmp.ge.f32.partialorder %v2066_v21, %v5200_v37 }
 0x826   : > { %v2051_v1 = vadd.f32 %v2049_v54, %v2038_v30  ;;  %v2052_v2 = vadd.f32 %v2050_v55, %v2039_v57  ;;  %v2060_v49 = vadd.f32 %v3768_v0, %v2047_v62  ;;  %v2061_v40 = vadd.f32 %v3769_v13, %v2048_v5 }
 0x827   : > { %v2062_v9 = vmul.f32 %v3768_v0, %v2053_v12  ;;  %v2063_v16 = vmul.f32 %v3769_v13, %v2053_v12  ;;  %v3770_v51 = vsel %vm2067_vm4, 1.0, %v5891_v39  ;;  %v3771_v8 = vsel %vm2068_vm5, 1.0, %v5891_v39 }
 0x828   : > { %v2073_v3 = vadd.f32 %v3770_v51, %v2060_v49  ;;  %v2074_v31 = vadd.f32 %v3771_v8, %v2061_v40  ;;  %v2075_v29 = vmul.f32 %v3770_v51, %v2066_v21  ;;  %v2076_v63 = vmul.f32 %v3771_v8, %v2066_v21 }
 0x829   : > { %v2064_v59 = vadd.f32 %v2062_v9, %v2051_v1  ;;  %v2065_v4 = vadd.f32 %v2063_v16, %v2052_v2  ;;  %vm2080_vm6 = vcmp.ge.f32.partialorder %v2079_v47, %v5198_v15  ;;  %vm2081_vm7 = vcmp.ge.f32.partialorder %v2079_v47, %v5200_v37 }
 0x82a   : > { %v3772_v30 = vsel %vm2080_vm6, 1.0, %v5891_v39  ;;  %v3773_v57 = vsel %vm2081_vm7, 1.0, %v5891_v39  ;;  %vm2093_vm8 = vcmp.ge.f32.partialorder %v2092_v35, %v5198_v15  ;;  %vm2094_vm9 = vcmp.ge.f32.partialorder %v2092_v35, %v5200_v37 }
 0x82b   : > { %v2077_v12 = vadd.f32 %v2075_v29, %v2064_v59  ;;  %v2078_v53 = vadd.f32 %v2076_v63, %v2065_v4  ;;  %v2086_v62 = vadd.f32 %v3772_v30, %v2073_v3  ;;  %v2087_v5 = vadd.f32 %v3773_v57, %v2074_v31 }
 0x82c   : > { %v2088_v54 = vmul.f32 %v3772_v30, %v2079_v47  ;;  %v2089_v21 = vmul.f32 %v3773_v57, %v2079_v47  ;;  %v3774_v55 = vsel %vm2093_vm8, 1.0, %v5891_v39  ;;  %v3775_v0 = vsel %vm2094_vm9, 1.0, %v5891_v39 }
 0x82d   : > { %v2099_v13 = vadd.f32 %v3774_v55, %v2086_v62  ;;  %v2100_v1 = vadd.f32 %v3775_v0, %v2087_v5  ;;  %v2101_v2 = vmul.f32 %v3774_v55, %v2092_v35  ;;  %v2102_v49 = vmul.f32 %v3775_v0, %v2092_v35 }
 0x82e   : > { %v2090_v40 = vadd.f32 %v2088_v54, %v2077_v12  ;;  %v2091_v9 = vadd.f32 %v2089_v21, %v2078_v53  ;;  %vm2106_vm10 = vcmp.ge.f32.partialorder %v2105_v56, %v5198_v15  ;;  %vm2107_vm11 = vcmp.ge.f32.partialorder %v2105_v56, %v5200_v37 }
 0x82f   : > { %v3776_v16 = vsel %vm2106_vm10, 1.0, %v5891_v39  ;;  %v3777_v51 = vsel %vm2107_vm11, 1.0, %v5891_v39  ;;  %v2118_v47 = vperm.slane %v5200_v37, 6  ;;  %v2131_v8 = vperm.slane %v5200_v37, 7 }
 0x830   : > { %v2103_v3 = vadd.f32 %v2101_v2, %v2090_v40  ;;  %v2104_v31 = vadd.f32 %v2102_v49, %v2091_v9  ;;  %v2112_v29 = vadd.f32 %v3776_v16, %v2099_v13  ;;  %v2113_v63 = vadd.f32 %v3777_v51, %v2100_v1 }
 0x831   : > { %v2114_v59 = vmul.f32 %v3776_v16, %v2105_v56  ;;  %v2115_v35 = vmul.f32 %v3777_v51, %v2105_v56  ;;  %vm2119_vm12 = vcmp.ge.f32.partialorder %v2118_v47, %v5198_v15  ;;  %vm2120_vm13 = vcmp.ge.f32.partialorder %v2118_v47, %v5200_v37 }
 0x832   : > { %v3778_v4 = vsel %vm2119_vm12, 1.0, %v5891_v39  ;;  %v3779_v30 = vsel %vm2120_vm13, 1.0, %v5891_v39  ;;  %vm2132_vm14 = vcmp.ge.f32.partialorder %v2131_v8, %v5198_v15  ;;  %vm2133_vm15 = vcmp.ge.f32.partialorder %v2131_v8, %v5200_v37 }
 0x833   : > { %v2116_v57 = vadd.f32 %v2114_v59, %v2103_v3  ;;  %v2117_v12 = vadd.f32 %v2115_v35, %v2104_v31  ;;  %v2125_v53 = vadd.f32 %v3778_v4, %v2112_v29  ;;  %v2126_v62 = vadd.f32 %v3779_v30, %v2113_v63 }
 0x834   : > { %v2127_v5 = vmul.f32 %v3778_v4, %v2118_v47  ;;  %v2128_v54 = vmul.f32 %v3779_v30, %v2118_v47  ;;  %v3780_v56 = vsel %vm2132_vm14, 1.0, %v5891_v39  ;;  %v3781_v21 = vsel %vm2133_vm15, 1.0, %v5891_v39 }
 0x835   : > { %v2138_v55 = vadd.f32 %v3780_v56, %v2125_v53  ;;  %v2139_v0 = vadd.f32 %v3781_v21, %v2126_v62  ;;  %v2140_v2 = vmul.f32 %v3780_v56, %v2131_v8  ;;  %v2141_v49 = vmul.f32 %v3781_v21, %v2131_v8 }
 0x836   : > { %v2129_v13 = vadd.f32 %v2127_v5, %v2116_v57  ;;  %v2130_v1 = vadd.f32 %v2128_v54, %v2117_v12 }
 0x837   : > { %v2144_v40 = vmul.f32 %v2138_v55, %v5198_v15  ;;  %v2145_v9 = vmul.f32 %v2139_v0, %v5200_v37 }
 0x838   : > { %v2142_v16 = vadd.f32 %v2140_v2, %v2129_v13  ;;  %v2143_v51 = vadd.f32 %v2141_v49, %v2130_v1 }
 0x839   : > { %v2146_v3 = vadd.f32 1.0, %v2144_v40  ;;  %v2147_v31 = vadd.f32 1.0, %v2145_v9 }
 0x83b   : > { %vm2148_vm2 = vcmp.gt.f32.partialorder %v2146_v3, %v2142_v16  ;;  %vm2149_vm3 = vcmp.gt.f32.partialorder %v2147_v31, %v2143_v51 }
 0x83c   : > { %v3782_v47 = vsel %vm2148_vm2, 1.0, %v5891_v39  ;;  %v3783_v29 = vsel %vm2149_vm3, 1.0, %v5891_v39 }
 0x83d   : > { %v2154_v63 = vadd.f32 %v3783_v29, %v3782_v47  ;;  %v2161_v59 = vmul.f32 %v3782_v47, %v5198_v15  ;;  %v2162_v35 = vmul.f32 %v3783_v29, %v5200_v37 }
 0x83f   : > { %v2155_v8 = vrot.slane %v2154_v63, 4  ;;  %v2163_v4 = vadd.f32 %v2162_v35, %v2161_v59 }
 0x841   : > { %v2156_v30 = vadd.f32 %v2155_v8, %v2154_v63  ;;  %v2164_v57 = vrot.slane %v2163_v4, 4 }
 0x843   : > { %v2157_v12 = vrot.slane %v2156_v30, 2  ;;  %v2165_v62 = vadd.f32 %v2164_v57, %v2163_v4 }
 0x845   : > { %v2158_v53 = vadd.f32 %v2157_v12, %v2156_v30  ;;  %v2166_v56 = vrot.slane %v2165_v62, 2 }
 0x847   : > { %v2159_v5 = vrot.slane %v2158_v53, 1  ;;  %v2167_v21 = vadd.f32 %v2166_v56, %v2165_v62 }
 0x849   : > { %v2160_v54 = vadd.f32 %v2159_v5, %v2158_v53  ;;  %v2168_v0 = vrot.slane %v2167_v21, 1  ;;  %v1490_v5 = vrot.slane %v4819_v6, 4 }
 0x84b   : > { %4086 = vrcp.f32 %v2160_v54  ;;  %v2182_v2 = vand.u32 2147483648, %v2160_v54  ;;  %v2169_v49 = vadd.f32 %v2168_v0, %v2167_v21  ;;  %v2180_v9 = vand.u32 2147483647, %v2160_v54 }
 0x84c   : > { %vm2176_vm5 = vweird.f32 %v2160_v54  ;;  %v1491_v0 = vadd.f32 %v1490_v5, %v4819_v6  ;;  %v5340_v6 = vld [vmem:[%s5853_s23 + $0x18] sm:$0xff] }
 0x84d   : > { %v2183_v51 = vor.u32 1.1754944e-38, %v2182_v2  ;;  %v3784_v3 = vadd.f32 -1.0, %v2169_v49  ;;  %vm2181_vm7 = vcmp.eq.f32.partialorder %v2180_v9, 8.507059e+37  ;;  %v5333_v9 = vld [vmem:[%s5853_s23 + $0x10] sm:$0xff] }
 0x84e   : > { %v1492_v2 = vrot.slane %v1491_v0, 2 }
 0x851   : > { %v4087_v55 = vpop.eup %4086 }
 0x852   : > { %v2172_v13 = vmul.f32 %v4087_v55, %v2160_v54  ;;  %vm2177_vm4 = vweird.f32 %v4087_v55 }
 0x853   : > { %vm2178_vm6 = vmor %vm2176_vm5, %vm2177_vm4 }
 0x854   : > { %v2173_v1 = vsub.f32 1.0, %v2172_v13 }
 0x856   : > { %v2174_v40 = vmul.f32 %v4087_v55, %v2173_v1 }
 0x858   : > { %v2175_v16 = vadd.f32 %v4087_v55, %v2174_v40 }
 0x85a   : > { %v2179_v31 = vsel %vm2178_vm6, %v4087_v55, %v2175_v16  ;;  %v5325_v55 = vld [vmem:[%s5853_s23 + $0x8] sm:$0xff]  ;;  %v1493_v16 = vadd.f32 %v1492_v2, %v1491_v0 }
 0x85b   : > { %v2184_v47 = vsel %vm2181_vm7, %v2183_v51, %v2179_v31 }
 0x85c   : > { %v2185_v29 = vmul.f32 %v3784_v3, %v2184_v47  ;;  %v1494_v3 = vrot.slane %v1493_v16, 1 }
 0x85e   : > { %v2187_v63 = vsub.f32 %v5200_v37, %v2185_v29  ;;  %v2186_v59 = vsub.f32 %v5198_v15, %v2185_v29  ;;  %v5315_v15 = vld [vmem:[%s5853_s23] sm:$0xff]  ;;  %v1495_v47 = vadd.f32 %v1494_v3, %v1493_v16 }
 0x85f   : > { %v5357_v3 = vld [vmem:[%s5854_s5] sm:$0xff] }
 0x860   : > { %v5302_v35 = vmax.f32 %v2187_v63, 0.0  ;;  %v5304_v8 = vmax.f32 %v2186_v59, 0.0 }
 0x862   : > { %v2191_v4 = vadd.f32 1e-15, %v5302_v35  ;;  %v2211_v30 = vmul.f32 %v5302_v35, %v4518_v17  ;;  %v2190_v57 = vadd.f32 1e-15, %v5304_v8  ;;  %v2210_v12 = vmul.f32 %v5304_v8, %v4528_v23 }
 0x864   : > { %4088 = vlog2.f32 %v2191_v4  ;;  %2226 = vmatpush.msra.mxu2 %v2211_v30 }
 0x865   : > { %4090 = vlog2.f32 %v2190_v57 }
 0x866   : > { %2227 = vmatpush.msra.mxu2 %v2210_v12 }
 0x867   : > { %3785 = vmatmul.msk.f32.vlgmr.msra.gmra.mxu2 %vm774_vm0, %v5315_v15 }
 0x86a   : > { %v4089_v37 = vpop.eup %4088 }
 0x86b   : > { %v4091_v53 = vpop.eup %4090  ;;  %v2195_v62 = vmul.f32 0.6931472, %v4089_v37 }
 0x86c   : > { %v2193_v54 = vmul.f32 0.6931472, %v4091_v53 }
 0x86d   : > { %v2197_v56 = vmul.f32 %v2195_v62, %v5302_v35 }
 0x86e   : > { %v2196_v21 = vmul.f32 %v2193_v54, %v5304_v8 }
 0x86f   : > { %3786 = vmatmul.msk.f32.gmra.mxu2 %vm774_vm0, %v5325_v55 }
 0x870   : > { %v2198_v13 = vadd.f32 %v2197_v56, %v2196_v21 }
 0x872   : > { %v2199_v1 = vrot.slane %v2198_v13, 4 }
 0x874   : > { %v2200_v49 = vadd.f32 %v2199_v1, %v2198_v13 }
 0x876   : > { %v2201_v40 = vrot.slane %v2200_v49, 2 }
 0x877   : > { %3787 = vmatmul.msk.f32.gmra.mxu2 %vm774_vm0, %v5333_v9 }
 0x878   : > { %v2202_v51 = vadd.f32 %v2201_v40, %v2200_v49 }
 0x87a   : > { %v2203_v31 = vrot.slane %v2202_v51, 1 }
 0x87c   : > { %v2204_v29 = vadd.f32 %v2203_v31, %v2202_v51 }
 0x87e   : > { %v5344_v63 = vadd.f32 %v2204_v29, %v1495_v47 }
 0x87f   : > { %3788 = vmatmul.msk.f32.gmra.mxu2 %vm774_vm0, %v5340_v6 }
 0x8ea   : > { %v2229_v59 = vpop.f32.mrf.mxu2 }
 0x8f2   : > { %v2232_v4 = vpop.f32.mrf.mxu2 }
 0x8fa   : > { %v2235_v30 = vpop.f32.mrf.mxu2 }
 0x8fb   : > { %v2259_v57 = vmul.f32 %v5020_v34, %v2235_v30  ;;  %v2258_v34 = vmul.f32 %v5093_v25, %v2232_v4 }
 0x8fd   : > { %v2279_v12 = vadd.f32 %v5027_v38, %v2259_v57  ;;  %v2257_v38 = vmul.f32 %v5005_v18, %v2229_v59  ;;  %v2278_v40 = vadd.f32 %v5034_v46, %v2258_v34  ;;  %v5364_v18 = vld [vmem:[%s5854_s5 + $0x8] sm:$0xff]  ;;  %v5378_v46 = vld [vmem:[%s5854_s5 + $0x18] sm:$0xff] }
 0x8ff   : > { %v2281_v37 = vsub.f32 0.0, %v2279_v12 }
 0x901   : > { %v2283_v53 = vmul.f32 1.442695, %v2281_v37 }
 0x902   : > { %v2238_v62 = vpop.f32.mrf.mxu2 }
 0x903   : > { %v2260_v5 = vmul.f32 %v4993_v20, %v2238_v62  ;;  %4092 = vpow2.f32 %v2283_v53 }
 0x905   : > { %v2280_v54 = vadd.f32 %v4999_v24, %v2260_v5  ;;  %v2277_v24 = vadd.f32 %v5011_v22, %v2257_v38  ;;  %v5371_v22 = vld [vmem:[%s5854_s5 + $0x10] sm:$0xff] }
 0x907   : > { %v2282_v56 = vsub.f32 0.0, %v2280_v54 }
 0x909   : > { %v2285_v21 = vmul.f32 1.442695, %v2282_v56  ;;  %v4093_v0 = vpop.eup %4092 }
 0x90a   : > { %v2287_v13 = vadd.f32 1.0, %v4093_v0 }
 0x90b   : > { %4094 = vpow2.f32 %v2285_v21 }
 0x90c   : > { %4096 = vrcp.f32 %v2287_v13 }
 0x911   : > { %v4095_v1 = vpop.eup %4094 }
 0x912   : > { %v2288_v2 = vadd.f32 1.0, %v4095_v1  ;;  %v4097_v49 = vpop.eup %4096 }
 0x913   : > { %v2291_v51 = vmul.f32 %v4097_v49, %v2277_v24 }
 0x914   : > { %4098 = vrcp.f32 %v2288_v2 }
 0x91a   : > { %v4099_v20 = vpop.eup %4098 }
 0x91b   : > { %v2292_v16 = vmul.f32 %v4099_v20, %v2278_v40 }
 0x91d   : > { %2307 = vmatpush.msra.mxu3 %v2292_v16 }
 0x91f   : > { %2308 = vmatpush.msra.mxu3 %v2291_v51 }
 0x920   : > { %3789 = vmatmul.msk.f32.vlgmr.msra.gmra.mxu3 %vm774_vm0, %v5357_v3 }
 0x928   : > { %3790 = vmatmul.msk.f32.gmra.mxu3 %vm774_vm0, %v5364_v18 }
 0x930   : > { %3791 = vmatmul.msk.f32.gmra.mxu3 %vm774_vm0, %v5371_v22 }
 0x938   : > { %3792 = vmatmul.msk.f32.gmra.mxu3 %vm774_vm0, %v5378_v46 }
 0x9a3   : > { %v2310_v25 = vpop.f32.mrf.mxu3 }
 0x9ab   : > { %v2313_v31 = vpop.f32.mrf.mxu3 }
 0x9b3   : > { %v2316_v47 = vpop.f32.mrf.mxu3 }
 0x9b4   : > { %v2340_v29 = vmul.f32 %v5103_v58, %v2316_v47  ;;  %v2338_v58 = vmul.f32 %v5056_v14, %v2310_v25  ;;  %v3793_v14 = vld [vmem:[%s5855_s2 + $0x80] sm:$0xff] }
 0x9b6   : > { %v2360_v59 = vadd.f32 %v5048_v10, %v2340_v29  ;;  %v2339_v10 = vmul.f32 %v5025_v36, %v2313_v31  ;;  %v2358_v13 = vadd.f32 %v5036_v48, %v2338_v58  ;;  %v3794_v36 = vld [vmem:[%s5855_s2 + $0x88] sm:$0xff]  ;;  %v3795_v48 = vld [vmem:[%s5855_s2 + $0x90] sm:$0xff] }
 0x9b8   : > { %v2362_v4 = vsub.f32 0.0, %v2360_v59 }
 0x9ba   : > { %v2364_v30 = vmul.f32 1.442695, %v2362_v4 }
 0x9bb   : > { %v2319_v57 = vpop.f32.mrf.mxu3 }
 0x9bc   : > { %4100 = vpow2.f32 %v2364_v30  ;;  %v2341_v12 = vmul.f32 %v5042_v50, %v2319_v57  ;;  %v2359_v50 = vadd.f32 %v5109_v41, %v2339_v10  ;;  %v3796_v41 = vld [vmem:[%s5855_s2 + $0x98] sm:$0xff] }
 0x9be   : > { %v2361_v37 = vadd.f32 %v5018_v33, %v2341_v12 }
 0x9c0   : > { %v2363_v53 = vsub.f32 0.0, %v2361_v37 }
 0x9c2   : > { %v4101_v62 = vpop.eup %4100  ;;  %v2366_v5 = vmul.f32 1.442695, %v2363_v53 }
 0x9c3   : > { %v2368_v54 = vadd.f32 1.0, %v4101_v62 }
 0x9c4   : > { %4102 = vpow2.f32 %v2366_v5  ;;  %v4290_v5 = vmov 15  }
 0x9c5   : > { %4104 = vrcp.f32 %v2368_v54  ;;  %4012 = vset.pattern.permute.xlu2 %v4290_v5  ;;  %4013 = vset.pattern.permute.xlu0 %v4290_v5 }
 0x9c6   : > { %4016 = vset.pattern.permute.xlu1 %v4290_v5 }
 0x9ca   : > { %v4103_v56 = vpop.eup %4102 }
 0x9cb   : > { %v2369_v21 = vadd.f32 1.0, %v4103_v56  ;;  %v4105_v0 = vpop.eup %4104 }
 0x9cc   : > { %v2372_v1 = vmul.f32 %v4105_v0, %v2358_v13 }
 0x9cd   : > { %4106 = vrcp.f32 %v2369_v21 }
 0x9ce   : > { %v2374_v38 = vadd.f32 %v2372_v1, %v2291_v51  ;;  %v4177_v1 = vld [vmem:[%s5852_s25] sm:$0xff] }
 0x9d0   : > { %v2376_v40 = vmul.f32 0.70710677, %v2374_v38  ;;  %v3803_v38 = vld [vmem:[%s5855_s2 + $0xb0] sm:$0xff] }
 0x9d3   : > { %v4107_v33 = vpop.eup %4106 }
 0x9d4   : > { %v2373_v2 = vmul.f32 %v4107_v33, %v2359_v50  ;;  %v5892_v50 = vmov 11   ;;  %v5893_v33 = vmov 0  }
 0x9d6   : > { %v2375_v34 = vadd.f32 %v2373_v2, %v2292_v16 }
 0x9d8   : > { %v2377_v49 = vmul.f32 0.70710677, %v2375_v34  ;;  %v3802_v34 = vld [vmem:[%s5855_s2 + $0xa8] sm:$0xff] }
 0x9da   : > { %2409 = vmatpush.msrb.mxu0 %v2377_v49 }
 0x9dc   : > { %2410 = vmatpush.msrb.mxu0 %v2376_v40 }
 0x9dd   : > { %3797 = vmatmul.msk.f32.vlgmr.msrb.gmra.mxu0 %vm774_vm0, %v3793_v14 }
 0x9e5   : > { %3798 = vmatmul.msk.f32.gmra.mxu0 %vm774_vm0, %v3794_v36 }
 0x9ed   : > { %3799 = vmatmul.msk.f32.gmra.mxu0 %vm774_vm0, %v3795_v48 }
 0x9f5   : > { %3800 = vmatmul.msk.f32.gmra.mxu0 %vm774_vm0, %v3796_v41 }
 0xa5a   : > { %v2412_v20 = vpop.f32.mrf.mxu0 }
 0xa62   : > { %v2415_v24 = vpop.f32.mrf.mxu0 }
 0xa6a   : > { %v2418_v16 = vpop.f32.mrf.mxu0 }
 0xa6b   : > { %v2442_v51 = vmul.f32 %v5117_v26, %v2418_v16  ;;  %v2440_v26 = vmul.f32 %v5091_v27, %v2412_v20 }
 0xa6d   : > { %v2462_v25 = vadd.f32 %v5081_v52, %v2442_v51  ;;  %v2441_v52 = vmul.f32 %v5054_v19, %v2415_v24  ;;  %v2460_v56 = vadd.f32 %v5072_v32, %v2440_v26  ;;  %v4176_v19 = vld [vmem:[%s5851_s7] sm:$0xff] }
 0xa6e   : > { %3242 = vperm.xlu1 %4016, %v4176_v19  }
 0xa6f   : > { %v2464_v31 = vsub.f32 0.0, %v2462_v25  ;;  %v2461_v27 = vadd.f32 %v5123_v61, %v2441_v52  ;;  %v3801_v61 = vld [vmem:[%s5855_s2 + $0xa0] sm:$0xff] }
 0xa71   : > { %v2466_v47 = vmul.f32 1.442695, %v2464_v31 }
 0xa72   : > { %v2421_v29 = vpop.f32.mrf.mxu0 }
 0xa73   : > { %4108 = vpow2.f32 %v2466_v47  ;;  %v2443_v59 = vmul.f32 %v5075_v42, %v2421_v29  ;;  %v4175_v42 = vld [vmem:[%s5851_s7 + $0x10] sm:$0xff] }
 0xa74   : > { %3246 = vperm.xlu0 %4013, %v4175_v42  }
 0xa75   : > { %v2463_v4 = vadd.f32 %v5045_v7, %v2443_v59  ;;  %v4174_v7 = vld [vmem:[%s5852_s25 + $0x10] sm:$0xff] }
 0xa76   : > { %3236 = vperm.xlu2 %4012, %v4174_v7   ;;  %4019 = vset.pattern.permute.xlu1 %v5893_v33 }
 0xa77   : > { %v2465_v30 = vsub.f32 0.0, %v2463_v4 }
 0xa79   : > { %v4109_v57 = vpop.eup %4108  ;;  %v2468_v12 = vmul.f32 1.442695, %v2465_v30 }
 0xa7a   : > { %v2470_v37 = vadd.f32 1.0, %v4109_v57 }
 0xa7b   : > { %4110 = vpow2.f32 %v2468_v12 }
 0xa7c   : > { %4112 = vrcp.f32 %v2470_v37  ;;  %3232 = vperm.xlu0 %4013, %v4177_v1  }
 0xa7e   : > { %4015 = vset.pattern.permute.xlu2 %v5892_v50  ;;  %v5896_v50 = vld [vmem:[#allocation18_spill] sm:$0xff] }
 0xa7f   : > { %2527 = vperm.xlu2 %4015, %v4177_v1  }
 0xa81   : > { %v4111_v53 = vpop.eup %4110 }
 0xa82   : > { %v2471_v62 = vadd.f32 1.0, %v4111_v53  ;;  %v4113_v54 = vpop.eup %4112 }
 0xa83   : > { %v2474_v21 = vmul.f32 %v4113_v54, %v2460_v56 }
 0xa84   : > { %4114 = vrcp.f32 %v2471_v62  ;;  %4018 = vset.pattern.permute.xlu0 %v5893_v33 }
 0xa85   : > { %v2476_v13 = vadd.f32 %v2474_v21, %v2376_v40 }
 0xa87   : > { %v2478_v2 = vmul.f32 0.70710677, %v2476_v13  ;;  %2547 = vperm.xlu2 %4015, %v4176_v19  }
 0xa8a   : > { %v4115_v58 = vpop.eup %4114 }
 0xa8b   : > { %v2475_v10 = vmul.f32 %v4115_v58, %v2461_v27 }
 0xa8d   : > { %v2477_v0 = vadd.f32 %v2475_v10, %v2377_v49  ;;  %v3804_v49 = vld [vmem:[%s5855_s2 + $0xb8] sm:$0xff] }
 0xa8f   : > { %v2479_v32 = vmul.f32 0.70710677, %v2477_v0  ;;  %4017 = vset.pattern.permute.xlu2 %v5893_v33  ;;  %v3809_v0 = vld [vmem:[%s5858_s8 + $0x20] sm:$0xff]  ;;  %v2207_v33 = vsub.f32 1.3, %v5302_v35 }
 0xa91   : > { %2511 = vmatpush.msra.mxu1 %v2479_v32 }
 0xa93   : > { %2512 = vmatpush.msra.mxu1 %v2478_v2 }
 0xa94   : > { %3805 = vmatmul.msk.f32.vlgmr.msra.gmra.mxu1 %vm774_vm0, %v3801_v61  ;;  %v5897_v61 = vld [vmem:[#allocation30_spill] sm:$0xff] }
 0xa9c   : > { %3806 = vmatmul.msk.f32.gmra.mxu1 %vm774_vm0, %v3802_v34 }
 0xaa4   : > { %3807 = vmatmul.msk.f32.gmra.mxu1 %vm774_vm0, %v3803_v38  ;;  %v5898_v38 = vld [vmem:[#allocation22_spill] sm:$0xff] }
 0xaac   : > { %3808 = vmatmul.msk.f32.gmra.mxu1 %vm774_vm0, %v3804_v49 }
 0xad0   : > { %v5446_v36 = vpop.permute.xlu2 %3236 }
 0xad9   : > { %v2528_v31 = vpop.permute.xlu2 %2527 }
 0xae1   : > { %v2548_v12 = vpop.permute.xlu2 %2547 }
 0xb11   : > { %v2514_v40 = vpop.f32.mrf.mxu1 }
 0xb12   : > { %v2542_v57 = vmul.f32 %v2528_v31, %v2514_v40  ;;  %v5899_v40 = vld [vmem:[#allocation17_spill] sm:$0xff] }
 0xb14   : > { %v2562_v37 = vadd.f32 %v2548_v12, %v2542_v57 }
 0xb19   : > { %v2517_v14 = vpop.f32.mrf.mxu1 }
 0xb1a   : > { %v2543_v26 = vmul.f32 %v5085_v28, %v2517_v14  ;;  %v5900_v14 = vsub.f32 1.3, %v5899_v40 }
 0xb21   : > { %v2520_v48 = vpop.f32.mrf.mxu1 }
 0xb22   : > { %v2544_v41 = vmul.f32 %v5167_v43, %v2520_v48 }
 0xb24   : > { %v2564_v20 = vadd.f32 %v5171_v60, %v2544_v41  ;;  %v5901_v41 = vld [vmem:[#allocation16_spill] sm:$0xff] }
 0xb26   : > { %v2566_v24 = vsub.f32 0.0, %v2564_v20  ;;  %v5902_v20 = vsub.f32 1.3, %v5901_v41 }
 0xb28   : > { %v2568_v16 = vmul.f32 1.442695, %v2566_v24  ;;  %v2209_v24 = vmul.f32 %v2207_v33, %v5902_v20 }
 0xb29   : > { %v2523_v51 = vpop.f32.mrf.mxu1 }
 0xb2a   : > { %4116 = vpow2.f32 %v2568_v16  ;;  %v2545_v25 = vmul.f32 %v5101_v45, %v2523_v51  ;;  %v5894_v45 = vld [vmem:[#allocation47_spill] sm:$0xff] }
 0xb2b   : > { %v1867_v52 = vadd.f32 %v5894_v45, %v5064_v11  ;;  %v3810_v11 = vld [vmem:[%s5858_s8 + $0x28] sm:$0xff]  ;;  %s3889_s8 = sshll.u32 %s4427_s4, 1  ;;  %s4198_s4 = scalar_lea.hbm %s5798_s20, 16 }
 0xb2c   : > { %v2565_v47 = vadd.f32 %v5129_v44, %v2545_v25  ;;  %v5895_v44 = vld [vmem:[#allocation20_spill] sm:$0xff]  ;;  %v5903_v16 = vld [vmem:[#allocation19_spill] sm:$0xff]  ;;  %s3531_s9 = scalar_lea.hbm %s5799_s21, %s3889_s8 }
 0xb2d   : > { %v2563_v5 = vadd.f32 %v5895_v44, %v2543_v26  ;;  %v1869_v7 = vmul.f32 0.70710677, %v1867_v52 }
 0xb2e   : > { %v2567_v29 = vsub.f32 0.0, %v2565_v47 }
 0xb2f   : > { %v1871_v21 = vmax.f32 %v1869_v7, 0.0 }
 0xb30   : > { %v4117_v59 = vpop.eup %4116  ;;  %v2570_v4 = vmul.f32 1.442695, %v2567_v29 }
 0xb31   : > { %v2572_v30 = vadd.f32 1.0, %v4117_v59 }
 0xb32   : > { %4118 = vpow2.f32 %v2570_v4 }
 0xb33   : > { %4120 = vrcp.f32 %v2572_v30 }
 0xb38   : > { %v4119_v43 = vpop.eup %4118 }
 0xb39   : > { %v4121_v60 = vpop.eup %4120  ;;  %v2573_v53 = vadd.f32 1.0, %v4119_v43 }
 0xb3a   : > { %v2576_v62 = vmul.f32 %v4121_v60, %v2562_v37 }
 0xb3b   : > { %4122 = vrcp.f32 %v2573_v53 }
 0xb3c   : > { %v2578_v42 = vadd.f32 %v2576_v62, %v2478_v2 }
 0xb3e   : > { %v2580_v19 = vmul.f32 0.70710677, %v2578_v42 }
 0xb40   : > { %v2582_v58 = vmax.f32 %v2580_v19, 0.0 }
 0xb41   : > { %v4123_v54 = vpop.eup %4122 }
 0xb42   : > { %v2577_v56 = vmul.f32 %v4123_v54, %v2563_v5  ;;  %v5459_v13 = vadd.f32 %v2582_v58, %v1871_v21 }
 0xb44   : > { %v2579_v27 = vadd.f32 %v2577_v56, %v2479_v32  ;;  %v2206_v32 = vsub.f32 1.3, %v5304_v8 }
 0xb46   : > { %v2581_v10 = vmul.f32 0.70710677, %v2579_v27  ;;  %v2208_v48 = vmul.f32 %v2206_v32, %v5900_v14 }
 0xb48   : > { %2608 = vmatpush.msrb.mxu2 %v2581_v10 }
 0xb49   : > { %3811 = vmatmul.msk.f32.vlgmr.msrb.gmra.mxu2 %vm1160_vm1, %v3809_v0 }
 0xb51   : > { %3812 = vmatmul.msk.f32.gmra.mxu2 %vm1160_vm1, %v3810_v11 }
 0xbcc   : > { %v2610_v28 = vpop.f32.mrf.mxu2 }
 0xbcd   : > { %v2624_v1 = vmul.f32 %v5896_v50, %v2610_v28 }
 0xbcf   : > { %v2634_v34 = vadd.f32 %v5897_v61, %v2624_v1 }
 0xbd1   : > { %v2636_v25 = vmul.f32 %v2634_v34, %v2208_v48 }
 0xbd4   : > { %v2613_v2 = vpop.f32.mrf.mxu2 }
 0xbd5   : > { %v2625_v49 = vmul.f32 %v5898_v38, %v2613_v2 }
 0xbd7   : > { %v2635_v51 = vadd.f32 %v5903_v16, %v2625_v49 }
 0xbd9   : > { %v2637_v31 = vmul.f32 %v2635_v51, %v2209_v24 }
 0xbdb   : > { %v2638_v47 = vmax.f32 %v2636_v25, %v2637_v31 }
 0xbdd   : > { %v2639_v29 = vrot.slane %v2638_v47, 4 }
 0xbdf   : > { %v2640_v8 = vmax.f32 %v2638_v47, %v2639_v29 }
 0xbe1   : > { %v2641_v59 = vrot.slane %v2640_v8, 2 }
 0xbe3   : > { %v2642_v35 = vmax.f32 %v2640_v8, %v2641_v59 }
 0xbe5   : > { %v2643_v4 = vrot.slane %v2642_v35, 1 }
 0xbe7   : > { %v2644_v30 = vmax.f32 %v2642_v35, %v2643_v4 }
 0xbe9   : > { %v5476_v57 = vsub.f32 %v2636_v25, %v2644_v30  ;;  %v5478_v12 = vsub.f32 %v2637_v31, %v2644_v30 }
 0xbeb   : > { %v2647_v43 = vperm.slane %v5476_v57, 0  ;;  %v2660_v37 = vperm.slane %v5476_v57, 1  ;;  %v2673_v60 = vperm.slane %v5476_v57, 2  ;;  %v2686_v53 = vperm.slane %v5476_v57, 3 }
 0xbec   : > { %v2699_v62 = vperm.slane %v5476_v57, 4  ;;  %v2712_v26 = vperm.slane %v5476_v57, 5  ;;  %v5487_v45 = vperm.slane %v5476_v57, 6  ;;  %v5490_v52 = vperm.slane %v5476_v57, 7 }
 0xbed   : > { %vm2648_vm8 = vcmp.ge.f32.partialorder %v2647_v43, %v5476_v57  ;;  %vm2649_vm9 = vcmp.ge.f32.partialorder %v2647_v43, %v5478_v12  ;;  %vm2661_vm10 = vcmp.ge.f32.partialorder %v2660_v37, %v5476_v57  ;;  %vm2662_vm11 = vcmp.ge.f32.partialorder %v2660_v37, %v5478_v12 }
 0xbee   : > { %v3813_v44 = vsel %vm2648_vm8, 1.0, %v5891_v39  ;;  %v3814_v5 = vsel %vm2649_vm9, 1.0, %v5891_v39  ;;  %v3815_v54 = vsel %vm2661_vm10, 1.0, %v5891_v39  ;;  %v3816_v7 = vsel %vm2662_vm11, 1.0, %v5891_v39 }
 0xbef   : > { %v2656_v42 = vmul.f32 %v3813_v44, %v2647_v43  ;;  %v2657_v56 = vmul.f32 %v3814_v5, %v2647_v43  ;;  %v2667_v19 = vadd.f32 %v3815_v54, %v3813_v44  ;;  %v2668_v27 = vadd.f32 %v3816_v7, %v3814_v5 }
 0xbf0   : > { %v2669_v21 = vmul.f32 %v3815_v54, %v2660_v37  ;;  %v2670_v58 = vmul.f32 %v3816_v7, %v2660_v37  ;;  %vm2674_vm12 = vcmp.ge.f32.partialorder %v2673_v60, %v5476_v57  ;;  %vm2675_vm13 = vcmp.ge.f32.partialorder %v2673_v60, %v5478_v12 }
 0xbf1   : > { %v3817_v10 = vsel %vm2674_vm12, 1.0, %v5891_v39  ;;  %v3818_v0 = vsel %vm2675_vm13, 1.0, %v5891_v39  ;;  %vm2687_vm14 = vcmp.ge.f32.partialorder %v2686_v53, %v5476_v57  ;;  %vm2688_vm15 = vcmp.ge.f32.partialorder %v2686_v53, %v5478_v12 }
 0xbf2   : > { %v2671_v11 = vadd.f32 %v2669_v21, %v2656_v42  ;;  %v2672_v28 = vadd.f32 %v2670_v58, %v2657_v56  ;;  %v2680_v50 = vadd.f32 %v3817_v10, %v2667_v19  ;;  %v2681_v1 = vadd.f32 %v3818_v0, %v2668_v27 }
 0xbf3   : > { %v2682_v32 = vmul.f32 %v3817_v10, %v2673_v60  ;;  %v2683_v33 = vmul.f32 %v3818_v0, %v2673_v60  ;;  %v3819_v2 = vsel %vm2687_vm14, 1.0, %v5891_v39  ;;  %v3820_v61 = vsel %vm2688_vm15, 1.0, %v5891_v39 }
 0xbf4   : > { %v2693_v34 = vadd.f32 %v3819_v2, %v2680_v50  ;;  %v2694_v38 = vadd.f32 %v3820_v61, %v2681_v1  ;;  %v2695_v49 = vmul.f32 %v3819_v2, %v2686_v53  ;;  %v2696_v40 = vmul.f32 %v3820_v61, %v2686_v53 }
 0xbf5   : > { %v2684_v14 = vadd.f32 %v2682_v32, %v2671_v11  ;;  %v2685_v48 = vadd.f32 %v2683_v33, %v2672_v28  ;;  %vm2700_vm2 = vcmp.ge.f32.partialorder %v2699_v62, %v5476_v57  ;;  %vm2701_vm3 = vcmp.ge.f32.partialorder %v2699_v62, %v5478_v12 }
 0xbf6   : > { %v3821_v41 = vsel %vm2700_vm2, 1.0, %v5891_v39  ;;  %v3822_v20 = vsel %vm2701_vm3, 1.0, %v5891_v39  ;;  %vm2713_vm4 = vcmp.ge.f32.partialorder %v2712_v26, %v5476_v57  ;;  %vm2714_vm5 = vcmp.ge.f32.partialorder %v2712_v26, %v5478_v12 }
 0xbf7   : > { %v2697_v24 = vadd.f32 %v2695_v49, %v2684_v14  ;;  %v2698_v16 = vadd.f32 %v2696_v40, %v2685_v48  ;;  %v2706_v51 = vadd.f32 %v3821_v41, %v2693_v34  ;;  %v2707_v25 = vadd.f32 %v3822_v20, %v2694_v38 }
 0xbf8   : > { %v2708_v31 = vmul.f32 %v3821_v41, %v2699_v62  ;;  %v2709_v47 = vmul.f32 %v3822_v20, %v2699_v62  ;;  %v3823_v29 = vsel %vm2713_vm4, 1.0, %v5891_v39  ;;  %v3824_v8 = vsel %vm2714_vm5, 1.0, %v5891_v39 }
 0xbf9   : > { %v2719_v59 = vadd.f32 %v3823_v29, %v2706_v51  ;;  %v2720_v35 = vadd.f32 %v3824_v8, %v2707_v25  ;;  %v2721_v4 = vmul.f32 %v3823_v29, %v2712_v26  ;;  %v2722_v30 = vmul.f32 %v3824_v8, %v2712_v26 }
 0xbfa   : > { %v2710_v43 = vadd.f32 %v2708_v31, %v2697_v24  ;;  %v2711_v37 = vadd.f32 %v2709_v47, %v2698_v16  ;;  %vm2726_vm6 = vcmp.ge.f32.partialorder %v5487_v45, %v5476_v57  ;;  %vm2727_vm7 = vcmp.ge.f32.partialorder %v5487_v45, %v5478_v12 }
 0xbfb   : > { %v3825_v60 = vsel %vm2726_vm6, 1.0, %v5891_v39  ;;  %v3826_v53 = vsel %vm2727_vm7, 1.0, %v5891_v39  ;;  %vm2739_vm8 = vcmp.ge.f32.partialorder %v5490_v52, %v5476_v57  ;;  %vm2740_vm9 = vcmp.ge.f32.partialorder %v5490_v52, %v5478_v12 }
 0xbfc   : > { %v2723_v62 = vadd.f32 %v2721_v4, %v2710_v43  ;;  %v2724_v26 = vadd.f32 %v2722_v30, %v2711_v37  ;;  %v2732_v44 = vadd.f32 %v3825_v60, %v2719_v59  ;;  %v2733_v5 = vadd.f32 %v3826_v53, %v2720_v35 }
 0xbfd   : > { %v2734_v54 = vmul.f32 %v3825_v60, %v5487_v45  ;;  %v2735_v7 = vmul.f32 %v3826_v53, %v5487_v45  ;;  %v3827_v42 = vsel %vm2739_vm8, 1.0, %v5891_v39  ;;  %v3828_v56 = vsel %vm2740_vm9, 1.0, %v5891_v39 }
 0xbfe   : > { %v2745_v19 = vadd.f32 %v3827_v42, %v2732_v44  ;;  %v2746_v27 = vadd.f32 %v3828_v56, %v2733_v5  ;;  %v2747_v21 = vmul.f32 %v3827_v42, %v5490_v52  ;;  %v2748_v58 = vmul.f32 %v3828_v56, %v5490_v52 }
 0xbff   : > { %v2736_v10 = vadd.f32 %v2734_v54, %v2723_v62  ;;  %v2737_v0 = vadd.f32 %v2735_v7, %v2724_v26  ;;  %v2751_v11 = vperm.slane %v5478_v12, 0  ;;  %v2764_v28 = vperm.slane %v5478_v12, 1 }
 0xc00   : > { %v2777_v50 = vperm.slane %v5478_v12, 2  ;;  %v2790_v45 = vperm.slane %v5478_v12, 3  ;;  %v2803_v1 = vperm.slane %v5478_v12, 4  ;;  %v2816_v32 = vperm.slane %v5478_v12, 5 }
 0xc01   : > { %v2749_v33 = vadd.f32 %v2747_v21, %v2736_v10  ;;  %v2750_v2 = vadd.f32 %v2748_v58, %v2737_v0  ;;  %vm2752_vm10 = vcmp.ge.f32.partialorder %v2751_v11, %v5476_v57  ;;  %vm2753_vm11 = vcmp.ge.f32.partialorder %v2751_v11, %v5478_v12 }
 0xc02   : > { %v3829_v52 = vsel %vm2752_vm10, 1.0, %v5891_v39  ;;  %v3830_v61 = vsel %vm2753_vm11, 1.0, %v5891_v39  ;;  %vm2765_vm12 = vcmp.ge.f32.partialorder %v2764_v28, %v5476_v57  ;;  %vm2766_vm13 = vcmp.ge.f32.partialorder %v2764_v28, %v5478_v12 }
 0xc03   : > { %v2758_v34 = vadd.f32 %v3829_v52, %v2745_v19  ;;  %v2759_v38 = vadd.f32 %v3830_v61, %v2746_v27  ;;  %v2760_v49 = vmul.f32 %v3829_v52, %v2751_v11  ;;  %v2761_v40 = vmul.f32 %v3830_v61, %v2751_v11 }
 0xc04   : > { %v3831_v14 = vsel %vm2765_vm12, 1.0, %v5891_v39  ;;  %v3832_v48 = vsel %vm2766_vm13, 1.0, %v5891_v39  ;;  %vm2778_vm14 = vcmp.ge.f32.partialorder %v2777_v50, %v5476_v57  ;;  %vm2779_vm15 = vcmp.ge.f32.partialorder %v2777_v50, %v5478_v12 }
 0xc05   : > { %v2762_v41 = vadd.f32 %v2760_v49, %v2749_v33  ;;  %v2763_v20 = vadd.f32 %v2761_v40, %v2750_v2  ;;  %v2771_v24 = vadd.f32 %v3831_v14, %v2758_v34  ;;  %v2772_v16 = vadd.f32 %v3832_v48, %v2759_v38 }
 0xc06   : > { %v2773_v51 = vmul.f32 %v3831_v14, %v2764_v28  ;;  %v2774_v25 = vmul.f32 %v3832_v48, %v2764_v28  ;;  %v3833_v31 = vsel %vm2778_vm14, 1.0, %v5891_v39  ;;  %v3834_v47 = vsel %vm2779_vm15, 1.0, %v5891_v39 }
 0xc07   : > { %v2784_v29 = vadd.f32 %v3833_v31, %v2771_v24  ;;  %v2785_v8 = vadd.f32 %v3834_v47, %v2772_v16  ;;  %v2786_v59 = vmul.f32 %v3833_v31, %v2777_v50  ;;  %v2787_v35 = vmul.f32 %v3834_v47, %v2777_v50 }
 0xc08   : > { %v2775_v4 = vadd.f32 %v2773_v51, %v2762_v41  ;;  %v2776_v30 = vadd.f32 %v2774_v25, %v2763_v20  ;;  %vm2791_vm2 = vcmp.ge.f32.partialorder %v2790_v45, %v5476_v57  ;;  %vm2792_vm3 = vcmp.ge.f32.partialorder %v2790_v45, %v5478_v12 }
 0xc09   : > { %v3835_v43 = vsel %vm2791_vm2, 1.0, %v5891_v39  ;;  %v3836_v37 = vsel %vm2792_vm3, 1.0, %v5891_v39  ;;  %vm2804_vm4 = vcmp.ge.f32.partialorder %v2803_v1, %v5476_v57  ;;  %vm2805_vm5 = vcmp.ge.f32.partialorder %v2803_v1, %v5478_v12 }
 0xc0a   : > { %v2788_v60 = vadd.f32 %v2786_v59, %v2775_v4  ;;  %v2789_v53 = vadd.f32 %v2787_v35, %v2776_v30  ;;  %v2797_v62 = vadd.f32 %v3835_v43, %v2784_v29  ;;  %v2798_v26 = vadd.f32 %v3836_v37, %v2785_v8 }
 0xc0b   : > { %v2799_v44 = vmul.f32 %v3835_v43, %v2790_v45  ;;  %v2800_v5 = vmul.f32 %v3836_v37, %v2790_v45  ;;  %v3837_v54 = vsel %vm2804_vm4, 1.0, %v5891_v39  ;;  %v3838_v7 = vsel %vm2805_vm5, 1.0, %v5891_v39 }
 0xc0c   : > { %v2810_v42 = vadd.f32 %v3837_v54, %v2797_v62  ;;  %v2811_v56 = vadd.f32 %v3838_v7, %v2798_v26  ;;  %v2812_v19 = vmul.f32 %v3837_v54, %v2803_v1  ;;  %v2813_v27 = vmul.f32 %v3838_v7, %v2803_v1 }
 0xc0d   : > { %v2801_v21 = vadd.f32 %v2799_v44, %v2788_v60  ;;  %v2802_v58 = vadd.f32 %v2800_v5, %v2789_v53  ;;  %vm2817_vm6 = vcmp.ge.f32.partialorder %v2816_v32, %v5476_v57  ;;  %vm2818_vm7 = vcmp.ge.f32.partialorder %v2816_v32, %v5478_v12 }
 0xc0e   : > { %v3839_v10 = vsel %vm2817_vm6, 1.0, %v5891_v39  ;;  %v3840_v0 = vsel %vm2818_vm7, 1.0, %v5891_v39  ;;  %v2829_v11 = vperm.slane %v5478_v12, 6  ;;  %v2842_v28 = vperm.slane %v5478_v12, 7 }
 0xc0f   : > { %v2814_v50 = vadd.f32 %v2812_v19, %v2801_v21  ;;  %v2815_v45 = vadd.f32 %v2813_v27, %v2802_v58  ;;  %v2823_v33 = vadd.f32 %v3839_v10, %v2810_v42  ;;  %v2824_v2 = vadd.f32 %v3840_v0, %v2811_v56 }
 0xc10   : > { %v2825_v52 = vmul.f32 %v3839_v10, %v2816_v32  ;;  %v2826_v1 = vmul.f32 %v3840_v0, %v2816_v32  ;;  %vm2830_vm8 = vcmp.ge.f32.partialorder %v2829_v11, %v5476_v57  ;;  %vm2831_vm9 = vcmp.ge.f32.partialorder %v2829_v11, %v5478_v12 }
 0xc11   : > { %v3841_v61 = vsel %vm2830_vm8, 1.0, %v5891_v39  ;;  %v3842_v34 = vsel %vm2831_vm9, 1.0, %v5891_v39  ;;  %vm2843_vm10 = vcmp.ge.f32.partialorder %v2842_v28, %v5476_v57  ;;  %vm2844_vm11 = vcmp.ge.f32.partialorder %v2842_v28, %v5478_v12 }
 0xc12   : > { %v2827_v38 = vadd.f32 %v2825_v52, %v2814_v50  ;;  %v2828_v49 = vadd.f32 %v2826_v1, %v2815_v45  ;;  %v2836_v40 = vadd.f32 %v3841_v61, %v2823_v33  ;;  %v2837_v14 = vadd.f32 %v3842_v34, %v2824_v2 }
 0xc13   : > { %v2838_v48 = vmul.f32 %v3841_v61, %v2829_v11  ;;  %v2839_v41 = vmul.f32 %v3842_v34, %v2829_v11  ;;  %v3843_v32 = vsel %vm2843_vm10, 1.0, %v5891_v39  ;;  %v3844_v20 = vsel %vm2844_vm11, 1.0, %v5891_v39 }
 0xc14   : > { %v2849_v24 = vadd.f32 %v3843_v32, %v2836_v40  ;;  %v2850_v16 = vadd.f32 %v3844_v20, %v2837_v14  ;;  %v2851_v31 = vmul.f32 %v3843_v32, %v2842_v28  ;;  %v2852_v47 = vmul.f32 %v3844_v20, %v2842_v28 }
 0xc15   : > { %v2840_v51 = vadd.f32 %v2838_v48, %v2827_v38  ;;  %v2841_v25 = vadd.f32 %v2839_v41, %v2828_v49  ;;  %vm3436_vm4 = vcmask 1041408   ;;  %vm3472_vm5 = vcmask 1046528  }
 0xc16   : > { %v2855_v29 = vmul.f32 %v2849_v24, %v5476_v57  ;;  %v2856_v8 = vmul.f32 %v2850_v16, %v5478_v12  ;;  %vm3468_vm6 = vcmask 121856  }
 0xc17   : > { %v2853_v59 = vadd.f32 %v2851_v31, %v2840_v51  ;;  %v2854_v35 = vadd.f32 %v2852_v47, %v2841_v25 }
 0xc18   : > { %v2857_v4 = vadd.f32 1.0, %v2855_v29  ;;  %v2858_v30 = vadd.f32 1.0, %v2856_v8 }
 0xc1a   : > { %vm2859_vm12 = vcmp.gt.f32.partialorder %v2857_v4, %v2853_v59  ;;  %vm2860_vm13 = vcmp.gt.f32.partialorder %v2858_v30, %v2854_v35 }
 0xc1b   : > { %v3845_v43 = vsel %vm2859_vm12, 1.0, %v5891_v39  ;;  %v3846_v37 = vsel %vm2860_vm13, 1.0, %v5891_v39 }
 0xc1c   : > { %v2865_v60 = vadd.f32 %v3846_v37, %v3845_v43  ;;  %v2872_v53 = vmul.f32 %v3845_v43, %v5476_v57  ;;  %v2873_v62 = vmul.f32 %v3846_v37, %v5478_v12  ;;  %v5904_v43 = vld [vmem:[#allocation21_spill] sm:$0xff] }
 0xc1e   : > { %v2866_v26 = vrot.slane %v2865_v60, 4  ;;  %v2874_v44 = vadd.f32 %v2873_v62, %v2872_v53 }
 0xc20   : > { %v2867_v5 = vadd.f32 %v2866_v26, %v2865_v60  ;;  %v2875_v54 = vrot.slane %v2874_v44, 4 }
 0xc22   : > { %v2868_v7 = vrot.slane %v2867_v5, 2  ;;  %v2876_v56 = vadd.f32 %v2875_v54, %v2874_v44  ;;  %v5906_v44 = vld [vmem:[#allocation23_spill] sm:$0xff]  ;;  %v5907_v54 = vld [vmem:[#allocation25_spill] sm:$0xff] }
 0xc24   : > { %v2869_v42 = vadd.f32 %v2868_v7, %v2867_v5  ;;  %v2877_v21 = vrot.slane %v2876_v56, 2 }
 0xc26   : > { %v2870_v19 = vrot.slane %v2869_v42, 1  ;;  %v2878_v58 = vadd.f32 %v2877_v21, %v2876_v56  ;;  %v5908_v21 = vld [vmem:[#allocation24_spill] sm:$0xff] }
 0xc28   : > { %v2871_v27 = vadd.f32 %v2870_v19, %v2869_v42  ;;  %v2879_v0 = vrot.slane %v2878_v58, 1 }
 0xc2a   : > { %4124 = vrcp.f32 %v2871_v27  ;;  %v2893_v28 = vand.u32 2147483648, %v2871_v27  ;;  %v2880_v50 = vadd.f32 %v2879_v0, %v2878_v58  ;;  %v2891_v33 = vand.u32 2147483647, %v2871_v27 }
 0xc2b   : > { %vm2887_vm15 = vweird.f32 %v2871_v27 }
 0xc2c   : > { %v2894_v52 = vor.u32 1.1754944e-38, %v2893_v28  ;;  %v3847_v1 = vadd.f32 -1.0, %v2880_v50  ;;  %vm2892_vm3 = vcmp.eq.f32.partialorder %v2891_v33, 8.507059e+37 }
 0xc30   : > { %v4125_v10 = vpop.eup %4124 }
 0xc31   : > { %v2883_v39 = vmul.f32 %v4125_v10, %v2871_v27  ;;  %vm2888_vm14 = vweird.f32 %v4125_v10 }
 0xc32   : > { %vm2889_vm2 = vmor %vm2887_vm15, %vm2888_vm14 }
 0xc33   : > { %v2884_v11 = vsub.f32 1.0, %v2883_v39 }
 0xc35   : > { %v2885_v45 = vmul.f32 %v4125_v10, %v2884_v11  ;;  %v5910_v11 = vld [vmem:[#allocation26_spill] sm:$0xff] }
 0xc37   : > { %v2886_v2 = vadd.f32 %v4125_v10, %v2885_v45  ;;  %v5911_v45 = vld [vmem:[#allocation29_spill] sm:$0xff] }
 0xc39   : > { %v2890_v61 = vsel %vm2889_vm2, %v4125_v10, %v2886_v2  ;;  %v5909_v10 = vld [vmem:[#allocation27_spill] sm:$0xff] }
 0xc3a   : > { %v2895_v34 = vsel %vm2892_vm3, %v2894_v52, %v2890_v61 }
 0xc3b   : > { %v2896_v38 = vmul.f32 %v3847_v1, %v2895_v34 }
 0xc3d   : > { %v2898_v49 = vsub.f32 %v5478_v12, %v2896_v38  ;;  %v2897_v40 = vsub.f32 %v5476_v57, %v2896_v38  ;;  %v5912_v38 = vld [vmem:[#allocation28_spill] sm:$0xff] }
 0xc3f   : > { %v2900_v14 = vmax.f32 %v2898_v49, 0.0  ;;  %v2899_v48 = vmax.f32 %v2897_v40, 0.0  ;;  %v5913_v40 = vld [vmem:[#allocation31_spill] sm:$0xff] }
 0xc41   : > { %v2902_v41 = vadd.f32 1e-15, %v2900_v14  ;;  %v2918_v32 = vmul.f32 %v2900_v14, %v4518_v17  ;;  %v2901_v20 = vadd.f32 1e-15, %v2899_v48  ;;  %v2917_v24 = vmul.f32 %v2899_v48, %v4528_v23 }
 0xc43   : > { %4126 = vlog2.f32 %v2902_v41  ;;  %2933 = vmatpush.msrb.mxu3 %v2918_v32 }
 0xc44   : > { %4128 = vlog2.f32 %v2901_v20 }
 0xc45   : > { %2934 = vmatpush.msrb.mxu3 %v2917_v24 }
 0xc46   : > { %3848 = vmatmul.msk.f32.vlgmr.msrb.gmra.mxu3 %vm774_vm0, %v5315_v15 }
 0xc49   : > { %v4127_v12 = vpop.eup %4126 }
 0xc4a   : > { %v4129_v16 = vpop.eup %4128  ;;  %v2906_v57 = vmul.f32 0.6931472, %v4127_v12 }
 0xc4b   : > { %v2904_v51 = vmul.f32 0.6931472, %v4129_v16 }
 0xc4c   : > { %v2908_v25 = vmul.f32 %v2906_v57, %v2900_v14 }
 0xc4d   : > { %v2907_v31 = vmul.f32 %v2904_v51, %v2899_v48 }
 0xc4e   : > { %3849 = vmatmul.msk.f32.gmra.mxu3 %vm774_vm0, %v5325_v55 }
 0xc4f   : > { %v2909_v17 = vadd.f32 %v2908_v25, %v2907_v31  ;;  %v5916_v25 = vld [vmem:[#allocation39_spill] sm:$0xff] }
 0xc51   : > { %v2910_v47 = vrot.slane %v2909_v17, 4 }
 0xc53   : > { %v2911_v29 = vadd.f32 %v2910_v47, %v2909_v17  ;;  %v5917_v17 = vld [vmem:[#allocation35_spill] sm:$0xff] }
 0xc55   : > { %v2912_v23 = vrot.slane %v2911_v29, 2 }
 0xc56   : > { %3850 = vmatmul.msk.f32.gmra.mxu3 %vm774_vm0, %v5333_v9  ;;  %v5905_v9 = vld [vmem:[#allocation33_spill] sm:$0xff] }
 0xc57   : > { %v2913_v8 = vadd.f32 %v2912_v23, %v2911_v29  ;;  %v5918_v23 = vld [vmem:[#allocation38_spill] sm:$0xff] }
 0xc59   : > { %v2914_v15 = vrot.slane %v2913_v8, 1 }
 0xc5b   : > { %v2915_v59 = vadd.f32 %v2914_v15, %v2913_v8  ;;  %v5919_v15 = vld [vmem:[#allocation34_spill] sm:$0xff] }
 0xc5d   : > { %v2916_v35 = vadd.f32 %v2915_v59, %v5344_v63 }
 0xc5e   : > { %3851 = vmatmul.msk.f32.gmra.mxu3 %vm774_vm0, %v5340_v6 }
 0xc5f   : > { %3497 = vst [vmem:[%s739_s27] sm:$0x1] %v2916_v35  ;;  %s724_s27 = scalar_lea.vmem [#allocation3], %s3663_s1 }
 0xc60   : > { %s3519_s28 = sshll.u32 %s724_s27, 4  ;;  %s3520_s28 = int_to_ptr.vmem [resolvable:$true] %s3519_s28 }
 0xcc9   : > { %v2936_v55 = vpop.f32.mrf.mxu3 }
 0xcca   : > { %v2964_v0 = vmul.f32 %v5909_v10, %v2936_v55  ;;  %v5923_v10 = vld [vmem:[#allocation41_spill] sm:$0xff] }
 0xccc   : > { %v2984_v33 = vadd.f32 %v5911_v45, %v2964_v0 }
 0xcd1   : > { %v2939_v4 = vpop.f32.mrf.mxu3 }
 0xcd2   : > { %v2965_v58 = vmul.f32 %v5908_v21, %v2939_v4  ;;  %v5922_v21 = vld [vmem:[#allocation42_spill] sm:$0xff] }
 0xcd4   : > { %v2985_v28 = vadd.f32 %v5910_v11, %v2965_v58 }
 0xcd9   : > { %v2942_v30 = vpop.f32.mrf.mxu3 }
 0xcda   : > { %v2966_v37 = vmul.f32 %v5904_v43, %v2942_v30 }
 0xcdc   : > { %v2986_v60 = vadd.f32 %v5905_v9, %v2966_v37 }
 0xcde   : > { %v2988_v53 = vsub.f32 0.0, %v2986_v60  ;;  %v3856_v60 = vld [vmem:[%s5855_s2 + $0xc0] sm:$0xff] }
 0xce0   : > { %v2990_v62 = vmul.f32 1.442695, %v2988_v53  ;;  %v3857_v53 = vld [vmem:[%s5855_s2 + $0xc8] sm:$0xff] }
 0xce1   : > { %v2945_v26 = vpop.f32.mrf.mxu3 }
 0xce2   : > { %v2967_v5 = vmul.f32 %v5906_v44, %v2945_v26  ;;  %4130 = vpow2.f32 %v2990_v62  ;;  %v3858_v62 = vld [vmem:[%s5855_s2 + $0xd0] sm:$0xff]  ;;  %v3859_v26 = vld [vmem:[%s5855_s2 + $0xd8] sm:$0xff] }
 0xce4   : > { %v2987_v7 = vadd.f32 %v5907_v54, %v2967_v5 }
 0xce6   : > { %v2989_v63 = vsub.f32 0.0, %v2987_v7  ;;  %v5920_v7 = vld [vmem:[#allocation37_spill] sm:$0xff] }
 0xce8   : > { %v2992_v42 = vmul.f32 1.442695, %v2989_v63  ;;  %v4131_v6 = vpop.eup %4130 }
 0xce9   : > { %v2994_v56 = vadd.f32 1.0, %v4131_v6 }
 0xcea   : > { %4132 = vpow2.f32 %v2992_v42  ;;  %v5921_v42 = vld [vmem:[#allocation40_spill] sm:$0xff] }
 0xceb   : > { %4134 = vrcp.f32 %v2994_v56 }
 0xcf0   : > { %v4133_v19 = vpop.eup %4132 }
 0xcf1   : > { %v2995_v27 = vadd.f32 1.0, %v4133_v19  ;;  %v4135_v39 = vpop.eup %4134 }
 0xcf2   : > { %v2998_v52 = vmul.f32 %v4135_v39, %v2984_v33 }
 0xcf3   : > { %4136 = vrcp.f32 %v2995_v27 }
 0xcf9   : > { %v4137_v50 = vpop.eup %4136 }
 0xcfa   : > { %v2999_v2 = vmul.f32 %v4137_v50, %v2985_v28 }
 0xcfc   : > { %3014 = vmatpush.msra.mxu0 %v2999_v2 }
 0xcfe   : > { %3015 = vmatpush.msra.mxu0 %v2998_v52 }
 0xcff   : > { %3852 = vmatmul.msk.f32.vlgmr.msra.gmra.mxu0 %vm774_vm0, %v5357_v3  ;;  %v5914_v3 = vld [vmem:[#allocation36_spill] sm:$0xff] }
 0xd07   : > { %3853 = vmatmul.msk.f32.gmra.mxu0 %vm774_vm0, %v5364_v18  ;;  %v5915_v18 = vld [vmem:[#allocation32_spill] sm:$0xff] }
 0xd0f   : > { %3854 = vmatmul.msk.f32.gmra.mxu0 %vm774_vm0, %v5371_v22 }
 0xd17   : > { %3855 = vmatmul.msk.f32.gmra.mxu0 %vm774_vm0, %v5378_v46 }
 0xd7c   : > { %v3017_v1 = vpop.f32.mrf.mxu0 }
 0xd7d   : > { %v3045_v31 = vmul.f32 %v5916_v25, %v3017_v1  ;;  %v5925_v1 = vld [vmem:[#allocation44_spill] sm:$0xff] }
 0xd7f   : > { %v3065_v8 = vadd.f32 %v5918_v23, %v3045_v31  ;;  %v3247_v31 = vpop.permute.xlu0 %3246 }
 0xd84   : > { %v3020_v61 = vpop.f32.mrf.mxu0 }
 0xd85   : > { %v3046_v47 = vmul.f32 %v5917_v17, %v3020_v61 }
 0xd87   : > { %v3066_v59 = vadd.f32 %v5919_v15, %v3046_v47 }
 0xd8c   : > { %v3023_v34 = vpop.f32.mrf.mxu0 }
 0xd8d   : > { %v3047_v49 = vmul.f32 %v5912_v38, %v3023_v34  ;;  %v5926_v38 = vld [vmem:[#allocation46_spill] sm:$0xff] }
 0xd8f   : > { %v3067_v14 = vadd.f32 %v5913_v40, %v3047_v49  ;;  %v5927_v40 = vld [vmem:[#allocation43_spill] sm:$0xff] }
 0xd91   : > { %v3069_v48 = vsub.f32 0.0, %v3067_v14 }
 0xd93   : > { %v3071_v41 = vmul.f32 1.442695, %v3069_v48 }
 0xd94   : > { %v3026_v32 = vpop.f32.mrf.mxu0 }
 0xd95   : > { %4138 = vpow2.f32 %v3071_v41  ;;  %v3048_v20 = vmul.f32 %v5914_v3, %v3026_v32 }
 0xd97   : > { %v3068_v24 = vadd.f32 %v5915_v18, %v3048_v20 }
 0xd99   : > { %v3070_v12 = vsub.f32 0.0, %v3068_v24 }
 0xd9b   : > { %v4139_v22 = vpop.eup %4138  ;;  %v3073_v16 = vmul.f32 1.442695, %v3070_v12  ;;  %v3864_v12 = vld [vmem:[%s5855_s2 + $0xe0] sm:$0xff] }
 0xd9c   : > { %v3075_v46 = vadd.f32 1.0, %v4139_v22  ;;  %v3865_v22 = vld [vmem:[%s5855_s2 + $0xe8] sm:$0xff] }
 0xd9d   : > { %4140 = vpow2.f32 %v3073_v16  ;;  %v3866_v16 = vld [vmem:[%s5855_s2 + $0xf0] sm:$0xff] }
 0xd9e   : > { %4142 = vrcp.f32 %v3075_v46 }
 0xda3   : > { %v4141_v57 = vpop.eup %4140 }
 0xda4   : > { %v3076_v51 = vadd.f32 1.0, %v4141_v57  ;;  %v4143_v29 = vpop.eup %4142 }
 0xda5   : > { %v3079_v35 = vmul.f32 %v4143_v29, %v3065_v8  ;;  %v3233_v8 = vpop.permute.xlu0 %3232 }
 0xda6   : > { %4144 = vrcp.f32 %v3076_v51 }
 0xda7   : > { %v3081_v43 = vadd.f32 %v3079_v35, %v2998_v52  ;;  %v3243_v35 = vpop.permute.xlu1 %3242 }
 0xda9   : > { %v3083_v9 = vmul.f32 0.70710677, %v3081_v43 }
 0xdac   : > { %v4145_v55 = vpop.eup %4144 }
 0xdad   : > { %v3080_v4 = vmul.f32 %v4145_v55, %v3066_v59 }
 0xdaf   : > { %v3082_v30 = vadd.f32 %v3080_v4, %v2999_v2  ;;  %v5924_v2 = vld [vmem:[#allocation45_spill] sm:$0xff] }
 0xdb1   : > { %v3084_v37 = vmul.f32 0.70710677, %v3082_v30 }
 0xdb3   : > { %3116 = vmatpush.msrb.mxu1 %v3084_v37 }
 0xdb5   : > { %3117 = vmatpush.msrb.mxu1 %v3083_v9 }
 0xdb6   : > { %3860 = vmatmul.msk.f32.vlgmr.msrb.gmra.mxu1 %vm774_vm0, %v3856_v60 }
 0xdbe   : > { %3861 = vmatmul.msk.f32.gmra.mxu1 %vm774_vm0, %v3857_v53  ;;  %v3262_v53 = vld [vmem:[%s5928_s11 + $0x8] sm:$0xff] }
 0xdc6   : > { %3862 = vmatmul.msk.f32.gmra.mxu1 %vm774_vm0, %v3858_v62  ;;  %v3263_v62 = vld [vmem:[%s5928_s11 + $0x10] sm:$0xff] }
 0xdce   : > { %3863 = vmatmul.msk.f32.gmra.mxu1 %vm774_vm0, %v3859_v26 }
 0xe33   : > { %v3119_v44 = vpop.f32.mrf.mxu1 }
 0xe34   : > { %v3147_v52 = vmul.f32 %v5924_v2, %v3119_v44 }
 0xe36   : > { %v3167_v49 = vadd.f32 %v5926_v38, %v3147_v52  ;;  %v3867_v38 = vld [vmem:[%s5855_s2 + $0xf8] sm:$0xff]  ;;  %s3664_s2 = sshll.u32 %s4503_s3, 1 }
 0xe3b   : > { %v3122_v5 = vpop.f32.mrf.mxu1 }
 0xe3c   : > { %v3148_v61 = vmul.f32 %v5925_v1, %v3122_v5  ;;  %v3310_v5 = vld [vmem:[%s5791_s13] sm:$0xff] }
 0xe3d   : > { %3316 = vperm.xlu0 %4018, %v3310_v5  }
 0xe3e   : > { %v3168_v14 = vadd.f32 %v5927_v40, %v3148_v61  ;;  %v3380_v61 = vld [vmem:[%s5792_s14] sm:$0xff] }
 0xe43   : > { %v3125_v54 = vpop.f32.mrf.mxu1 }
 0xe44   : > { %v3149_v63 = vmul.f32 %v5920_v7, %v3125_v54  ;;  %v3426_v7 = vld [vmem:[%s5795_s17] sm:$0x1f] }
 0xe45   : > { %3429 = vperm.xlu0 %4018, %v3426_v7  }
 0xe46   : > { %v3169_v6 = vadd.f32 %v5921_v42, %v3149_v63  ;;  %v3311_v63 = vld [vmem:[%s5791_s13 + $0x8] sm:$0xff]  ;;  %v3382_v42 = vld [vmem:[%s5793_s15] sm:$0xff] }
 0xe47   : > { %3321 = vperm.xlu2 %4017, %v3311_v63  }
 0xe48   : > { %v3171_v56 = vsub.f32 0.0, %v3169_v6 }
 0xe4a   : > { %v3173_v19 = vmul.f32 1.442695, %v3171_v56  ;;  %v3306_v56 = vld [vmem:[%s5790_s12] sm:$0xff] }
 0xe4b   : > { %v3128_v27 = vpop.f32.mrf.mxu1 }
 0xe4c   : > { %4146 = vpow2.f32 %v3173_v19  ;;  %v3150_v58 = vmul.f32 %v5922_v21, %v3128_v27  ;;  %v3312_v19 = vld [vmem:[%s5791_s13 + $0x10] sm:$0xff]  ;;  %v3307_v27 = vld [vmem:[%s5790_s12 + $0x8] sm:$0xff] }
 0xe4d   : > { %v3308_v21 = vld [vmem:[%s5790_s12 + $0x10] sm:$0xff] }
 0xe4e   : > { %v3170_v0 = vadd.f32 %v5923_v10, %v3150_v58  ;;  %v3383_v58 = vld [vmem:[%s5793_s15 + $0x8] sm:$0x3]  ;;  %v3309_v10 = vld [vmem:[%s5790_s12 + $0x18] sm:$0x7f] }
 0xe4f   : > { %3386 = vperm.xlu2 %4017, %v3382_v42   ;;  %3391 = vperm.xlu1 %4019, %v3383_v58  }
 0xe50   : > { %v3172_v39 = vsub.f32 0.0, %v3170_v0  ;;  %v3313_v0 = vld [vmem:[%s5791_s13 + $0x18] sm:$0x7f] }
 0xe52   : > { %v4147_v11 = vpop.eup %4146  ;;  %v3175_v28 = vmul.f32 1.442695, %v3172_v39 }
 0xe53   : > { %v3177_v50 = vadd.f32 1.0, %v4147_v11  ;;  %v3462_v11 = vld [vmem:[%s5797_s19] sm:$0x3] }
 0xe54   : > { %4148 = vpow2.f32 %v3175_v28 }
 0xe55   : > { %4150 = vrcp.f32 %v3177_v50 }
 0xe57   : > { %3326 = vperm.xlu2 %4017, %v3312_v19   ;;  %3331 = vperm.xlu1 %4019, %v3313_v0  }
 0xe5a   : > { %v4149_v45 = vpop.eup %4148 }
 0xe5b   : > { %v3178_v33 = vadd.f32 1.0, %v4149_v45  ;;  %v4151_v34 = vpop.eup %4150 }
 0xe5c   : > { %v3181_v48 = vmul.f32 %v4151_v34, %v3167_v49  ;;  %v3381_v34 = vld [vmem:[%s5792_s14 + $0x8] sm:$0x3] }
 0xe5d   : > { %4152 = vrcp.f32 %v3178_v33 }
 0xe5e   : > { %v3183_v20 = vadd.f32 %v3181_v48, %v3083_v9 }
 0xe5f   : > { %3465 = vperm.xlu1 %4019, %v3462_v11  }
 0xe60   : > { %v3185_v24 = vmul.f32 0.70710677, %v3183_v20 }
 0xe63   : > { %v4153_v41 = vpop.eup %4152 }
 0xe64   : > { %v3182_v32 = vmul.f32 %v4153_v41, %v3168_v14 }
 0xe66   : > { %v3184_v3 = vadd.f32 %v3182_v32, %v3084_v37 }
 0xe68   : > { %v3186_v18 = vmul.f32 0.70710677, %v3184_v3 }
 0xe6a   : > { %3218 = vmatpush.msra.mxu2 %v3186_v18 }
 0xe6c   : > { %3219 = vmatpush.msra.mxu2 %v3185_v24 }
 0xe6d   : > { %3868 = vmatmul.msk.f32.vlgmr.msra.gmra.mxu2 %vm774_vm0, %v3864_v12 }
 0xe75   : > { %3869 = vmatmul.msk.f32.gmra.mxu2 %vm774_vm0, %v3865_v22 }
 0xe7d   : > { %3870 = vmatmul.msk.f32.gmra.mxu2 %vm774_vm0, %v3866_v16 }
 0xe85   : > { %3871 = vmatmul.msk.f32.gmra.mxu2 %vm774_vm0, %v3867_v38 }
 0xea1   : > { %v3322_v50 = vpop.permute.xlu2 %3321 }
 0xea9   : > { %v3387_v48 = vpop.permute.xlu2 %3386 }
 0xeaf   : > { %v3317_v28 = vpop.permute.xlu0 %3316 }
 0xeb1   : > { %v3327_v22 = vpop.permute.xlu2 %3326 }
 0xec1   : > { %v3392_v40 = vpop.permute.xlu1 %3391 }
 0xec9   : > { %v3332_v18 = vpop.permute.xlu1 %3331 }
 0xef0   : > { %v3221_v46 = vpop.f32.mrf.mxu2 }
 0xef1   : > { %v3239_v59 = vmul.f32 %v3233_v8, %v3221_v46 }
 0xef3   : > { %v3249_v55 = vadd.f32 %v3243_v35, %v3239_v59 }
 0xef8   : > { %v3224_v57 = vpop.f32.mrf.mxu2 }
 0xef9   : > { %v3425_v57 = vld [vmem:[%s5794_s16] sm:$0x1f] }
 0xf00   : > { %v3226_v51 = vpop.f32.mrf.mxu2 }
 0xf01   : > { %v3240_v25 = vmul.f32 %v5446_v36, %v3226_v51  ;;  %v3261_v36 = vld [vmem:[%s5928_s11] sm:$0xff] }
 0xf03   : > { %v3250_v17 = vadd.f32 %v3247_v31, %v3240_v25  ;;  %v3461_v31 = vld [vmem:[%s5796_s18] sm:$0x3] }
 0xf05   : > { %v3251_v47 = vsub.f32 0.0, %v3250_v17 }
 0xf07   : > { %v3252_v29 = vmul.f32 1.442695, %v3251_v47  ;;  %v3430_v47 = vpop.permute.xlu0 %3429 }
 0xf08   : > { %v3229_v17 = vpop.f32.mrf.mxu2 }
 0xf09   : > { %4154 = vpow2.f32 %v3252_v29 }
 0xf0f   : > { %v4155_v23 = vpop.eup %4154 }
 0xf10   : > { %v3254_v15 = vadd.f32 1.0, %v4155_v23 }
 0xf12   : > { %4156 = vrcp.f32 %v3254_v15 }
 0xf18   : > { %v4157_v4 = vpop.eup %4156 }
 0xf19   : > { %v3256_v30 = vmul.f32 %v4157_v4, %v3249_v55 }
 0xf1b   : > { %v3257_v43 = vadd.f32 %v3256_v30, %v3185_v24 }
 0xf1d   : > { %v3258_v37 = vmul.f32 0.70710677, %v3257_v43 }
 0xf1f   : > { %v3259_v9 = vmax.f32 %v3258_v37, 0.0 }
 0xf21   : > { %v3260_v60 = vadd.f32 %v3259_v9, %v5459_v13  ;;  %v3264_v13 = vld [vmem:[%s5928_s11 + $0x18] sm:$0xff]  ;;  %s4192_s11 = sshra.s32 %s3522_s30, 4  ;;  %s4193_s11 = int_to_ptr.hbm [resolvable:$true] %s4192_s11 }
 0xf22   : > { %s4194_s0 = scalar_lea.hbm %s4193_s11, 8  ;;  %p4199_p3 = scmp.lt.s32.totalorder %s4193_s11, %s5798_s20 }
 0xf23   : > { %3292 = vmatpush.msra.mxu3 %v3260_v60  ;;  %p4195_p0 = scmp.ne.s32.totalorder %s4193_s11, %s4194_s0  ;;  %p4200_p4 = scmp.lt.s32.totalorder %s4198_s4, %s4194_s0 }
 0xf24   : > { %3872 = vmatmul.msk.f32.vlgmr.msra.gmra.mxu3 %vm1160_vm1, %v3261_v36 }
 0xf25   : > { %p4196_p1 = pnand %p4195_p0, %p4445_p6  ;;  %p4201_p5 = por %p4200_p4, %p4199_p3 }
 0xf27   : > { %p4197_p2 = pneg %p4196_p1 }
 0xf29   : > { %p4202_p7 = pnand %p4201_p5, %p4197_p2 }
 0xf2c   : > { %3873 = vmatmul.msk.f32.gmra.mxu3 %vm1160_vm1, %v3262_v53 }
 0xf34   : > { %3874 = vmatmul.msk.f32.gmra.mxu3 %vm1160_vm1, %v3263_v62 }
 0xf3c   : > { %3875 = vmatmul.msk.f32.gmra.mxu3 %vm1160_vm1, %v3264_v13  ;;  %vm3334_vm1 = vcmask 261120  }
 0xfa7   : > { %v3294_v26 = vpop.f32.mrf.mxu3 }
 0xfaf   : > { %v3297_v44 = vpop.f32.mrf.mxu3 }
 0xfb7   : > { %v3300_v54 = vpop.f32.mrf.mxu3 }
 0xfbf   : > { %v3303_v6 = vpop.f32.mrf.mxu3 }
 0xfc0   : > { %3359 = vmatpush.msrb.mxu0 %v3303_v6 }
 0xfc2   : > { %3360 = vmatpush.msrb.mxu0 %v3300_v54 }
 0xfc4   : > { %3361 = vmatpush.msrb.mxu0 %v3297_v44 }
 0xfc6   : > { %3362 = vmatpush.msrb.mxu0 %v3294_v26 }
 0xfc7   : > { %3876 = vmatmul.msk.f32.vlgmr.msrb.gmra.mxu0 %vm3334_vm1, %v3306_v56 }
 0xfcf   : > { %3877 = vmatmul.msk.f32.gmra.mxu0 %vm3334_vm1, %v3307_v27 }
 0xfd7   : > { %3878 = vmatmul.msk.f32.gmra.mxu0 %vm3334_vm1, %v3308_v21 }
 0xfdf   : > { %3879 = vmatmul.msk.f32.gmra.mxu0 %vm3334_vm1, %v3309_v10 }
0x1044   : > { %v3364_v39 = vpop.f32.mrf.mxu0 }
0x1045   : > { %v3365_v33 = vadd.f32 %v3364_v39, %v3317_v28 }
0x1047   : > { %v3376_v1 = vmax.f32 %v3365_v33, 0.0 }
0x104c   : > { %v3367_v45 = vpop.f32.mrf.mxu0 }
0x104d   : > { %v3368_v2 = vadd.f32 %v3367_v45, %v3322_v50 }
0x104f   : > { %v3377_v52 = vmax.f32 %v3368_v2, 0.0 }
0x1051   : > { %3414 = vmatpush.msra.mxu1 %v3377_v52 }
0x1053   : > { %3415 = vmatpush.msra.mxu1 %v3376_v1 }
0x1054   : > { %3880 = vmatmul.msk.f32.vlgmr.msra.gmra.mxu1 %vm774_vm0, %v3380_v61  ;;  %v3370_v49 = vpop.f32.mrf.mxu0 }
0x1055   : > { %v3371_v16 = vadd.f32 %v3370_v49, %v3327_v22 }
0x1057   : > { %v3378_v25 = vmax.f32 %v3371_v16, 0.0 }
0x105c   : > { %3881 = vmatmul.msk.f32.gmra.mxu1 %vm774_vm0, %v3381_v34  ;;  %v3373_v32 = vpop.f32.mrf.mxu0  ;;  %vm3432_vm0 = vcmask 80896  }
0x105d   : > { %v3374_v12 = vadd.f32 %v3373_v32, %v3332_v18 }
0x105f   : > { %v3379_v51 = vmax.f32 %v3374_v12, 0.0 }
0x10d1   : > { %v3417_v14 = vpop.f32.mrf.mxu1 }
0x10d2   : > { %v3418_v3 = vadd.f32 %v3417_v14, %v3387_v48 }
0x10d4   : > { %v3423_v46 = vmax.f32 %v3418_v3, 0.0 }
0x10d9   : > { %v3420_v41 = vpop.f32.mrf.mxu1 }
0x10da   : > { %v3421_v20 = vadd.f32 %v3420_v41, %v3392_v40 }
0x10dc   : > { %v3424_v24 = vmax.f32 %v3421_v20, 0.0 }
0x10de   : > { %3882 = vmatpush.msk.msrb.mxu2 %vm3436_vm4, %v3424_v24 }
0x10e0   : > { %3455 = vmatpush.msrb.mxu2 %v3423_v46 }
0x10e1   : > { %3883 = vmatmul.msk.f32.vlgmr.msrb.gmra.mxu2 %vm3432_vm0, %v3425_v57 }
0x10e2   : > { %3884 = vmatpush.msk.msra.mxu2 %vm3472_vm5, %v3379_v51 }
0x10e4   : > { %3491 = vmatpush.msra.mxu2 %v3378_v25 }
0x10e9   : > { %3885 = vmatmul.msk.f32.vlgmr.msra.gmra.mxu2 %vm3468_vm6, %v3461_v31 }
0x1164   : > { %v3457_v29 = vpop.f32.mrf.mxu2 }
0x1165   : > { %v3458_v23 = vadd.f32 %v3457_v29, %v3430_v47 }
0x1167   : > { %3460 = vst [vmem:[%s724_s27] sm:$0x1f] %v3458_v23 }
0x1168   : > { %4205 = shalt.err (!%p4202_p7)
}
0x1169   : > { %3894 = dma.vmem_to_hbm [thread:$0]  (%p4445_p6), %s3520_s28, 128, %s3522_s30, %s3499_s10   ;;  %v3466_v8 = vpop.permute.xlu1 %3465 }
0x116a   : > { %s731_s8 = scalar_lea.vmem [#allocation5], %s3664_s2  ;;  %s3535_s26 = sshll.u32 %s3531_s9, 4  ;;  %s3536_s26 = int_to_ptr.hbm [resolvable:$true] %s3535_s26 }
0x116b   : > { %s3533_s27 = sshll.u32 %s731_s8, 4  ;;  %s3504_s24 = scalar_lea.sflag [#allocation6], %s4503_s3  ;;  %s3534_s27 = int_to_ptr.vmem [resolvable:$true] %s3533_s27 }
0x116c   : > { %v3493_v15 = vpop.f32.mrf.mxu2  ;;  %s4220_s11 = sshra.s32 %s3536_s26, 4  ;;  %s4226_s10 = scalar_lea.hbm %s5799_s21, 4  ;;  %s4221_s11 = int_to_ptr.hbm [resolvable:$true] %s4220_s11 }
0x116d   : > { %v3494_v59 = vadd.f32 %v3493_v15, %v3466_v8  ;;  %s4222_s0 = scalar_lea.hbm %s4221_s11, 2  ;;  %p4227_p13 = scmp.lt.s32.totalorder %s4221_s11, %s5799_s21 }
0x116e   : > { %p4223_p10 = scmp.ne.s32.totalorder %s4221_s11, %s4222_s0  ;;  %p4228_p0 = scmp.lt.s32.totalorder %s4226_s10, %s4222_s0 }
0x116f   : > { %3496 = vst [vmem:[%s731_s8] sm:$0x3] %v3494_v59 }
0x1170   : > { %p4224_p11 = pnand %p4223_p10, %p4445_p6  ;;  %p4229_p1 = por %p4228_p0, %p4227_p13 }
0x1172   : > { %p4225_p12 = pneg %p4224_p11 }
0x1174   : > { %p4230_p2 = pnand %p4229_p1, %p4225_p12 }
0x1176   : > { %4233 = shalt.err (!%p4230_p2)
}
0x1177   : > { %3895 = dma.vmem_to_hbm [thread:$0]  (%p4445_p6), %s3534_s27, 32, %s3536_s26, %s3504_s24  }
0x1178 PF: > { %s5929_s3 = sld [smem:[#allocation9_spill]]  ;;  %p3899_p3 = pnand %p3658_p9, %p4449_p8 }
0x117a   : > { %p3900_p4 = pneg %p3899_p3 }
0x117e   : > { %s3550_s4 = sand.u32 1, %s5929_s3  }
0x117f   : > { %s3551_s5 = scalar_lea.sflag [#allocation4], %s3550_s4 }
0x1180   : > { %4251 = dma.done.wait (%p3900_p4), %s3551_s5, 128  }
0x1181   : > { %4253 = vsyncadd (%p3900_p4), %s3551_s5, 4294967168  ;;  %s3561_s29 = scalar_lea.sflag [#allocation6], %s3550_s4 }
0x1182   : > { %4255 = dma.done.wait (%p3900_p4), %s3561_s29, 32  }
0x1183   : > { %4257 = vsyncadd (%p3900_p4), %s3561_s29, 4294967264  ;;  %s5932_s30 = sld [smem:[#allocation13_spill]] }
0x1184   : > { %s5933_s3 = sld [smem:[#allocation10_spill]] }
0x1185   : > { %s5934_s28 = sld [smem:[#allocation11_spill]] }
0x1186   : > { %s5935_s29 = sld [smem:[#allocation14_spill]] }
0x1189   : > { %p36_p6 = scmp.ge.s32.totalorder %s5932_s30, 4  }
0x118b   :  { %38 = sbr.rel (!%p36_p6) target bundleno = 18 (0x12), region = 216 }
0x1190   :  { %3573 = vsyncpa [#allocation4], 1 }
0x1191   :  { %3575 = vsyncpa [#allocation4 + $0x1], 1 }
0x1192   :  { %3576 = vsyncpa [#allocation6], 1 }
0x1193   :  { %3578 = vsyncpa [#allocation6 + $0x1], 1 }

</bundles_post_ra>
